<compile_context>
chip_gen: v7x
topology: tpu7x:2x2x1
jax: 0.10.0
libtpu: 0.0.40
codegen_flags: <defaults>
</compile_context>

<pallas_src>
import math
import functools

import jax
import jax.numpy as jnp
from jax.experimental import pallas as pl
from jax.experimental.pallas import tpu as pltpu

LN_EPS = 1e-5  # PyTorch nn.LayerNorm default


# ---------------------------------------------------------------------------
# helpers usable inside kernels
# ---------------------------------------------------------------------------
def _layernorm(x, g, b):
    mu = jnp.mean(x, axis=-1, keepdims=True)
    var = jnp.mean((x - mu) ** 2, axis=-1, keepdims=True)
    return (x - mu) * jax.lax.rsqrt(var + LN_EPS) * g + b


def _gelu_tanh(x):
    # tanh-form GELU: the transcendental goes to the EUP slot instead of a long
    # VALU polynomial. Works in the dtype of x (bf16 in the MLP kernel).
    c = 0.7978845608028654  # sqrt(2/pi)
    return 0.5 * x * (1.0 + jnp.tanh(c * (x + 0.044715 * x * x * x)))


# ---------------------------------------------------------------------------
# VMEM capacity / footprint-aware tile selection
# ---------------------------------------------------------------------------
def _vmem_caps():
    """(per-step footprint budget, vmem_limit_bytes) derived from the chip."""
    cap = 64 * 1024 * 1024  # conservative default (v7x per-TC VMEM)
    try:
        info = pltpu.get_tpu_info()
        cap = int(getattr(info, "vmem_capacity_bytes", cap) or cap)
    except Exception:
        pass
    budget = int(cap * 0.62)                       # ~40 MB on v7x, ~80 MB on v5e/v6e
    limit = int(min(cap * 0.85, 112 * 1024 * 1024))
    return budget, limit


def _attn_step_bytes(sb, n, C, has_fc):
    """Rough per-grid-step VMEM footprint of the fused attention kernel."""
    rows = sb * n
    byt = rows * C * 4 * 2 * 2            # input + output row blocks, double-buffered
    byt += rows * C * 4 * 2               # x (f32) + xn (f32)
    byt += rows * 3 * C * 2               # qkv (bf16)
    byt += rows * C * 2                   # per-head output scratch (bf16)
    byt += sb * n * n * (4 + 2)           # one head's scores f32 + probs bf16
    byt += rows * C * 4                   # projection result (f32)
    w_elems = 3 * C * C + C * C + (C * C if has_fc else 0)
    byt += w_elems * 2                    # bf16 weights (single-buffered)
    return byt


def _pick_sb(nseq, seq_len, C, has_fc, budget, row_align, rows_soft_cap=2048):
    """Sequences per grid step: divides nseq, keeps the row block aligned,
    fits the VMEM budget, and prefers >= 2 grid steps (megacore)."""
    valid = [sb for sb in range(1, nseq + 1)
             if nseq % sb == 0
             and ((sb * seq_len) % row_align == 0 or sb == nseq)]
    fitting = [sb for sb in valid
               if _attn_step_bytes(sb, seq_len, C, has_fc) <= budget]
    if not fitting:
        return min(valid)
    capped = [sb for sb in fitting if sb * seq_len <= rows_soft_cap] or [min(fitting)]
    multi = [sb for sb in capped if nseq // sb >= 2]
    return max(multi) if multi else max(capped)


def _mlp_step_bytes(rows, C, hidden):
    byt = rows * C * (4 * 2 + 2 * 2 + 4 * 2)   # a, b, out row blocks (double-buffered)
    byt += rows * C * 4 * 2                     # x + xn (f32)
    byt += rows * hidden * (4 + 2)              # fc1 f32 + bf16 gelu
    byt += rows * C * 4                         # fc2 result
    byt += (2 * C * hidden + hidden + C) * 2    # bf16 weights + biases
    return byt


def _pick_mlp_tile(R, C, hidden, budget):
    for tn in (1024, 512, 256, 128, 64, 32, 16):
        if tn <= R and _mlp_step_bytes(tn, C, hidden) <= budget:
            return tn
    return R


# ---------------------------------------------------------------------------
# weight BlockSpec: single-buffered VMEM-resident when supported
# ---------------------------------------------------------------------------
_UNBLOCKED_VMEM_OK = None


def _probe_unblocked_vmem():
    """Probe whether whole-array VMEM inputs (no block_shape) work with a grid."""
    try:
        def k(w_ref, o_ref):
            o_ref[...] = w_ref[...] + 1.0

        f = pl.pallas_call(
            k,
            out_shape=jax.ShapeDtypeStruct((16, 128), jnp.float32),
            grid=(2,),
            in_specs=[pl.BlockSpec(memory_space=pltpu.MemorySpace.VMEM)],
            out_specs=pl.BlockSpec((8, 128), lambda i: (i, 0)),
        )
        jax.block_until_ready(f(jnp.zeros((8, 128), jnp.float32)))
        return True
    except Exception:
        return False


def _weight_spec(shape):
    """Spec for a grid-invariant operand (weights / biases / LN params)."""
    global _UNBLOCKED_VMEM_OK
    if _UNBLOCKED_VMEM_OK is None:
        _UNBLOCKED_VMEM_OK = _probe_unblocked_vmem()
    if _UNBLOCKED_VMEM_OK:
        # whole array resident in VMEM, not double-buffered across grid steps
        return pl.BlockSpec(memory_space=pltpu.MemorySpace.VMEM)
    nd = len(shape)
    return pl.BlockSpec(shape, lambda i, _nd=nd: (0,) * _nd)


# ---------------------------------------------------------------------------
# Pallas kernels
# ---------------------------------------------------------------------------
def _mha(xn, wqkv_ref, wproj_ref, bproj_ref, head_scr, sb, n, num_heads, hd):
    """Multi-head self attention on `sb` packed sequences of length `n`.

    xn: (sb*n, C) f32 (already layer-normed). Softmax scale is pre-folded into
    the Q columns of wqkv. The qkv intermediate is bf16; per-head outputs are
    written into the bf16 VMEM scratch `head_scr` at their column offset and the
    output projection is a single full-width matmul against wproj.
    """
    C = num_heads * hd
    rows = sb * n
    qkv = jnp.dot(xn.astype(jnp.bfloat16), wqkv_ref[...],
                  preferred_element_type=jnp.float32).astype(jnp.bfloat16)
    qkv = qkv.reshape(sb, n, 3 * C)
    # TODO(synk): per-head (hd-wide) q/k/v slices are not 128-lane aligned for
    # hd < 128; a head-pair 4-D einsum would fix that but is kept out for
    # lowering robustness.
    for h in range(num_heads):                                    # static unroll
        qh = qkv[:, :, h * hd:(h + 1) * hd]
        kh = qkv[:, :, C + h * hd:C + (h + 1) * hd]
        vh = qkv[:, :, 2 * C + h * hd:2 * C + (h + 1) * hd]
        s = jnp.einsum("bqd,bkd->bqk", qh, kh,
                       preferred_element_type=jnp.float32)        # (sb, n, n)
        s = s - jnp.max(s, axis=-1, keepdims=True)
        p = jnp.exp(s)
        p = p * pl.reciprocal(jnp.sum(p, axis=-1, keepdims=True), approx=True)
        oh = jnp.einsum("bqk,bkd->bqd", p.astype(jnp.bfloat16), vh,
                        preferred_element_type=jnp.float32)       # (sb, n, hd)
        head_scr[:, h * hd:(h + 1) * hd] = oh.reshape(rows, hd).astype(jnp.bfloat16)
    # single full-contraction output projection (K = C, not K = hd)
    y = jnp.dot(head_scr[...], wproj_ref[...], preferred_element_type=jnp.float32)
    return y + bproj_ref[...]


def _attn_kernel(x_ref, g_ref, bn_ref, wqkv_ref, wproj_ref, bproj_ref, o_ref,
                 head_scr, *, seq_len, num_heads):
    rows, C = x_ref.shape
    sb = rows // seq_len
    hd = C // num_heads
    x = x_ref[...].astype(jnp.float32)
    xn = _layernorm(x, g_ref[...], bn_ref[...])
    y = _mha(xn, wqkv_ref, wproj_ref, bproj_ref, head_scr, sb, seq_len, num_heads, hd)
    o_ref[...] = y.astype(o_ref.dtype)


def _attn_fc_res_kernel(x_ref, g_ref, bn_ref, wqkv_ref, wproj_ref, bproj_ref,
                        wfc_ref, bfc_ref, o_ref, head_scr, *, seq_len, num_heads):
    # LN -> MHA -> proj -> temporal_fc -> + residual, fully fused (one HBM pass).
    rows, C = x_ref.shape
    sb = rows // seq_len
    hd = C // num_heads
    x = x_ref[...].astype(jnp.float32)
    xn = _layernorm(x, g_ref[...], bn_ref[...])
    y = _mha(xn, wqkv_ref, wproj_ref, bproj_ref, head_scr, sb, seq_len, num_heads, hd)
    z = jnp.dot(y.astype(jnp.bfloat16), wfc_ref[...],
                preferred_element_type=jnp.float32) + bfc_ref[...]
    o_ref[...] = (x + z).astype(o_ref.dtype)


def _mlp_res_kernel(a_ref, b_ref, g_ref, bn_ref, w1_ref, b1_ref, w2_ref, b2_ref,
                    o_ref):
    # x = a + b (the module's concat(...)+concat(...)) fused with
    # LN -> fc1 -> GELU(bf16) -> fc2 -> + residual; row-tiled over the sequence.
    x = a_ref[...].astype(jnp.float32) + b_ref[...].astype(jnp.float32)
    xn = _layernorm(x, g_ref[...], bn_ref[...])
    h = jnp.dot(xn.astype(jnp.bfloat16), w1_ref[...],
                preferred_element_type=jnp.float32) + b1_ref[...]
    h = _gelu_tanh(h.astype(jnp.bfloat16))          # bf16 elementwise / EUP
    y = jnp.dot(h, w2_ref[...],
                preferred_element_type=jnp.float32) + b2_ref[...]
    o_ref[...] = (x + y).astype(o_ref.dtype)


# ---------------------------------------------------------------------------
# pallas_call wrappers
# ---------------------------------------------------------------------------
def pallas_attention(x_rows, seq_len, norm_p, attn_p, num_heads, fc_p,
                     budget, vmem_limit):
    """x_rows: (num_seq * seq_len, C) with sequences stored contiguously.
    Computes proj(MHA(LN(x))); if fc_p is given, also applies the extra linear
    (temporal_fc) and adds the residual x (fused temporal branch)."""
    R, C = x_rows.shape
    nseq = R // seq_len
    row_align = 16 if x_rows.dtype == jnp.bfloat16 else 8
    sb = _pick_sb(nseq, seq_len, C, fc_p is not None, budget, row_align)
    rows_blk = sb * seq_len
    grid = (nseq // sb,)

    g, b = norm_p
    hd = C // num_heads
    scale = hd ** (-0.5)
    # fold the softmax scale into the Q columns of wqkv; cast weights to bf16
    col_scale = jnp.concatenate([jnp.full((C,), scale, jnp.float32),
                                 jnp.ones((2 * C,), jnp.float32)])
    wqkv = (attn_p["wqkv"] * col_scale[None, :]).astype(jnp.bfloat16)
    wproj = attn_p["wproj"].astype(jnp.bfloat16)
    bproj = attn_p["bproj"]

    row_spec = pl.BlockSpec((rows_blk, C), lambda i: (i, 0))
    cparams = pltpu.CompilerParams(dimension_semantics=("parallel",),
                                   vmem_limit_bytes=vmem_limit)

    if fc_p is None:
        kern = functools.partial(_attn_kernel, seq_len=seq_len,
                                 num_heads=num_heads)
        ops = (x_rows, g, b, wqkv, wproj, bproj)
    else:
        wfc, bfc = fc_p
        kern = functools.partial(_attn_fc_res_kernel, seq_len=seq_len,
                                 num_heads=num_heads)
        ops = (x_rows, g, b, wqkv, wproj, bproj, wfc.astype(jnp.bfloat16), bfc)

    in_specs = [row_spec] + [_weight_spec(o.shape) for o in ops[1:]]
    return pl.pallas_call(
        kern,
        out_shape=jax.ShapeDtypeStruct((R, C), x_rows.dtype),
        grid=grid,
        in_specs=in_specs,
        out_specs=row_spec,
        scratch_shapes=[pltpu.VMEM((rows_blk, C), jnp.bfloat16)],
        compiler_params=cparams,
    )(*ops)


def pallas_mlp_residual(a_rows, b_rows, norm_p, mlp_p, budget, vmem_limit):
    """Returns x + MLP(LN(x)) with x = a + b, row-tiled over R."""
    R, C = a_rows.shape
    hidden = mlp_p["w1"].shape[1]
    tn = _pick_mlp_tile(R, C, hidden, budget)
    grid = (pl.cdiv(R, tn),)
    g, b = norm_p
    ops = (a_rows, b_rows, g, b,
           mlp_p["w1"].astype(jnp.bfloat16), mlp_p["b1"],
           mlp_p["w2"].astype(jnp.bfloat16), mlp_p["b2"])
    row_spec = pl.BlockSpec((tn, C), lambda i: (i, 0))
    in_specs = [row_spec, row_spec] + [_weight_spec(o.shape) for o in ops[2:]]
    return pl.pallas_call(
        _mlp_res_kernel,
        out_shape=jax.ShapeDtypeStruct((R, C), a_rows.dtype),
        grid=grid,
        in_specs=in_specs,
        out_specs=row_spec,
        compiler_params=pltpu.CompilerParams(
            dimension_semantics=("parallel",),
            vmem_limit_bytes=vmem_limit),
    )(*ops)


# ---------------------------------------------------------------------------
# Block forward (divided_space_time) — Pallas path
# ---------------------------------------------------------------------------
def block_forward_pallas(x, B, T, W, params, num_heads):
    _, Ntot, C = x.shape
    HW = (Ntot - 1) // T
    H = HW // W
    budget, vmem_limit = _vmem_caps()

    # ----- temporal attention + temporal_fc + residual (single fused kernel) ----
    # token order is h-major, then w, then t -> every T consecutive rows of
    # x[:, 1:, :] form one temporal sequence, so the reshape below is free.
    xt_rows = x[:, 1:, :].reshape(B * HW * T, C)
    xt_new = pallas_attention(
        xt_rows, T, params["temporal_norm1"], params["temporal_attn"], num_heads,
        fc_p=(params["temporal_fc_w"], params["temporal_fc_b"]),
        budget=budget, vmem_limit=vmem_limit)
    xt_new = xt_new.reshape(B, HW * T, C)   # == x[:,1:] + temporal_fc(attn(LN(.)))

    # ----- spatial attention -----
    init_cls = x[:, 0:1, :]                                              # (B,1,C)
    cls_rep = jnp.repeat(init_cls.astype(jnp.bfloat16), T, axis=1
                         ).reshape(B * T, 1, C)
    # TODO(synk): the (h w t)<->(t h w) relayouts remain plain-XLA transposes
    # (done in bf16 to halve HBM traffic); folding them into out_spec index_maps
    # would need Element-indexed blocks and is omitted for lowering robustness.
    xs = xt_new.astype(jnp.bfloat16).reshape(B, H, W, T, C)
    xs = jnp.transpose(xs, (0, 3, 1, 2, 4)).reshape(B * T, HW, C)
    xs = jnp.concatenate([cls_rep, xs], axis=1)                          # (BT,1+HW,C)
    n_sp = 1 + HW
    res_spatial = pallas_attention(
        xs.reshape(B * T * n_sp, C), n_sp, params["norm1"], params["attn"],
        num_heads, fc_p=None, budget=budget, vmem_limit=vmem_limit,
    ).reshape(B * T, n_sp, C)                                            # bf16

    cls_tok = jnp.mean(res_spatial[:, 0, :].reshape(B, T, C), axis=1,
                       keepdims=True).astype(jnp.bfloat16)
    res_sp = res_spatial[:, 1:, :].reshape(B, T, H, W, C)
    res_sp = jnp.transpose(res_sp, (0, 2, 3, 1, 4)).reshape(B, HW * T, C)

    # ----- final residual add fused into the MLP kernel (no x_new round trip) ---
    a_rows = jnp.concatenate([init_cls, xt_new], axis=1).reshape(B * Ntot, C)
    b_rows = jnp.concatenate([cls_tok, res_sp], axis=1).reshape(B * Ntot, C)
    out = pallas_mlp_residual(a_rows, b_rows, params["norm2"], params["mlp"],
                              budget, vmem_limit)
    return out.reshape(B, Ntot, C)


# ---------------------------------------------------------------------------
# Pure-JAX reference (exact f32, exact erf GELU) for in-script validation
# ---------------------------------------------------------------------------
def ref_attention(x, norm_p, attn_p, num_heads):
    g, b = norm_p
    xn = _layernorm(x, g[0], b[0])
    BB, N, C = x.shape
    hd = C // num_heads
    scale = hd ** (-0.5)
    qkv = xn @ attn_p["wqkv"]
    q, k, v = qkv[..., :C], qkv[..., C:2 * C], qkv[..., 2 * C:]
    split = lambda t: t.reshape(BB, N, num_heads, hd).transpose(0, 2, 1, 3)
    q, k, v = split(q), split(k), split(v)
    s = jnp.einsum("bhnd,bhmd->bhnm", q, k) * scale
    p = jax.nn.softmax(s, axis=-1)
    o = jnp.einsum("bhnm,bhmd->bhnd", p, v)
    o = o.transpose(0, 2, 1, 3).reshape(BB, N, C)
    return o @ attn_p["wproj"] + attn_p["bproj"][0]


def ref_mlp(x, norm_p, mlp_p):
    g, b = norm_p
    xn = _layernorm(x, g[0], b[0])
    h = xn @ mlp_p["w1"] + mlp_p["b1"][0]
    h = 0.5 * h * (1.0 + jax.lax.erf(h / math.sqrt(2.0)))   # exact GELU
    return h @ mlp_p["w2"] + mlp_p["b2"][0]


def block_forward_ref(x, B, T, W, params, num_heads):
    _, Ntot, C = x.shape
    HW = (Ntot - 1) // T
    H = HW // W
    xt = x[:, 1:, :]
    xt_r = xt.reshape(B * HW, T, C)
    res_t = ref_attention(xt_r, params["temporal_norm1"], params["temporal_attn"],
                          num_heads)
    res_t = res_t.reshape(B, HW * T, C)
    res_t = res_t @ params["temporal_fc_w"] + params["temporal_fc_b"][0]
    xt = x[:, 1:, :] + res_t

    init_cls = x[:, 0:1, :]
    cls_rep = jnp.repeat(init_cls, T, axis=1).reshape(B * T, 1, C)
    xs = xt.reshape(B, H, W, T, C)
    xs = jnp.transpose(xs, (0, 3, 1, 2, 4)).reshape(B * T, HW, C)
    xs = jnp.concatenate([cls_rep, xs], axis=1)
    res_s = ref_attention(xs, params["norm1"], params["attn"], num_heads)

    cls_tok = jnp.mean(res_s[:, 0, :].reshape(B, T, C), axis=1, keepdims=True)
    res_sp = res_s[:, 1:, :].reshape(B, T, H, W, C)
    res_sp = jnp.transpose(res_sp, (0, 2, 3, 1, 4)).reshape(B, HW * T, C)

    x_new = (jnp.concatenate([init_cls, xt], axis=1)
             + jnp.concatenate([cls_tok, res_sp], axis=1))
    return x_new + ref_mlp(x_new, params["norm2"], params["mlp"])


# ---------------------------------------------------------------------------
# deterministic parameter init
# ---------------------------------------------------------------------------
def init_params(key, dim, mlp_ratio=4.0):
    hidden = int(dim * mlp_ratio)
    ks = jax.random.split(key, 16)
    nrm = lambda k, shape, s=0.02: (s * jax.random.normal(k, shape)).astype(jnp.float32)
    ln = lambda: (jnp.ones((1, dim), jnp.float32), jnp.zeros((1, dim), jnp.float32))
    attn = lambda k1, k2, k3: {              # qkv_bias=False (module default)
        "wqkv": nrm(k1, (dim, 3 * dim)),
        "wproj": nrm(k2, (dim, dim)),
        "bproj": nrm(k3, (1, dim)),
    }
    return {
        "norm1": ln(),
        "attn": attn(ks[0], ks[1], ks[2]),
        "temporal_norm1": ln(),
        "temporal_attn": attn(ks[3], ks[4], ks[5]),
        "temporal_fc_w": nrm(ks[6], (dim, dim)),
        "temporal_fc_b": nrm(ks[7], (1, dim)),
        "norm2": ln(),
        "mlp": {
            "w1": nrm(ks[8], (dim, hidden)),
            "b1": nrm(ks[9], (1, hidden)),
            "w2": nrm(ks[10], (hidden, dim)),
            "b2": nrm(ks[11], (1, dim)),
        },
    }


# ---------------------------------------------------------------------------
if __name__ == "__main__":
    # small shapes consistent with the module: dim=32, heads=4, B=2, T=4, H=W=4
    B, T, H, W = 2, 4, 4, 4
    dim, num_heads = 32, 4
    N = 1 + H * W * T                       # CLS token + space-time tokens

    key = jax.random.PRNGKey(0)
    kx, kp = jax.random.split(key)
    x = jax.random.normal(kx, (B, N, dim), jnp.float32)
    params = init_params(kp, dim)

    # TODO(synk): DropPath (p=0.1) and Dropout are stochastic training-only ops;
    # implemented here as identity (eval / inference mode).
    out = block_forward_pallas(x, B, T, W, params, num_heads)
    out = jax.block_until_ready(out)

    ref = block_forward_ref(x, B, T, W, params, num_heads)
    ref = jax.block_until_ready(ref)

    assert out.shape == (B, N, dim)
    max_err = float(jnp.max(jnp.abs(out - ref)))
    # bf16 matmuls / relayouts (f32 accumulation), bf16 tanh-GELU and
    # approx-reciprocal softmax introduce small deviations vs the exact-f32
    # erf-GELU reference.
    assert jnp.allclose(out, ref, atol=5e-3, rtol=5e-3), max_err
    print("KERNEL_OK")
</pallas_src>

<mosaic_0001>
module attributes {stable_mosaic.version = 11 : i64} {
  func.func @k(%arg0: i32, %arg1: memref<8x128xf32, #tpu.memory_space<vmem>>, %arg2: memref<8x128xf32, #tpu.memory_space<vmem>>) attributes {dimension_semantics = [#tpu.dimension_semantics<arbitrary>], iteration_bounds = array<i64: 2>, scalar_prefetch = 0 : i64, scratch_operands = 0 : i64, tpu.core_type = #tpu.core_type<tc>, window_params = [{pipeline_mode = #tpu.pipeline_mode<synchronous>, transform_indices = @transform_0, window_bounds = array<i64: 8, 128>}, {transform_indices = @transform_1, window_bounds = array<i64: 8, 128>}]} {
    %c0 = arith.constant 0 : index
    %c0_0 = arith.constant 0 : index
    %0 = vector.load %arg1[%c0, %c0_0] : memref<8x128xf32, #tpu.memory_space<vmem>>, vector<8x128xf32>
    %cst = arith.constant 1.000000e+00 : f32
    %1 = vector.broadcast %cst : f32 to vector<8x128xf32>
    %2 = arith.addf %0, %1 : vector<8x128xf32>
    %c0_1 = arith.constant 0 : index
    %c0_2 = arith.constant 0 : index
    %3 = vector.load %arg2[%c0_1, %c0_2] : memref<8x128xf32, #tpu.memory_space<vmem>>, vector<8x128xf32>
    tpu.vector_store %arg2[%c0_1, %c0_2], %2 {strides = array<i32>} : memref<8x128xf32, #tpu.memory_space<vmem>>, vector<8x128xf32>,
    return
  }
  func.func @transform_0(%arg0: i32) -> (i32, i32) {
    %c0_i32 = arith.constant 0 : i32
    %c0_i32_0 = arith.constant 0 : i32
    %c0_i32_1 = arith.constant 0 : i32
    return %c0_i32, %c0_i32_0 : i32, i32
  }
  func.func @transform_1(%arg0: i32) -> (i32, i32) {
    %c0_i32 = arith.constant 0 : i32
    %c0_i32_0 = arith.constant 0 : i32
    return %arg0, %c0_i32 : i32, i32
  }
}

module attributes {stable_mosaic.version = 11 : i64} {
  func.func @_attn_fc_res_kernel(%arg0: i32, %arg1: memref<64x32xf32, #tpu.memory_space<vmem>>, %arg2: memref<1x32xf32, #tpu.memory_space<vmem>>, %arg3: memref<1x32xf32, #tpu.memory_space<vmem>>, %arg4: memref<32x96xbf16, #tpu.memory_space<vmem>>, %arg5: memref<32x32xbf16, #tpu.memory_space<vmem>>, %arg6: memref<1x32xf32, #tpu.memory_space<vmem>>, %arg7: memref<32x32xbf16, #tpu.memory_space<vmem>>, %arg8: memref<1x32xf32, #tpu.memory_space<vmem>>, %arg9: memref<64x32xf32, #tpu.memory_space<vmem>>, %arg10: memref<64x32xbf16, #tpu.memory_space<vmem>>) attributes {dimension_semantics = [#tpu.dimension_semantics<parallel>], iteration_bounds = array<i64: 2>, scalar_prefetch = 0 : i64, scratch_operands = 1 : i64, tpu.core_type = #tpu.core_type<tc>, window_params = [{transform_indices = @transform_0, window_bounds = array<i64: 64, 32>}, {pipeline_mode = #tpu.pipeline_mode<synchronous>, transform_indices = @transform_1, window_bounds = array<i64: 1, 32>}, {pipeline_mode = #tpu.pipeline_mode<synchronous>, transform_indices = @transform_2, window_bounds = array<i64: 1, 32>}, {pipeline_mode = #tpu.pipeline_mode<synchronous>, transform_indices = @transform_3, window_bounds = array<i64: 32, 96>}, {pipeline_mode = #tpu.pipeline_mode<synchronous>, transform_indices = @transform_4, window_bounds = array<i64: 32, 32>}, {pipeline_mode = #tpu.pipeline_mode<synchronous>, transform_indices = @transform_5, window_bounds = array<i64: 1, 32>}, {pipeline_mode = #tpu.pipeline_mode<synchronous>, transform_indices = @transform_6, window_bounds = array<i64: 32, 32>}, {pipeline_mode = #tpu.pipeline_mode<synchronous>, transform_indices = @transform_7, window_bounds = array<i64: 1, 32>}, {transform_indices = @transform_8, window_bounds = array<i64: 64, 32>}]} {
    %c0 = arith.constant 0 : index
    %c0_0 = arith.constant 0 : index
    %0 = vector.load %arg1[%c0, %c0_0] : memref<64x32xf32, #tpu.memory_space<vmem>>, vector<64x32xf32>
    %c0_1 = arith.constant 0 : index
    %c0_2 = arith.constant 0 : index
    %1 = vector.load %arg2[%c0_1, %c0_2] : memref<1x32xf32, #tpu.memory_space<vmem>>, vector<1x32xf32>
    %c0_3 = arith.constant 0 : index
    %c0_4 = arith.constant 0 : index
    %2 = vector.load %arg3[%c0_3, %c0_4] : memref<1x32xf32, #tpu.memory_space<vmem>>, vector<1x32xf32>
    %cst = arith.constant dense<0.000000e+00> : vector<64xf32>
    %3 = vector.multi_reduction <add>, %0, %cst [1] : vector<64x32xf32> to vector<64xf32>
    %4 = vector.shape_cast %3 : vector<64xf32> to vector<64x1xf32>
    %cst_5 = arith.constant 3.200000e+01 : f32
    %5 = vector.broadcast %cst_5 : f32 to vector<64x1xf32>
    %6 = arith.divf %4, %5 : vector<64x1xf32>
    %7 = vector.broadcast %6 : vector<64x1xf32> to vector<64x32xf32>
    %8 = arith.subf %0, %7 : vector<64x32xf32>
    %9 = arith.mulf %8, %8 : vector<64x32xf32>
    %cst_6 = arith.constant dense<0.000000e+00> : vector<64xf32>
    %10 = vector.multi_reduction <add>, %9, %cst_6 [1] : vector<64x32xf32> to vector<64xf32>
    %11 = vector.shape_cast %10 : vector<64xf32> to vector<64x1xf32>
    %cst_7 = arith.constant 3.200000e+01 : f32
    %12 = vector.broadcast %cst_7 : f32 to vector<64x1xf32>
    %13 = arith.divf %11, %12 : vector<64x1xf32>
    %14 = vector.broadcast %6 : vector<64x1xf32> to vector<64x32xf32>
    %15 = arith.subf %0, %14 : vector<64x32xf32>
    %cst_8 = arith.constant 9.99999974E-6 : f32
    %16 = vector.broadcast %cst_8 : f32 to vector<64x1xf32>
    %17 = arith.addf %13, %16 : vector<64x1xf32>
    %18 = math.rsqrt %17 : vector<64x1xf32>
    %19 = vector.broadcast %18 : vector<64x1xf32> to vector<64x32xf32>
    %20 = arith.mulf %15, %19 : vector<64x32xf32>
    %21 = vector.broadcast %1 : vector<1x32xf32> to vector<64x32xf32>
    %22 = arith.mulf %20, %21 : vector<64x32xf32>
    %23 = vector.broadcast %2 : vector<1x32xf32> to vector<64x32xf32>
    %24 = arith.addf %22, %23 : vector<64x32xf32>
    %25 = arith.truncf %24 : vector<64x32xf32> to vector<64x32xbf16>
    %c0_9 = arith.constant 0 : index
    %c0_10 = arith.constant 0 : index
    %26 = vector.load %arg4[%c0_9, %c0_10] : memref<32x96xbf16, #tpu.memory_space<vmem>>, vector<32x96xbf16>
    %cst_11 = arith.constant dense<0.000000e+00> : vector<64x96xf32>
    %27 = tpu.matmul %25, %26, %cst_11 {dimension_numbers = #tpu.dot_dimension_numbers<[1], [0], [0], [1], [0, 0, 1, 1], [], []>} : vector<64x32xbf16>, vector<32x96xbf16>, vector<64x96xf32> -> vector<64x96xf32>
    %28 = arith.truncf %27 : vector<64x96xf32> to vector<64x96xbf16>
    %29 = vector.shape_cast %28 : vector<64x96xbf16> to vector<16x4x96xbf16>
    %30 = vector.extract_strided_slice %29 {offsets = [0, 0, 0], sizes = [16, 4, 8], strides = [1, 1, 1]} : vector<16x4x96xbf16> to vector<16x4x8xbf16>
    %31 = vector.extract_strided_slice %29 {offsets = [0, 0, 32], sizes = [16, 4, 8], strides = [1, 1, 1]} : vector<16x4x96xbf16> to vector<16x4x8xbf16>
    %32 = vector.extract_strided_slice %29 {offsets = [0, 0, 64], sizes = [16, 4, 8], strides = [1, 1, 1]} : vector<16x4x96xbf16> to vector<16x4x8xbf16>
    "tpu.trace_start"() <{level = 10 : i32, message = "bqd,bkd->bqk"}> : () -> ()
    %cst_12 = arith.constant dense<0.000000e+00> : vector<16x4x4xf32>
    %33 = tpu.matmul %30, %31, %cst_12 {dimension_numbers = #tpu.dot_dimension_numbers<[2], [2], [1], [1], [0, 0, 0, 1, 1, 1], [0], [0]>} : vector<16x4x8xbf16>, vector<16x4x8xbf16>, vector<16x4x4xf32> -> vector<16x4x4xf32>
    "tpu.trace_stop"() : () -> ()
    %cst_13 = arith.constant dense<0xFF800000> : vector<16x4xf32>
    %34 = vector.multi_reduction <maximumf>, %33, %cst_13 [2] : vector<16x4x4xf32> to vector<16x4xf32>
    %35 = vector.shape_cast %34 : vector<16x4xf32> to vector<16x4x1xf32>
    %36 = vector.broadcast %35 : vector<16x4x1xf32> to vector<16x4x4xf32>
    %37 = arith.subf %33, %36 : vector<16x4x4xf32>
    %38 = math.exp %37 : vector<16x4x4xf32>
    %cst_14 = arith.constant dense<0.000000e+00> : vector<16x4xf32>
    %39 = vector.multi_reduction <add>, %38, %cst_14 [2] : vector<16x4x4xf32> to vector<16x4xf32>
    %40 = vector.shape_cast %39 : vector<16x4xf32> to vector<16x4x1xf32>
    %41 = tpu.reciprocal %40 {approx = true} : vector<16x4x1xf32> -> vector<16x4x1xf32>
    %42 = vector.broadcast %41 : vector<16x4x1xf32> to vector<16x4x4xf32>
    %43 = arith.mulf %38, %42 : vector<16x4x4xf32>
    %44 = arith.truncf %43 : vector<16x4x4xf32> to vector<16x4x4xbf16>
    "tpu.trace_start"() <{level = 10 : i32, message = "bqk,bkd->bqd"}> : () -> ()
    %cst_15 = arith.constant dense<0.000000e+00> : vector<16x4x8xf32>
    %45 = tpu.matmul %44, %32, %cst_15 {dimension_numbers = #tpu.dot_dimension_numbers<[2], [1], [1], [2], [0, 0, 0, 1, 1, 2], [0], [0]>} : vector<16x4x4xbf16>, vector<16x4x8xbf16>, vector<16x4x8xf32> -> vector<16x4x8xf32>
    "tpu.trace_stop"() : () -> ()
    %46 = vector.shape_cast %45 : vector<16x4x8xf32> to vector<64x8xf32>
    %47 = arith.truncf %46 : vector<64x8xf32> to vector<64x8xbf16>
    %c0_16 = arith.constant 0 : index
    %c0_17 = arith.constant 0 : index
    %48 = vector.load %arg10[%c0_16, %c0_17] : memref<64x32xbf16, #tpu.memory_space<vmem>>, vector<64x8xbf16>
    tpu.vector_store %arg10[%c0_16, %c0_17], %47 {strides = array<i32>} : memref<64x32xbf16, #tpu.memory_space<vmem>>, vector<64x8xbf16>,
    %49 = vector.extract_strided_slice %29 {offsets = [0, 0, 8], sizes = [16, 4, 8], strides = [1, 1, 1]} : vector<16x4x96xbf16> to vector<16x4x8xbf16>
    %50 = vector.extract_strided_slice %29 {offsets = [0, 0, 40], sizes = [16, 4, 8], strides = [1, 1, 1]} : vector<16x4x96xbf16> to vector<16x4x8xbf16>
    %51 = vector.extract_strided_slice %29 {offsets = [0, 0, 72], sizes = [16, 4, 8], strides = [1, 1, 1]} : vector<16x4x96xbf16> to vector<16x4x8xbf16>
    "tpu.trace_start"() <{level = 10 : i32, message = "bqd,bkd->bqk"}> : () -> ()
    %cst_18 = arith.constant dense<0.000000e+00> : vector<16x4x4xf32>
    %52 = tpu.matmul %49, %50, %cst_18 {dimension_numbers = #tpu.dot_dimension_numbers<[2], [2], [1], [1], [0, 0, 0, 1, 1, 1], [0], [0]>} : vector<16x4x8xbf16>, vector<16x4x8xbf16>, vector<16x4x4xf32> -> vector<16x4x4xf32>
    "tpu.trace_stop"() : () -> ()
    %cst_19 = arith.constant dense<0xFF800000> : vector<16x4xf32>
    %53 = vector.multi_reduction <maximumf>, %52, %cst_19 [2] : vector<16x4x4xf32> to vector<16x4xf32>
    %54 = vector.shape_cast %53 : vector<16x4xf32> to vector<16x4x1xf32>
    %55 = vector.broadcast %54 : vector<16x4x1xf32> to vector<16x4x4xf32>
    %56 = arith.subf %52, %55 : vector<16x4x4xf32>
    %57 = math.exp %56 : vector<16x4x4xf32>
    %cst_20 = arith.constant dense<0.000000e+00> : vector<16x4xf32>
    %58 = vector.multi_reduction <add>, %57, %cst_20 [2] : vector<16x4x4xf32> to vector<16x4xf32>
    %59 = vector.shape_cast %58 : vector<16x4xf32> to vector<16x4x1xf32>
    %60 = tpu.reciprocal %59 {approx = true} : vector<16x4x1xf32> -> vector<16x4x1xf32>
    %61 = vector.broadcast %60 : vector<16x4x1xf32> to vector<16x4x4xf32>
    %62 = arith.mulf %57, %61 : vector<16x4x4xf32>
    %63 = arith.truncf %62 : vector<16x4x4xf32> to vector<16x4x4xbf16>
    "tpu.trace_start"() <{level = 10 : i32, message = "bqk,bkd->bqd"}> : () -> ()
    %cst_21 = arith.constant dense<0.000000e+00> : vector<16x4x8xf32>
    %64 = tpu.matmul %63, %51, %cst_21 {dimension_numbers = #tpu.dot_dimension_numbers<[2], [1], [1], [2], [0, 0, 0, 1, 1, 2], [0], [0]>} : vector<16x4x4xbf16>, vector<16x4x8xbf16>, vector<16x4x8xf32> -> vector<16x4x8xf32>
    "tpu.trace_stop"() : () -> ()
    %65 = vector.shape_cast %64 : vector<16x4x8xf32> to vector<64x8xf32>
    %66 = arith.truncf %65 : vector<64x8xf32> to vector<64x8xbf16>
    %c0_22 = arith.constant 0 : index
    %c8 = arith.constant 8 : index
    %67 = vector.load %arg10[%c0_22, %c8] : memref<64x32xbf16, #tpu.memory_space<vmem>>, vector<64x8xbf16>
    tpu.vector_store %arg10[%c0_22, %c8], %66 {strides = array<i32>} : memref<64x32xbf16, #tpu.memory_space<vmem>>, vector<64x8xbf16>,
    %68 = vector.extract_strided_slice %29 {offsets = [0, 0, 16], sizes = [16, 4, 8], strides = [1, 1, 1]} : vector<16x4x96xbf16> to vector<16x4x8xbf16>
    %69 = vector.extract_strided_slice %29 {offsets = [0, 0, 48], sizes = [16, 4, 8], strides = [1, 1, 1]} : vector<16x4x96xbf16> to vector<16x4x8xbf16>
    %70 = vector.extract_strided_slice %29 {offsets = [0, 0, 80], sizes = [16, 4, 8], strides = [1, 1, 1]} : vector<16x4x96xbf16> to vector<16x4x8xbf16>
    "tpu.trace_start"() <{level = 10 : i32, message = "bqd,bkd->bqk"}> : () -> ()
    %cst_23 = arith.constant dense<0.000000e+00> : vector<16x4x4xf32>
    %71 = tpu.matmul %68, %69, %cst_23 {dimension_numbers = #tpu.dot_dimension_numbers<[2], [2], [1], [1], [0, 0, 0, 1, 1, 1], [0], [0]>} : vector<16x4x8xbf16>, vector<16x4x8xbf16>, vector<16x4x4xf32> -> vector<16x4x4xf32>
    "tpu.trace_stop"() : () -> ()
    %cst_24 = arith.constant dense<0xFF800000> : vector<16x4xf32>
    %72 = vector.multi_reduction <maximumf>, %71, %cst_24 [2] : vector<16x4x4xf32> to vector<16x4xf32>
    %73 = vector.shape_cast %72 : vector<16x4xf32> to vector<16x4x1xf32>
    %74 = vector.broadcast %73 : vector<16x4x1xf32> to vector<16x4x4xf32>
    %75 = arith.subf %71, %74 : vector<16x4x4xf32>
    %76 = math.exp %75 : vector<16x4x4xf32>
    %cst_25 = arith.constant dense<0.000000e+00> : vector<16x4xf32>
    %77 = vector.multi_reduction <add>, %76, %cst_25 [2] : vector<16x4x4xf32> to vector<16x4xf32>
    %78 = vector.shape_cast %77 : vector<16x4xf32> to vector<16x4x1xf32>
    %79 = tpu.reciprocal %78 {approx = true} : vector<16x4x1xf32> -> vector<16x4x1xf32>
    %80 = vector.broadcast %79 : vector<16x4x1xf32> to vector<16x4x4xf32>
    %81 = arith.mulf %76, %80 : vector<16x4x4xf32>
    %82 = arith.truncf %81 : vector<16x4x4xf32> to vector<16x4x4xbf16>
    "tpu.trace_start"() <{level = 10 : i32, message = "bqk,bkd->bqd"}> : () -> ()
    %cst_26 = arith.constant dense<0.000000e+00> : vector<16x4x8xf32>
    %83 = tpu.matmul %82, %70, %cst_26 {dimension_numbers = #tpu.dot_dimension_numbers<[2], [1], [1], [2], [0, 0, 0, 1, 1, 2], [0], [0]>} : vector<16x4x4xbf16>, vector<16x4x8xbf16>, vector<16x4x8xf32> -> vector<16x4x8xf32>
    "tpu.trace_stop"() : () -> ()
    %84 = vector.shape_cast %83 : vector<16x4x8xf32> to vector<64x8xf32>
    %85 = arith.truncf %84 : vector<64x8xf32> to vector<64x8xbf16>
    %c0_27 = arith.constant 0 : index
    %c16 = arith.constant 16 : index
    %86 = vector.load %arg10[%c0_27, %c16] : memref<64x32xbf16, #tpu.memory_space<vmem>>, vector<64x8xbf16>
    tpu.vector_store %arg10[%c0_27, %c16], %85 {strides = array<i32>} : memref<64x32xbf16, #tpu.memory_space<vmem>>, vector<64x8xbf16>,
    %87 = vector.extract_strided_slice %29 {offsets = [0, 0, 24], sizes = [16, 4, 8], strides = [1, 1, 1]} : vector<16x4x96xbf16> to vector<16x4x8xbf16>
    %88 = vector.extract_strided_slice %29 {offsets = [0, 0, 56], sizes = [16, 4, 8], strides = [1, 1, 1]} : vector<16x4x96xbf16> to vector<16x4x8xbf16>
    %89 = vector.extract_strided_slice %29 {offsets = [0, 0, 88], sizes = [16, 4, 8], strides = [1, 1, 1]} : vector<16x4x96xbf16> to vector<16x4x8xbf16>
    "tpu.trace_start"() <{level = 10 : i32, message = "bqd,bkd->bqk"}> : () -> ()
    %cst_28 = arith.constant dense<0.000000e+00> : vector<16x4x4xf32>
    %90 = tpu.matmul %87, %88, %cst_28 {dimension_numbers = #tpu.dot_dimension_numbers<[2], [2], [1], [1], [0, 0, 0, 1, 1, 1], [0], [0]>} : vector<16x4x8xbf16>, vector<16x4x8xbf16>, vector<16x4x4xf32> -> vector<16x4x4xf32>
    "tpu.trace_stop"() : () -> ()
    %cst_29 = arith.constant dense<0xFF800000> : vector<16x4xf32>
    %91 = vector.multi_reduction <maximumf>, %90, %cst_29 [2] : vector<16x4x4xf32> to vector<16x4xf32>
    %92 = vector.shape_cast %91 : vector<16x4xf32> to vector<16x4x1xf32>
    %93 = vector.broadcast %92 : vector<16x4x1xf32> to vector<16x4x4xf32>
    %94 = arith.subf %90, %93 : vector<16x4x4xf32>
    %95 = math.exp %94 : vector<16x4x4xf32>
    %cst_30 = arith.constant dense<0.000000e+00> : vector<16x4xf32>
    %96 = vector.multi_reduction <add>, %95, %cst_30 [2] : vector<16x4x4xf32> to vector<16x4xf32>
    %97 = vector.shape_cast %96 : vector<16x4xf32> to vector<16x4x1xf32>
    %98 = tpu.reciprocal %97 {approx = true} : vector<16x4x1xf32> -> vector<16x4x1xf32>
    %99 = vector.broadcast %98 : vector<16x4x1xf32> to vector<16x4x4xf32>
    %100 = arith.mulf %95, %99 : vector<16x4x4xf32>
    %101 = arith.truncf %100 : vector<16x4x4xf32> to vector<16x4x4xbf16>
    "tpu.trace_start"() <{level = 10 : i32, message = "bqk,bkd->bqd"}> : () -> ()
    %cst_31 = arith.constant dense<0.000000e+00> : vector<16x4x8xf32>
    %102 = tpu.matmul %101, %89, %cst_31 {dimension_numbers = #tpu.dot_dimension_numbers<[2], [1], [1], [2], [0, 0, 0, 1, 1, 2], [0], [0]>} : vector<16x4x4xbf16>, vector<16x4x8xbf16>, vector<16x4x8xf32> -> vector<16x4x8xf32>
    "tpu.trace_stop"() : () -> ()
    %103 = vector.shape_cast %102 : vector<16x4x8xf32> to vector<64x8xf32>
    %104 = arith.truncf %103 : vector<64x8xf32> to vector<64x8xbf16>
    %c0_32 = arith.constant 0 : index
    %c24 = arith.constant 24 : index
    %105 = vector.load %arg10[%c0_32, %c24] : memref<64x32xbf16, #tpu.memory_space<vmem>>, vector<64x8xbf16>
    tpu.vector_store %arg10[%c0_32, %c24], %104 {strides = array<i32>} : memref<64x32xbf16, #tpu.memory_space<vmem>>, vector<64x8xbf16>,
    %c0_33 = arith.constant 0 : index
    %c0_34 = arith.constant 0 : index
    %106 = vector.load %arg10[%c0_33, %c0_34] : memref<64x32xbf16, #tpu.memory_space<vmem>>, vector<64x32xbf16>
    %c0_35 = arith.constant 0 : index
    %c0_36 = arith.constant 0 : index
    %107 = vector.load %arg5[%c0_35, %c0_36] : memref<32x32xbf16, #tpu.memory_space<vmem>>, vector<32x32xbf16>
    %cst_37 = arith.constant dense<0.000000e+00> : vector<64x32xf32>
    %108 = tpu.matmul %106, %107, %cst_37 {dimension_numbers = #tpu.dot_dimension_numbers<[1], [0], [0], [1], [0, 0, 1, 1], [], []>} : vector<64x32xbf16>, vector<32x32xbf16>, vector<64x32xf32> -> vector<64x32xf32>
    %c0_38 = arith.constant 0 : index
    %c0_39 = arith.constant 0 : index
    %109 = vector.load %arg6[%c0_38, %c0_39] : memref<1x32xf32, #tpu.memory_space<vmem>>, vector<1x32xf32>
    %110 = vector.broadcast %109 : vector<1x32xf32> to vector<64x32xf32>
    %111 = arith.addf %108, %110 : vector<64x32xf32>
    %112 = arith.truncf %111 : vector<64x32xf32> to vector<64x32xbf16>
    %c0_40 = arith.constant 0 : index
    %c0_41 = arith.constant 0 : index
    %113 = vector.load %arg7[%c0_40, %c0_41] : memref<32x32xbf16, #tpu.memory_space<vmem>>, vector<32x32xbf16>
    %cst_42 = arith.constant dense<0.000000e+00> : vector<64x32xf32>
    %114 = tpu.matmul %112, %113, %cst_42 {dimension_numbers = #tpu.dot_dimension_numbers<[1], [0], [0], [1], [0, 0, 1, 1], [], []>} : vector<64x32xbf16>, vector<32x32xbf16>, vector<64x32xf32> -> vector<64x32xf32>
    %c0_43 = arith.constant 0 : index
    %c0_44 = arith.constant 0 : index
    %115 = vector.load %arg8[%c0_43, %c0_44] : memref<1x32xf32, #tpu.memory_space<vmem>>, vector<1x32xf32>
    %116 = vector.broadcast %115 : vector<1x32xf32> to vector<64x32xf32>
    %117 = arith.addf %114, %116 : vector<64x32xf32>
    %118 = arith.addf %0, %117 : vector<64x32xf32>
    %c0_45 = arith.constant 0 : index
    %c0_46 = arith.constant 0 : index
    %119 = vector.load %arg9[%c0_45, %c0_46] : memref<64x32xf32, #tpu.memory_space<vmem>>, vector<64x32xf32>
    tpu.vector_store %arg9[%c0_45, %c0_46], %118 {strides = array<i32>} : memref<64x32xf32, #tpu.memory_space<vmem>>, vector<64x32xf32>,
    return
  }
  func.func @transform_0(%arg0: i32) -> (i32, i32) {
    %c0_i32 = arith.constant 0 : i32
    %c0_i32_0 = arith.constant 0 : i32
    return %arg0, %c0_i32 : i32, i32
  }
  func.func @transform_1(%arg0: i32) -> (i32, i32) {
    %c0_i32 = arith.constant 0 : i32
    %c0_i32_0 = arith.constant 0 : i32
    %c0_i32_1 = arith.constant 0 : i32
    return %c0_i32, %c0_i32_0 : i32, i32
  }
  func.func @transform_2(%arg0: i32) -> (i32, i32) {
    %c0_i32 = arith.constant 0 : i32
    %c0_i32_0 = arith.constant 0 : i32
    %c0_i32_1 = arith.constant 0 : i32
    return %c0_i32, %c0_i32_0 : i32, i32
  }
  func.func @transform_3(%arg0: i32) -> (i32, i32) {
    %c0_i32 = arith.constant 0 : i32
    %c0_i32_0 = arith.constant 0 : i32
    %c0_i32_1 = arith.constant 0 : i32
    return %c0_i32, %c0_i32_0 : i32, i32
  }
  func.func @transform_4(%arg0: i32) -> (i32, i32) {
    %c0_i32 = arith.constant 0 : i32
    %c0_i32_0 = arith.constant 0 : i32
    %c0_i32_1 = arith.constant 0 : i32
    return %c0_i32, %c0_i32_0 : i32, i32
  }
  func.func @transform_5(%arg0: i32) -> (i32, i32) {
    %c0_i32 = arith.constant 0 : i32
    %c0_i32_0 = arith.constant 0 : i32
    %c0_i32_1 = arith.constant 0 : i32
    return %c0_i32, %c0_i32_0 : i32, i32
  }
  func.func @transform_6(%arg0: i32) -> (i32, i32) {
    %c0_i32 = arith.constant 0 : i32
    %c0_i32_0 = arith.constant 0 : i32
    %c0_i32_1 = arith.constant 0 : i32
    return %c0_i32, %c0_i32_0 : i32, i32
  }
  func.func @transform_7(%arg0: i32) -> (i32, i32) {
    %c0_i32 = arith.constant 0 : i32
    %c0_i32_0 = arith.constant 0 : i32
    %c0_i32_1 = arith.constant 0 : i32
    return %c0_i32, %c0_i32_0 : i32, i32
  }
  func.func @transform_8(%arg0: i32) -> (i32, i32) {
    %c0_i32 = arith.constant 0 : i32
    %c0_i32_0 = arith.constant 0 : i32
    return %arg0, %c0_i32 : i32, i32
  }
}

</mosaic_0001>

<bundles_post_ra>
// kernel: tpu_custom_call.1
= control target key start
LH: loop header
LB: loop body
LE: loop exit
PB: predicated region body
PF: predicated region fallthrough
CT: control target
= control target key end

     0   :  { %6 = vsyncpa [#allocation3], 0  ;;  %s482_s0 = inlined_call_operand.hbm [shape: f32[8,128], index: 0, kind: input, shape index: {}]   ;;  %s483_s1 = inlined_call_operand.hbm [shape: f32[16,128], index: 1, kind: output, shape index: {}]  }
   0x1   :  { %7 = vsyncpa [#allocation4], 0 }
   0x2   :  { %9 = vsyncpa [#allocation4 + $0x1], 0  ;;  %s352_s6 = smov 0   ;;  %s354_s7 = smov 0  }
   0x3   :  { %s356_s8 = smov 0   ;;  %s358_s9 = smov 0  }
   0x4 LB: > { %s373_s10 = sadd.s32 4294967295, %s338_s9   ;;  %s184_s11 = sadd.s32 4294967294, %s338_s9   ;;  %s338_s9 = sphi %s358_s9, %s499_s9   ;;  %s334_s8 = sphi %s356_s8, %s498_s8   ;;  %s330_s7 = sphi %s354_s7, %s497_s7   ;;  %s326_s6 = sphi %s352_s6, %s496_s6  }
   0x5   : > { %s377_s12 = sadd.s32 1, %s338_s9   ;;  %s43_s13 = sadd.s32 1, %s334_s8 }
   0x6   : > { %s40_s14 = ssub.s32 %s338_s9, %s377_s12  ;;  %p53_p0 = scmp.ne.s32.totalorder %s334_s8, %s330_s7 }
   0x7   : > { %p41_p1 = scmp.eq.s32.totalorder %s40_s14, 0  ;;  %p54_p2 = scmp.eq.s32.totalorder %s373_s10, 1 }
   0x8   : > { %p59_p3 = scmp.ne.s32.totalorder %s330_s7, %s326_s6  ;;  %p60_p4 = scmp.eq.s32.totalorder %s184_s11, 1 }
   0x9   : > { %s388_s15 = scalar_select %p41_p1, %s334_s8, %s43_s13  }
   0xa   : > { %p390_p5 = por %p54_p2, %p53_p0  ;;  %p394_p6 = por %p60_p4, %p59_p3 }
   0xb   : > { %p185_p7 = scmp.ge.s32.totalorder %s338_s9, 1  ;;  %p67_p8 = scmp.lt.s32.totalorder %s338_s9, 3 }
   0xc   : > { %s487_s16 = scalar_select %p390_p5, 1, 0 }
   0xd   : > { %s488_s17 = scalar_select %p394_p6, 1, 0 }
   0xe   : > { %p484_p9 = scmp.eq.s32.totalorder %s373_s10, 0  ;;  %p401_p10 = pnand %p185_p7, %p67_p8 }
   0xf   : > { %s340_s19 = smov [#allocation2]   ;;  %s244_s24 = scalar_lea.hbm %s482_s0, 128 }
  0x10   : > { %s489_s18 = scalar_select %p401_p10, 1, 0 }
  0x11   : > { %s80_s20 = sshll.u32 %s340_s19, 4  ;;  %p200_p11 = pneg %p401_p10  ;;  %s81_s20 = int_to_ptr.vmem [resolvable:$true] %s80_s20 }
  0x12   : > { %p245_p13 = scmp.ne.s32.totalorder %s482_s0, %s244_s24  ;;  %p251_p3 = scmp.lt.u32.totalorder %s244_s24, %s482_s0 }
  0x13   : > { %p409_p12 = pnand %p484_p9, %p200_p11 }
  0x15   : > { %p246_p0 = pneg %p409_p12 }
  0x17   : > { %p247_p1 = pnand %p246_p0, %p245_p13 }
  0x19   : > { %p248_p2 = pneg %p247_p1 }
  0x1b   : > { %p253_p4 = pnand %p251_p3, %p248_p2 }
  0x1d   : > { %256 = shalt.err (!%p253_p4)
}
  0x1e   : > { %s257_s29 = scalar_lea.vmem %s81_s20, 128  ;;  %p265_p9 = scmp.lt.s32.totalorder %s81_s20, %s81_s20 }
  0x1f   : > { %p258_p7 = scmp.ne.s32.totalorder %s81_s20, %s257_s29  ;;  %p266_p6 = scmp.lt.s32.totalorder %s257_s29, %s257_s29 }
  0x21   : > { %p260_p8 = pnand %p258_p7, %p246_p0  ;;  %p267_p5 = por %p266_p6, %p265_p9 }
  0x23   : > { %p261_p11 = pneg %p260_p8 }
  0x25   : > { %p268_p10 = pnand %p267_p5, %p261_p11 }
  0x27   : > { %271 = shalt.err (!%p268_p10)
}
  0x28   : > { %203 = dma.hbm_to_vmem [thread:$0]  (!%p409_p12), %s482_s0, 128, %s81_s20, [#allocation3]  }
  0x29   : > { %p491_p13 = scmp.ne.s32.totalorder %s489_s18, 0 }
  0x2a   : > { %p492_p1 = scmp.eq.s32.totalorder (!%p491_p13), %s373_s10, 0 }
  0x2b   : > { %93 = sbr.rel (%p491_p13) target bundleno = 77 (0x4d), region = 24 }
  0x32   : > { %317 = dma.done.wait (%p492_p1), [#allocation3], 128   ;;  %p493_p0 = pmov %p492_p1 }
  0x33   : > { %s105_s3 = sand.u32 1, %s330_s7   ;;  %s191_s13 = sshll.u32 %s373_s10, 7  ;;  %v108_v0 = vld [vmem:[#allocation2] sm:$0xff] }
  0x34   : > { %319 = vsyncadd (%p493_p0), [#allocation3], 4294967168  ;;  %s189_s4 = sshll.u32 %s105_s3, 3  ;;  %v109_v1 = vadd.f32 1.0, %v108_v0  ;;  %s442_s19 = scalar_lea.hbm %s483_s1, %s191_s13 }
  0x35   : > { %s107_s5 = scalar_lea.vmem [#allocation5], %s189_s4  ;;  %s112_s20 = scalar_lea.sflag [#allocation4], %s105_s3 }
  0x36   : > { %s125_s11 = sshll.u32 %s107_s5, 4  ;;  %110 = vst [vmem:[%s107_s5] sm:$0xff] %v109_v1  ;;  %p494_p6 = scmp.ne.s32.totalorder %s487_s16, 0  ;;  %s437_s11 = int_to_ptr.vmem [resolvable:$true] %s125_s11 }
  0x37   : > { %s272_s21 = scalar_lea.vmem %s437_s11, 128  ;;  %s341_s10 = smov [#allocation5]  }
  0x38   : > { %p273_p5 = scmp.ne.s32.totalorder %s437_s11, %s272_s21  ;;  %s276_s22 = sshll.u32 %s341_s10, 4  ;;  %s277_s22 = int_to_ptr.vmem [resolvable:$false] %s276_s22 }
  0x39   : > { %s278_s23 = scalar_lea.vmem %s277_s22, 256  ;;  %p279_p12 = scmp.lt.s32.totalorder %s437_s11, %s277_s22 }
  0x3a   : > { %p274_p9 = pnand %p273_p5, %p494_p6  ;;  %p280_p2 = scmp.lt.s32.totalorder %s278_s23, %s272_s21 }
  0x3c   : > { %p275_p10 = pneg %p274_p9  ;;  %p281_p3 = por %p280_p2, %p279_p12 }
  0x3e   : > { %p282_p4 = pnand %p281_p3, %p275_p10 }
  0x40   : > { %285 = shalt.err (!%p282_p4)
}
  0x41   : > { %s286_s24 = scalar_lea.hbm %s442_s19, 128  ;;  %s290_s27 = scalar_lea.hbm %s483_s1, 256 }
  0x42   : > { %p287_p7 = scmp.ne.s32.totalorder %s442_s19, %s286_s24  ;;  %p291_p13 = scmp.lt.u32.totalorder %s442_s19, %s483_s1 }
  0x43   : > { %p292_p1 = scmp.lt.u32.totalorder %s290_s27, %s286_s24  ;;  %p294_p5 = scmp.lt.u32.totalorder %s286_s24, %s442_s19 }
  0x44   : > { %p288_p8 = pnand %p287_p7, %p494_p6 }
  0x45   : > { %p293_p0 = por %p292_p1, %p291_p13 }
  0x46   : > { %p289_p11 = pneg %p288_p8 }
  0x47   : > { %p295_p9 = por %p294_p5, %p293_p0 }
  0x49   : > { %p296_p10 = pnand %p295_p9, %p289_p11 }
  0x4b   : > { %299 = shalt.err (!%p296_p10)
}
  0x4c   : > { %198 = dma.vmem_to_hbm [thread:$0]  (%p494_p6), %s437_s11, 128, %s442_s19, %s112_s20  }
  0x4d PF: > { %p210_p12 = scmp.ge.s32.totalorder %s338_s9, 2  ;;  %s137_s30 = sand.u32 1, %s326_s6  }
  0x4e   : > { %p495_p2 = scmp.ne.s32.totalorder %s488_s17, 0  ;;  %s138_s2 = scalar_lea.sflag [#allocation4], %s137_s30 }
  0x50   : > { %p205_p3 = pnand %p210_p12, %p495_p2 }
  0x52   : > { %321 = dma.done.wait (!%p205_p3), %s138_s2, 128  }
  0x53   : > { %323 = vsyncadd (!%p205_p3), %s138_s2, 4294967168  ;;  %p12_p4 = scmp.ge.s32.totalorder %s377_s12, 4   ;;  %s496_s6 = smov %s330_s7 }
  0x54   : > { %s497_s7 = smov %s334_s8  ;;  %s498_s8 = smov %s388_s15 }
  0x55   : > { %s499_s9 = smov %s377_s12  ;;  %14 = sbr.rel (!%p12_p4) target bundleno = 4 (0x4), region = 61 }
  0x5c   :  { %143 = vsyncpa [#allocation3], 1 }
  0x5d   :  { %145 = vsyncpa [#allocation3 + $0x1], 1 }
  0x5e   :  { %146 = vsyncpa [#allocation4], 1 }
  0x5f   :  { %148 = vsyncpa [#allocation4 + $0x1], 1 }

// kernel: tpu_custom_call.1
= control target key start
LH: loop header
LB: loop body
LE: loop exit
PB: predicated region body
PF: predicated region fallthrough
CT: control target
= control target key end

     0   :  { %s9866_s27 = smov 0   ;;  %s11977_s0 = inlined_call_operand.vmem [shape: f32[128,32], index: 0, kind: input, shape index: {}]   ;;  %s11978_s1 = inlined_call_operand.vmem [shape: f32[1,32], index: 1, kind: input, shape index: {}]   ;;  %s11979_s2 = inlined_call_operand.vmem [shape: f32[1,32], index: 2, kind: input, shape index: {}]   ;;  %s11980_s3 = inlined_call_operand.vmem [shape: bf16[32,96], index: 3, kind: input, shape index: {}]   ;;  %s11981_s4 = inlined_call_operand.vmem [shape: bf16[32,32], index: 4, kind: input, shape index: {}]   ;;  %s11982_s5 = inlined_call_operand.vmem [shape: f32[1,32], index: 5, kind: input, shape index: {}]   ;;  %s11983_s6 = inlined_call_operand.vmem [shape: bf16[32,32], index: 6, kind: input, shape index: {}]   ;;  %s11984_s7 = inlined_call_operand.vmem [shape: f32[1,32], index: 7, kind: input, shape index: {}]   ;;  %s11985_s8 = inlined_call_operand.vmem [shape: f32[128,32], index: 8, kind: output, shape index: {}]  }
   0x1 LB: > { %s8242_s28 = sadd.s32 4294967295, %s9802_s27   ;;  %p8246_p0 = scmp.ge.s32.totalorder %s9802_s27, 1  ;;  %s9802_s27 = sphi %s9866_s27, %s18_s27  }
   0x2   : > { %p263_p1 = scmp.lt.s32.totalorder %s9802_s27, 3 }
   0x4   : > { %p264_p2 = pnand %p8246_p0, %p263_p1 }
   0x5   : > { %s8247_s29 = sshll.u32 (!%p264_p2), %s8242_s28, 3  ;;  %vm320_vm0 = vcmask (!%p264_p2), 261120   ;;  %v9510_v56 = vld [vmem:[%s11980_s3] sm:$0xff] (!%p264_p2)   ;;  %v9511_v57 = vld [vmem:[%s11980_s3 + $0x8] sm:$0xff] (!%p264_p2)   ;;  %vm9806_vm1 = vmmov (!%p264_p2), 0   ;;  %s9807_s20 = smov (!%p264_p2), 96  }
   0x6   : > { %267 = sbr.rel (%p264_p2) target bundleno = 4060 (0xfdc), region = 52  ;;  %p298_p3 = scmp.lt.s32.totalorder (!%p264_p2), %s8247_s29, 15  ;;  %8681 = vmatprep.subr.bf16.mxu0 (!%p264_p2), %v9510_v56  ;;  %vm636_vm2 = vcmask (!%p264_p2), 64512   ;;  %vm1707_vm3 = vcmask (!%p264_p2), 1041408   ;;  %vm1508_vm4 = vcmask (!%p264_p2), 27648   ;;  %vm1703_vm5 = vcmask (!%p264_p2), 31744  }
   0x7   : > { %8682 = vmatpush3.bf16.msra.mxu0 (!%p264_p2), %v9510_v56  ;;  %s9808_s21 = smov (!%p264_p2), 64   ;;  %s9809_s22 = smov (!%p264_p2), 88   ;;  %vm4323_vm6 = vcmask (!%p264_p2), 130112   ;;  %vm6140_vm7 = vcmask (!%p264_p2), 195712   ;;  %vm7957_vm8 = vcmask (!%p264_p2), 261312  }
   0x8   : > { %8683 = vmatprep.subr.bf16.mxu0 (!%p264_p2), %v9511_v57  ;;  %s9810_s23 = smov (!%p264_p2), 120   ;;  %s9811_s24 = smov (!%p264_p2), 56  }
   0x9   : > { %s9812_s25 = smov (!%p264_p2), 80   ;;  %s9813_s26 = smov (!%p264_p2), 112  }
   0xa   : > { %s9814_s28 = smov (!%p264_p2), 48   ;;  %s9815_s9 = smov (!%p264_p2), 72  }
   0xb   : > { %8684 = vmatpush3.bf16.msra.mxu0 (!%p264_p2), %v9511_v57  ;;  %s9816_s10 = smov (!%p264_p2), 104   ;;  %s9817_s12 = smov (!%p264_p2), 40  }
   0xc   : > { %s9818_s13 = smov (!%p264_p2), 8   ;;  %s9819_s14 = smov (!%p264_p2), 16  }
   0xd   : > { %s11987_s29 = smov (!%p298_p3, %s8247_s29), 15  ;;  %s9820_s15 = smov 24  }
   0xe   : > { %s8248_s30 = sshll.u32 %s11987_s29, 3 }
   0xf   : > { %s9882_s11 = scalar_lea.vmem %s11977_s0, %s8248_s30 }
  0x10   : > { %v310_v0 = vld [vmem:[%s9882_s11] sm:$0xff]  ;;  %v312_v1 = vld [vmem:[%s9882_s11 + $0x10] sm:$0xff]  ;;  %v311_v2 = vld [vmem:[%s9882_s11 + $0x8] sm:$0xff] }
  0x11   : > { %v321_v3 = vsel %vm320_vm0, %v310_v0, 0.0  ;;  %v327_v4 = vsel %vm320_vm0, %v312_v1, 0.0  ;;  %v313_v5 = vld [vmem:[%s9882_s11 + $0x18] sm:$0xff]  ;;  %v324_v6 = vsel %vm320_vm0, %v311_v2, 0.0  ;;  %v314_v8 = vld [vmem:[%s9882_s11 + $0x20] sm:$0xff]  ;;  %v315_v9 = vld [vmem:[%s9882_s11 + $0x28] sm:$0xff] }
  0x12   : > { %322 = vadd.xlane.f32.xlu0 %v321_v3  ;;  %328 = vadd.xlane.f32.xlu1 %v327_v4  ;;  %v330_v7 = vsel %vm320_vm0, %v313_v5, 0.0  ;;  %v333_v10 = vsel %vm320_vm0, %v314_v8, 0.0  ;;  %v336_v11 = vsel %vm320_vm0, %v315_v9, 0.0  ;;  %v316_v12 = vld [vmem:[%s9882_s11 + $0x30] sm:$0xff]  ;;  %v317_v13 = vld [vmem:[%s9882_s11 + $0x38] sm:$0xff] }
  0x13   : > { %v339_v14 = vsel %vm320_vm0, %v316_v12, 0.0  ;;  %v342_v15 = vsel %vm320_vm0, %v317_v13, 0.0 }
  0x16   : > { %325 = vadd.xlane.f32.xlu0 %v324_v6  ;;  %331 = vadd.xlane.f32.xlu1 %v330_v7 }
  0x1a   : > { %334 = vadd.xlane.f32.xlu0 %v333_v10  ;;  %337 = vadd.xlane.f32.xlu1 %v336_v11 }
  0x1e   : > { %340 = vadd.xlane.f32.xlu0 %v339_v14  ;;  %343 = vadd.xlane.f32.xlu1 %v342_v15 }
  0x9f   : > { %v323_v16 = vpop.xlane.xlu0 %322  ;;  %v329_v17 = vpop.xlane.xlu1 %328 }
  0xa0   : > { %v346_v18 = vmul.f32 0.03125, %v323_v16  ;;  %v348_v19 = vmul.f32 0.03125, %v329_v17 }
  0xa2   : > { %v9900_v20 = vsub.f32 %v310_v0, %v346_v18  ;;  %v9902_v21 = vsub.f32 %v312_v1, %v348_v19  ;;  %v8251_v19 = vld [vmem:[%s11978_s1] ss:$0 sm:$0xff] }
  0xa3   : > { %v326_v22 = vpop.xlane.xlu0 %325  ;;  %v332_v23 = vpop.xlane.xlu1 %331 }
  0xa4   : > { %v347_v24 = vmul.f32 0.03125, %v326_v22  ;;  %v349_v25 = vmul.f32 0.03125, %v332_v23  ;;  %v362_v26 = vmul.f32 %v9900_v20, %v9900_v20  ;;  %v364_v27 = vmul.f32 %v9902_v21, %v9902_v21 }
  0xa6   : > { %v9908_v28 = vsub.f32 %v311_v2, %v347_v24  ;;  %v9910_v29 = vsub.f32 %v313_v5, %v349_v25  ;;  %v370_v30 = vsel %vm320_vm0, %v362_v26, 0.0  ;;  %v376_v33 = vsel %vm320_vm0, %v364_v27, 0.0  ;;  %v8252_v27 = vld [vmem:[%s11979_s2] ss:$0 sm:$0xff] }
  0xa7   : > { %371 = vadd.xlane.f32.xlu0 %v370_v30  ;;  %v335_v31 = vpop.xlane.xlu0 %334  ;;  %v338_v32 = vpop.xlane.xlu1 %337 }
  0xa8   : > { %v350_v34 = vmul.f32 0.03125, %v335_v31  ;;  %v351_v35 = vmul.f32 0.03125, %v338_v32  ;;  %v363_v36 = vmul.f32 %v9908_v28, %v9908_v28  ;;  %v365_v37 = vmul.f32 %v9910_v29, %v9910_v29 }
  0xaa   : > { %v9918_v38 = vsub.f32 %v314_v8, %v350_v34  ;;  %v9920_v39 = vsub.f32 %v315_v9, %v351_v35  ;;  %v373_v40 = vsel %vm320_vm0, %v363_v36, 0.0  ;;  %v379_v43 = vsel %vm320_vm0, %v365_v37, 0.0 }
  0xab   : > { %377 = vadd.xlane.f32.xlu0 %v376_v33  ;;  %374 = vadd.xlane.f32.xlu1 %v373_v40  ;;  %v341_v41 = vpop.xlane.xlu0 %340  ;;  %v344_v42 = vpop.xlane.xlu1 %343 }
  0xac   : > { %v352_v44 = vmul.f32 0.03125, %v341_v41  ;;  %v353_v45 = vmul.f32 0.03125, %v344_v42  ;;  %v366_v46 = vmul.f32 %v9918_v38, %v9918_v38  ;;  %v367_v47 = vmul.f32 %v9920_v39, %v9920_v39 }
  0xae   : > { %v9928_v48 = vsub.f32 %v316_v12, %v352_v44  ;;  %v9930_v49 = vsub.f32 %v317_v13, %v353_v45  ;;  %v382_v50 = vsel %vm320_vm0, %v366_v46, 0.0  ;;  %v385_v51 = vsel %vm320_vm0, %v367_v47, 0.0 }
  0xaf   : > { %380 = vadd.xlane.f32.xlu1 %v379_v43  ;;  %383 = vadd.xlane.f32.xlu0 %v382_v50 }
  0xb0   : > { %v368_v52 = vmul.f32 %v9928_v48, %v9928_v48  ;;  %v369_v53 = vmul.f32 %v9930_v49, %v9930_v49 }
  0xb2   : > { %v388_v54 = vsel %vm320_vm0, %v368_v52, 0.0  ;;  %v391_v55 = vsel %vm320_vm0, %v369_v53, 0.0 }
  0xb3   : > { %386 = vadd.xlane.f32.xlu1 %v385_v51  ;;  %389 = vadd.xlane.f32.xlu0 %v388_v54 }
  0xb7   : > { %392 = vadd.xlane.f32.xlu1 %v391_v55 }
 0x134   : > { %v372_v58 = vpop.xlane.xlu0 %371 }
 0x135   : > { %v394_v59 = vmul.f32 0.03125, %v372_v58 }
 0x137   : > { %v402_v60 = vadd.f32 1e-05, %v394_v59  ;;  %v563_v59 = vlaneseq }
 0x138   : > { %v375_v61 = vpop.xlane.xlu1 %374  ;;  %v378_v62 = vpop.xlane.xlu0 %377 }
 0x139   : > { %9516 = vrsqrt.f32 %v402_v60  ;;  %v395_v63 = vmul.f32 0.03125, %v375_v61  ;;  %v396_v0 = vmul.f32 0.03125, %v378_v62  ;;  %v9805_v60 = vmov 0.0  }
 0x13a   : > { %8693 = vmatprep.subr.bf16.mxu1 %v9805_v60  ;;  %8705 = vmatprep.subr.bf16.mxu0 %v9805_v60 }
 0x13b   : > { %v403_v1 = vadd.f32 1e-05, %v395_v63  ;;  %v404_v2 = vadd.f32 1e-05, %v396_v0  ;;  %8695 = vmatprep.mubr.msk.bf16.mxu1 %vm9806_vm1, %v9805_v60 }
 0x13c   : > { %v381_v3 = vpop.xlane.xlu1 %380  ;;  %v384_v4 = vpop.xlane.xlu0 %383 }
 0x13d   : > { %9518 = vrsqrt.f32 %v403_v1  ;;  %v397_v5 = vmul.f32 0.03125, %v381_v3  ;;  %v398_v6 = vmul.f32 0.03125, %v384_v4 }
 0x13e   : > { %9520 = vrsqrt.f32 %v404_v2 }
 0x13f   : > { %v405_v7 = vadd.f32 1e-05, %v397_v5  ;;  %v406_v8 = vadd.f32 1e-05, %v398_v6 }
 0x140   : > { %v387_v9 = vpop.xlane.xlu1 %386  ;;  %v390_v10 = vpop.xlane.xlu0 %389 }
 0x141   : > { %9522 = vrsqrt.f32 %v405_v7  ;;  %v399_v11 = vmul.f32 0.03125, %v387_v9  ;;  %v400_v12 = vmul.f32 0.03125, %v390_v10 }
 0x142   : > { %9524 = vrsqrt.f32 %v406_v8 }
 0x143   : > { %v9517_v13 = vpop.eup %9516  ;;  %v407_v14 = vadd.f32 1e-05, %v399_v11  ;;  %v408_v15 = vadd.f32 1e-05, %v400_v12 }
 0x144   : > { %v393_v16 = vpop.xlane.xlu1 %392  ;;  %v418_v17 = vmul.f32 %v9517_v13, %v9900_v20 }
 0x145   : > { %9526 = vrsqrt.f32 %v407_v14  ;;  %v401_v18 = vmul.f32 0.03125, %v393_v16 }
 0x146   : > { %9528 = vrsqrt.f32 %v408_v15  ;;  %v432_v26 = vmul.f32 %v8251_v19, %v418_v17 }
 0x147   : > { %v9519_v22 = vpop.eup %9518  ;;  %v409_v23 = vadd.f32 1e-05, %v401_v18 }
 0x148   : > { %v9521_v24 = vpop.eup %9520  ;;  %v419_v25 = vmul.f32 %v9519_v22, %v9908_v28  ;;  %v446_v33 = vadd.f32 %v8252_v27, %v432_v26 }
 0x149   : > { %9530 = vrsqrt.f32 %v409_v23  ;;  %v420_v20 = vmul.f32 %v9521_v24, %v9902_v21 }
 0x14a   : > { %v433_v30 = vmul.f32 %v8251_v19, %v419_v25 }
 0x14b   : > { %v9523_v31 = vpop.eup %9522  ;;  %v434_v36 = vmul.f32 %v8251_v19, %v420_v20 }
 0x14c   : > { %v9525_v32 = vpop.eup %9524  ;;  %v447_v34 = vadd.f32 %v8252_v27, %v433_v30  ;;  %v421_v35 = vmul.f32 %v9523_v31, %v9910_v29 }
 0x14d   : > { %v422_v37 = vmul.f32 %v9525_v32, %v9918_v38  ;;  %v448_v43 = vadd.f32 %v8252_v27, %v434_v36 }
 0x14e   : > { %v454_v40 = vpack.c.bf16 %v447_v34, %v446_v33  ;;  %v435_v28 = vmul.f32 %v8251_v19, %v421_v35 }
 0x14f   : > { %v9527_v41 = vpop.eup %9526  ;;  %v436_v45 = vmul.f32 %v8251_v19, %v422_v37 }
 0x150   : > { %v9529_v42 = vpop.eup %9528  ;;  %8685 = vmatprep.mubr.msk.bf16.mxu0 %vm320_vm0, %v454_v40  ;;  %v449_v44 = vadd.f32 %v8252_v27, %v435_v28  ;;  %v423_v21 = vmul.f32 %v9527_v41, %v9920_v39 }
 0x151   : > { %v424_v46 = vmul.f32 %v9529_v42, %v9928_v48  ;;  %v450_v29 = vadd.f32 %v8252_v27, %v436_v45  ;;  %v9804_v48 = vmov 1983009808  }
 0x152   : > { %v455_v47 = vpack.c.bf16 %v449_v44, %v448_v43  ;;  %v437_v50 = vmul.f32 %v8251_v19, %v423_v21  ;;  %v561_v58 = vunpack.c.l.s4 %v9804_v48 }
 0x153   : > { %v9531_v51 = vpop.eup %9530  ;;  %v438_v53 = vmul.f32 %v8251_v19, %v424_v46 }
 0x154   : > { %8686 = vmatmul.mubr.msk.bf16.vlgmr.msra.gmra.mrb[0].mxu0 %vm320_vm0, %v455_v47  ;;  %v451_v38 = vadd.f32 %v8252_v27, %v437_v50  ;;  %v425_v52 = vmul.f32 %v9531_v51, %v9930_v49  ;;  %v562_v61 = vunpack.c.0.s8 %v561_v58  ;;  %v564_v49 = vshrl.u32 %v563_v59, 7 }
 0x155   : > { %v452_v56 = vadd.f32 %v8252_v27, %v438_v53 }
 0x156   : > { %v456_v54 = vpack.c.bf16 %v451_v38, %v450_v29  ;;  %v439_v55 = vmul.f32 %v8251_v19, %v425_v52  ;;  %v9966_v1 = vsub.s32 %v562_v61, %v564_v49 }
 0x158   : > { %8689 = vmatprep.mubr.msk.bf16.mxu0 %vm320_vm0, %v456_v54  ;;  %v453_v57 = vadd.f32 %v8252_v27, %v439_v55 }
 0x15a   : > { %v457_v39 = vpack.c.bf16 %v453_v57, %v452_v56 }
 0x15c   : > { %8690 = vmatmul.mubr.msk.bf16.gmra.mrb[4].mxu0 %vm320_vm0, %v457_v39 }
 0x15d   : > { %8707 = vmatprep.mubr.msk.bf16.mxu0 %vm9806_vm1, %v9805_v60 }
 0x227   : > { %v8687_v62 = vpop.f32.mrb[0].mxu0 }
 0x228   : > { %v520_v63 = vpop.f32.mrb[1].mxu0 }
 0x229   : > { %v8688_v0 = vpop.f32.mrb[2].mxu0 }
 0x22a   : > { %v552_v2 = vpack.c.bf16 %v8688_v0, %v8687_v62  ;;  %v523_v3 = vpop.f32.mrb[3].mxu0  ;;  %v8260_v7 = vpack.c.bf16 %v8688_v0, %v8688_v0 }
 0x22b   : > { %v551_v4 = vpack.c.bf16 %v523_v3, %v520_v63  ;;  %v8259_v5 = vpack.c.bf16 %v523_v3, %v523_v3 }
 0x22c   : > { %v9976_v8 = vrot.slane %v552_v2, %v9966_v1  ;;  %v9996_v18 = vrot.slane %v8260_v7, %v9966_v1 }
 0x22d   : > { %v9973_v6 = vrot.slane %v551_v4, %v9966_v1  ;;  %v9987_v13 = vrot.slane %v8259_v5, %v9966_v1 }
 0x22e   : > { %v10000_v19 = vrot.slane %v9976_v8, %v9966_v1  ;;  %v10016_v25 = vrot.slane %v9996_v18, %v9966_v1  ;;  %v10025_v20 = vcombine.high %v9976_v8, %v9976_v8  ;;  %v10044_v33 = vcombine.high %v9996_v18, %v9996_v18 }
 0x22f   : > { %v9980_v9 = vcombine.high %v9973_v6, %v9973_v6  ;;  %v9984_v10 = vrot.slane %v9973_v6, %v9966_v1  ;;  %v8691_v11 = vpop.f32.mrb[4].mxu0  ;;  %v10006_v23 = vcombine.high %v9987_v13, %v9987_v13  ;;  %v10010_v24 = vrot.slane %v9987_v13, %v9966_v1 }
 0x230   : > { %v536_v12 = vpop.f32.mrb[5].mxu0  ;;  %v10048_v34 = vrot.slane %v10025_v20, %v9966_v1  ;;  %v10063_v40 = vrot.slane %v10044_v33, %v9966_v1 }
 0x231   : > { %v9991_v14 = vrot.slane %v9980_v9, %v9966_v1  ;;  %634 = vrot.lane.b32.xlu0 %v9984_v10, %s9807_s20  ;;  %v8692_v15 = vpop.f32.mrb[6].mxu0  ;;  %v10029_v30 = vrot.slane %v10006_v23, %v9966_v1 }
 0x232   : > { %v554_v16 = vpack.c.bf16 %v8692_v15, %v8691_v11  ;;  %v539_v17 = vpop.f32.mrb[7].mxu0  ;;  %v8262_v35 = vpack.c.bf16 %v8692_v15, %v8692_v15 }
 0x233   : > { %v553_v22 = vpack.c.bf16 %v539_v17, %v536_v12  ;;  %690 = vrot.lane.b32.xlu1 %v9991_v14, %s9807_s20  ;;  %v8261_v26 = vpack.c.bf16 %v539_v17, %v539_v17 }
 0x234   : > { %v10053_v36 = vrot.slane %v554_v16, %v9966_v1  ;;  %v10072_v41 = vrot.slane %v8262_v35, %v9966_v1 }
 0x235   : > { %855 = vrot.lane.b32.xlu0 %v10000_v19, %s9807_s20  ;;  %v10019_v27 = vrot.slane %v553_v22, %v9966_v1  ;;  %v10034_v31 = vrot.slane %v8261_v26, %v9966_v1 }
 0x236   : > { %v10076_v42 = vrot.slane %v10053_v36, %v9966_v1  ;;  %v10092_v21 = vrot.slane %v10072_v41, %v9966_v1  ;;  %v10098_v45 = vcombine.high %v10053_v36, %v10053_v36  ;;  %v10110_v47 = vcombine.high %v10072_v41, %v10072_v41 }
 0x237   : > { %745 = vrot.lane.b32.xlu1 %v10010_v24, %s9807_s20  ;;  %v10038_v32 = vrot.slane %v10019_v27, %v9966_v1  ;;  %v10057_v37 = vrot.slane %v10034_v31, %v9966_v1  ;;  %v10067_v28 = vcombine.high %v10019_v27, %v10019_v27  ;;  %v10082_v43 = vcombine.high %v10034_v31, %v10034_v31 }
 0x238   : > { %v10114_v50 = vrot.slane %v10098_v45, %v9966_v1  ;;  %v10122_v51 = vrot.slane %v10110_v47, %v9966_v1 }
 0x239   : > { %965 = vrot.lane.b32.xlu0 %v10016_v25, %s9807_s20  ;;  %v10086_v44 = vrot.slane %v10067_v28, %v9966_v1  ;;  %v10102_v46 = vrot.slane %v10082_v43, %v9966_v1 }
 0x23b   : > { %800 = vrot.lane.b32.xlu1 %v10029_v30, %s9807_s20 }
 0x23d   : > { %1075 = vrot.lane.b32.xlu0 %v10038_v32, %s9807_s20 }
 0x23f   : > { %910 = vrot.lane.b32.xlu1 %v10048_v34, %s9807_s20 }
 0x241   : > { %1185 = vrot.lane.b32.xlu0 %v10057_v37, %s9807_s20 }
 0x243   : > { %1020 = vrot.lane.b32.xlu1 %v10063_v40, %s9807_s20 }
 0x245   : > { %1295 = vrot.lane.b32.xlu0 %v10076_v42, %s9807_s20 }
 0x247   : > { %1130 = vrot.lane.b32.xlu1 %v10086_v44, %s9807_s20 }
 0x249   : > { %1405 = vrot.lane.b32.xlu0 %v10092_v21, %s9807_s20 }
 0x24b   : > { %1240 = vrot.lane.b32.xlu1 %v10102_v46, %s9807_s20 }
 0x24d   : > { %1701 = vrot.lane.b32.xlu0 %v9984_v10, %s9808_s21 }
 0x24f   : > { %1350 = vrot.lane.b32.xlu1 %v10114_v50, %s9807_s20 }
 0x251   : > { %1799 = vrot.lane.b32.xlu0 %v10010_v24, %s9808_s21 }
 0x253   : > { %1460 = vrot.lane.b32.xlu1 %v10122_v51, %s9807_s20 }
 0x255   : > { %1895 = vrot.lane.b32.xlu0 %v10000_v19, %s9808_s21 }
 0x257   : > { %1751 = vrot.lane.b32.xlu1 %v9991_v14, %s9808_s21 }
 0x259   : > { %1991 = vrot.lane.b32.xlu0 %v10016_v25, %s9808_s21 }
 0x25b   : > { %1847 = vrot.lane.b32.xlu1 %v10029_v30, %s9808_s21 }
 0x25d   : > { %2087 = vrot.lane.b32.xlu0 %v10038_v32, %s9808_s21 }
 0x25f   : > { %1943 = vrot.lane.b32.xlu1 %v10048_v34, %s9808_s21 }
 0x263   : > { %2039 = vrot.lane.b32.xlu1 %v10063_v40, %s9808_s21 }
 0x267   : > { %2183 = vrot.lane.b32.xlu1 %v10057_v37, %s9808_s21 }
 0x26b   : > { %2135 = vrot.lane.b32.xlu1 %v10086_v44, %s9808_s21 }
 0x2a3   : > { %v635_v29 = vpop.permute.xlu0 %634 }
 0x2a4   : > { %v641_v38 = vsel %vm636_vm2, %v635_v29, 0 }
 0x2a5   : > { %v691_v52 = vpop.permute.xlu1 %690  ;;  %8694 = vmatpush3.bf16.xpose.msra.mxu1 %v641_v38 }
 0x2a6   : > { %8699 = vmatprep.subr.bf16.mxu1 %v9805_v60  ;;  %v696_v55 = vsel %vm636_vm2, %v691_v52, 0 }
 0x2a7   : > { %v856_v56 = vpop.permute.xlu0 %855 }
 0x2a8   : > { %v861_v39 = vsel %vm636_vm2, %v856_v56, 0 }
 0x2a9   : > { %v746_v53 = vpop.permute.xlu1 %745 }
 0x2aa   : > { %v751_v54 = vsel %vm636_vm2, %v746_v53, 0 }
 0x2ab   : > { %8706 = vmatpush3.bf16.xpose.msra.mxu0 %v751_v54  ;;  %v966_v58 = vpop.permute.xlu0 %965 }
 0x2ac   : > { %8696 = vmatmul.mubr.msk.bf16.vlgmr.msra.gmra.mrb[0].mxu1 %vm636_vm2, %v9973_v6  ;;  %8717 = vmatprep.subr.bf16.mxu0 %v9805_v60  ;;  %v971_v61 = vsel %vm636_vm2, %v966_v58, 0 }
 0x2ad   : > { %8700 = vmatpush3.bf16.xpose.msra.mxu1 %v696_v55  ;;  %8701 = vmatprep.mubr.msk.bf16.mxu1 %vm9806_vm1, %v9805_v60  ;;  %v801_v57 = vpop.permute.xlu1 %800 }
 0x2ae   : > { %8711 = vmatprep.subr.bf16.mxu1 %v9805_v60  ;;  %v806_v48 = vsel %vm636_vm2, %v801_v57, 0 }
 0x2af   : > { %v1076_v62 = vpop.permute.xlu0 %1075 }
 0x2b0   : > { %v1081_v0 = vsel %vm636_vm2, %v1076_v62, 0 }
 0x2b1   : > { %v911_v59 = vpop.permute.xlu1 %910 }
 0x2b2   : > { %8708 = vmatmul.mubr.msk.bf16.vlgmr.msra.gmra.mrb[8].mxu0 %vm636_vm2, %v9987_v13  ;;  %v916_v49 = vsel %vm636_vm2, %v911_v59, 0 }
 0x2b3   : > { %8718 = vmatpush3.bf16.xpose.msra.mxu0 %v861_v39  ;;  %8719 = vmatprep.mubr.msk.bf16.mxu0 %vm9806_vm1, %v9805_v60  ;;  %v1186_v2 = vpop.permute.xlu0 %1185 }
 0x2b4   : > { %8702 = vmatmul.mubr.msk.bf16.vlgmr.msra.gmra.mrb[4].mxu1 %vm636_vm2, %v9980_v9  ;;  %8729 = vmatprep.subr.bf16.mxu0 %v9805_v60  ;;  %v1191_v4 = vsel %vm636_vm2, %v1186_v2, 0 }
 0x2b5   : > { %8712 = vmatpush3.bf16.xpose.msra.mxu1 %v806_v48  ;;  %8713 = vmatprep.mubr.msk.bf16.mxu1 %vm9806_vm1, %v9805_v60  ;;  %v1021_v63 = vpop.permute.xlu1 %1020 }
 0x2b6   : > { %8723 = vmatprep.subr.bf16.mxu1 %v9805_v60  ;;  %v1026_v1 = vsel %vm636_vm2, %v1021_v63, 0 }
 0x2b7   : > { %v1296_v6 = vpop.permute.xlu0 %1295 }
 0x2b9   : > { %v1131_v3 = vpop.permute.xlu1 %1130 }
 0x2ba   : > { %8720 = vmatmul.mubr.msk.bf16.vlgmr.msra.gmra.mrb[12].mxu0 %vm636_vm2, %v9976_v8  ;;  %v1136_v5 = vsel %vm636_vm2, %v1131_v3, 0  ;;  %v1301_v8 = vsel %vm636_vm2, %v1296_v6, 0 }
 0x2bb   : > { %8730 = vmatpush3.bf16.xpose.msra.mxu0 %v971_v61  ;;  %8731 = vmatprep.mubr.msk.bf16.mxu0 %vm9806_vm1, %v9805_v60  ;;  %v1406_v11 = vpop.permute.xlu0 %1405 }
 0x2bc   : > { %8714 = vmatmul.mubr.msk.bf16.vlgmr.msra.gmra.mrb[8].mxu1 %vm636_vm2, %v10006_v23  ;;  %8741 = vmatprep.subr.bf16.mxu0 %v9805_v60  ;;  %v1411_v13 = vsel %vm636_vm2, %v1406_v11, 0 }
 0x2bd   : > { %8724 = vmatpush3.bf16.xpose.msra.mxu1 %v916_v49  ;;  %8725 = vmatprep.mubr.msk.bf16.mxu1 %vm9806_vm1, %v9805_v60  ;;  %v1241_v7 = vpop.permute.xlu1 %1240 }
 0x2be   : > { %8735 = vmatprep.subr.bf16.mxu1 %v9805_v60  ;;  %v1246_v9 = vsel %vm636_vm2, %v1241_v7, 0 }
 0x2bf   : > { %v1702_v16 = vpop.permute.xlu0 %1701 }
 0x2c1   : > { %v1351_v12 = vpop.permute.xlu1 %1350 }
 0x2c2   : > { %8732 = vmatmul.mubr.msk.bf16.vlgmr.msra.gmra.mrb[16].mxu0 %vm636_vm2, %v9996_v18  ;;  %v1356_v15 = vsel %vm636_vm2, %v1351_v12, 0  ;;  %v1709_v18 = vsel %vm1707_vm3, %v1702_v16, 0 }
 0x2c3   : > { %8742 = vmatpush3.bf16.xpose.msra.mxu0 %v1081_v0  ;;  %8743 = vmatprep.mubr.msk.bf16.mxu0 %vm9806_vm1, %v9805_v60 }
 0x2c4   : > { %8726 = vmatmul.mubr.msk.bf16.vlgmr.msra.gmra.mrb[12].mxu1 %vm636_vm2, %v10025_v20  ;;  %8753 = vmatprep.subr.bf16.mxu0 %v9805_v60 }
 0x2c5   : > { %8736 = vmatpush3.bf16.xpose.msra.mxu1 %v1026_v1  ;;  %8737 = vmatprep.mubr.msk.bf16.mxu1 %vm9806_vm1, %v9805_v60  ;;  %v1461_v17 = vpop.permute.xlu1 %1460 }
 0x2c6   : > { %8747 = vmatprep.subr.bf16.mxu1 %v9805_v60  ;;  %v1466_v22 = vsel %vm636_vm2, %v1461_v17, 0 }
 0x2c9   : > { %v1752_v23 = vpop.permute.xlu1 %1751 }
 0x2ca   : > { %8744 = vmatmul.mubr.msk.bf16.vlgmr.msra.gmra.mrb[20].mxu0 %vm636_vm2, %v10019_v27  ;;  %v1757_v26 = vsel %vm1707_vm3, %v1752_v23, 0 }
 0x2cb   : > { %8754 = vmatpush3.bf16.xpose.msra.mxu0 %v1191_v4  ;;  %8755 = vmatprep.mubr.msk.bf16.mxu0 %vm9806_vm1, %v9805_v60 }
 0x2cc   : > { %8738 = vmatmul.mubr.msk.bf16.vlgmr.msra.gmra.mrb[16].mxu1 %vm636_vm2, %v10044_v33  ;;  %8765 = vmatprep.subr.bf16.mxu0 %v9805_v60 }
 0x2cd   : > { %8748 = vmatpush3.bf16.xpose.msra.mxu1 %v1136_v5  ;;  %8749 = vmatprep.mubr.msk.bf16.mxu1 %vm9806_vm1, %v9805_v60 }
 0x2ce   : > { %8759 = vmatprep.subr.bf16.mxu1 %v9805_v60 }
 0x2d2   : > { %8756 = vmatmul.mubr.msk.bf16.vlgmr.msra.gmra.mrb[24].mxu0 %vm636_vm2, %v10034_v31 }
 0x2d3   : > { %8766 = vmatpush3.bf16.xpose.msra.mxu0 %v1301_v8  ;;  %8767 = vmatprep.mubr.msk.bf16.mxu0 %vm9806_vm1, %v9805_v60 }
 0x2d4   : > { %8750 = vmatmul.mubr.msk.bf16.vlgmr.msra.gmra.mrb[20].mxu1 %vm636_vm2, %v10067_v28  ;;  %8777 = vmatprep.subr.bf16.mxu0 %v9805_v60 }
 0x2d5   : > { %8760 = vmatpush3.bf16.xpose.msra.mxu1 %v1246_v9  ;;  %8761 = vmatprep.mubr.msk.bf16.mxu1 %vm9806_vm1, %v9805_v60 }
 0x2d6   : > { %8771 = vmatprep.subr.bf16.mxu1 %v9805_v60 }
 0x2da   : > { %8768 = vmatmul.mubr.msk.bf16.vlgmr.msra.gmra.mrb[28].mxu0 %vm636_vm2, %v10053_v36 }
 0x2db   : > { %8778 = vmatpush3.bf16.xpose.msra.mxu0 %v1411_v13  ;;  %8779 = vmatprep.mubr.msk.bf16.mxu0 %vm9806_vm1, %v9805_v60 }
 0x2dc   : > { %8762 = vmatmul.mubr.msk.bf16.vlgmr.msra.gmra.mrb[24].mxu1 %vm636_vm2, %v10082_v43  ;;  %8789 = vmatprep.subr.bf16.mxu0 %v9805_v60 }
 0x2dd   : > { %8772 = vmatpush3.bf16.xpose.msra.mxu1 %v1356_v15  ;;  %8773 = vmatprep.mubr.msk.bf16.mxu1 %vm9806_vm1, %v9805_v60 }
 0x2de   : > { %8783 = vmatprep.subr.bf16.mxu1 %v9805_v60 }
 0x2e2   : > { %8780 = vmatmul.mubr.msk.bf16.vlgmr.msra.gmra.mrb[32].mxu0 %vm636_vm2, %v10072_v41 }
 0x2e3   : > { %8790 = vmatpush3.bf16.msra.mxu0 %v1709_v18  ;;  %8791 = vmatprep.mubr.msk.bf16.mxu0 %vm9806_vm1, %v9805_v60 }
 0x2e4   : > { %8774 = vmatmul.mubr.msk.bf16.vlgmr.msra.gmra.mrb[28].mxu1 %vm636_vm2, %v10098_v45  ;;  %8801 = vmatprep.subr.bf16.mxu0 %v9805_v60 }
 0x2e5   : > { %8784 = vmatpush3.bf16.xpose.msra.mxu1 %v1466_v22  ;;  %8785 = vmatprep.mubr.msk.bf16.mxu1 %vm9806_vm1, %v9805_v60 }
 0x2e6   : > { %8795 = vmatprep.subr.bf16.mxu1 %v9805_v60 }
 0x2ec   : > { %8786 = vmatmul.mubr.msk.bf16.vlgmr.msra.gmra.mrb[32].mxu1 %vm636_vm2, %v10110_v47 }
 0x2ed   : > { %8796 = vmatpush3.bf16.msra.mxu1 %v1757_v26  ;;  %8797 = vmatprep.mubr.msk.bf16.mxu1 %vm9806_vm1, %v9805_v60 }
 0x2ee   : > { %8807 = vmatprep.subr.bf16.mxu1 %v9805_v60 }
 0x37f   : > { %v10246_v27 = vpop.f32.mrb[0].mxu1 }
 0x380   : > { %v8697_v20 = vpop.f32.mrb[1].mxu1  ;;  %v1509_v31 = vsel %vm1508_vm4, %v10246_v27, -inf }
 0x381   : > { %1510 = vmax.xlane.f32.xlu0 %v1509_v31  ;;  %v680_v33 = vpop.f32.mrb[2].mxu1 }
 0x382   : > { %v8698_v35 = vpop.f32.mrb[3].mxu1 }
 0x385   : > { %v10250_v36 = vpop.f32.mrb[8].mxu0 }
 0x386   : > { %v8709_v28 = vpop.f32.mrb[9].mxu0  ;;  %v1515_v41 = vsel %vm1508_vm4, %v10250_v36, -inf }
 0x387   : > { %v790_v43 = vpop.f32.mrb[10].mxu0  ;;  %1516 = vmax.xlane.f32.xlu0 %v1515_v41  ;;  %v10254_v45 = vpop.f32.mrb[4].mxu1 }
 0x388   : > { %v8703_v47 = vpop.f32.mrb[5].mxu1  ;;  %v8710_v29 = vpop.f32.mrb[11].mxu0  ;;  %v1512_v38 = vsel %vm1508_vm4, %v10254_v45, -inf }
 0x389   : > { %1513 = vmax.xlane.f32.xlu1 %v1512_v38  ;;  %v735_v52 = vpop.f32.mrb[6].mxu1 }
 0x38a   : > { %v8704_v53 = vpop.f32.mrb[7].mxu1 }
 0x38d   : > { %v10258_v54 = vpop.f32.mrb[12].mxu0 }
 0x38e   : > { %v8721_v55 = vpop.f32.mrb[13].mxu0  ;;  %v1521_v56 = vsel %vm1508_vm4, %v10258_v54, -inf }
 0x38f   : > { %v10262_v57 = vpop.f32.mrb[8].mxu1  ;;  %1522 = vmax.xlane.f32.xlu0 %v1521_v56  ;;  %v900_v39 = vpop.f32.mrb[14].mxu0 }
 0x390   : > { %v8715_v48 = vpop.f32.mrb[9].mxu1  ;;  %v8722_v58 = vpop.f32.mrb[15].mxu0  ;;  %v1518_v49 = vsel %vm1508_vm4, %v10262_v57, -inf }
 0x391   : > { %v845_v59 = vpop.f32.mrb[10].mxu1 }
 0x392   : > { %v8716_v61 = vpop.f32.mrb[11].mxu1 }
 0x393   : > { %1519 = vmax.xlane.f32.xlu0 %v1518_v49 }
 0x395   : > { %v10266_v62 = vpop.f32.mrb[16].mxu0 }
 0x396   : > { %v8733_v63 = vpop.f32.mrb[17].mxu0  ;;  %v1527_v0 = vsel %vm1508_vm4, %v10266_v62, -inf }
 0x397   : > { %v10270_v1 = vpop.f32.mrb[12].mxu1  ;;  %1528 = vmax.xlane.f32.xlu0 %v1527_v0  ;;  %v1010_v2 = vpop.f32.mrb[18].mxu0 }
 0x398   : > { %v8727_v3 = vpop.f32.mrb[13].mxu1  ;;  %v8734_v4 = vpop.f32.mrb[19].mxu0  ;;  %v1524_v5 = vsel %vm1508_vm4, %v10270_v1, -inf }
 0x399   : > { %1525 = vmax.xlane.f32.xlu1 %v1524_v5  ;;  %v955_v6 = vpop.f32.mrb[14].mxu1 }
 0x39a   : > { %v8728_v7 = vpop.f32.mrb[15].mxu1 }
 0x39d   : > { %v10274_v8 = vpop.f32.mrb[20].mxu0 }
 0x39e   : > { %v8745_v9 = vpop.f32.mrb[21].mxu0  ;;  %v1533_v11 = vsel %vm1508_vm4, %v10274_v8, -inf }
 0x39f   : > { %v10278_v12 = vpop.f32.mrb[16].mxu1  ;;  %1534 = vmax.xlane.f32.xlu0 %v1533_v11  ;;  %v1120_v13 = vpop.f32.mrb[22].mxu0 }
 0x3a0   : > { %v8739_v15 = vpop.f32.mrb[17].mxu1  ;;  %v8746_v16 = vpop.f32.mrb[23].mxu0  ;;  %v1530_v17 = vsel %vm1508_vm4, %v10278_v12, -inf }
 0x3a1   : > { %1531 = vmax.xlane.f32.xlu1 %v1530_v17  ;;  %v1065_v18 = vpop.f32.mrb[18].mxu1  ;;  %v10314_v17 = vpop.permute.xlu0 %1799 }
 0x3a2   : > { %v8740_v22 = vpop.f32.mrb[19].mxu1  ;;  %v10316_v18 = vpop.permute.xlu1 %1847 }
 0x3a5   : > { %v10282_v23 = vpop.f32.mrb[24].mxu0  ;;  %v10318_v22 = vpop.permute.xlu0 %1895 }
 0x3a6   : > { %v8757_v26 = vpop.f32.mrb[25].mxu0  ;;  %v1539_v20 = vsel %vm1508_vm4, %v10282_v23, -inf }
 0x3a7   : > { %v10286_v31 = vpop.f32.mrb[20].mxu1  ;;  %1540 = vmax.xlane.f32.xlu0 %v1539_v20  ;;  %v1230_v33 = vpop.f32.mrb[26].mxu0 }
 0x3a8   : > { %v8751_v35 = vpop.f32.mrb[21].mxu1  ;;  %v8758_v28 = vpop.f32.mrb[27].mxu0  ;;  %v1536_v41 = vsel %vm1508_vm4, %v10286_v31, -inf }
 0x3a9   : > { %1537 = vmax.xlane.f32.xlu1 %v1536_v41  ;;  %v1175_v43 = vpop.f32.mrb[22].mxu1  ;;  %v10320_v26 = vpop.permute.xlu1 %1943 }
 0x3aa   : > { %v8752_v47 = vpop.f32.mrb[23].mxu1  ;;  %v10322_v20 = vpop.permute.xlu0 %1991 }
 0x3ad   : > { %v10290_v29 = vpop.f32.mrb[28].mxu0  ;;  %v10324_v33 = vpop.permute.xlu1 %2039 }
 0x3ae   : > { %v8769_v38 = vpop.f32.mrb[29].mxu0  ;;  %v1545_v52 = vsel %vm1508_vm4, %v10290_v29, -inf  ;;  %v10326_v35 = vpop.permute.xlu0 %2087 }
 0x3af   : > { %v10294_v53 = vpop.f32.mrb[24].mxu1  ;;  %1546 = vmax.xlane.f32.xlu0 %v1545_v52  ;;  %v1340_v55 = vpop.f32.mrb[30].mxu0 }
 0x3b0   : > { %v8763_v56 = vpop.f32.mrb[25].mxu1  ;;  %v8770_v39 = vpop.f32.mrb[31].mxu0  ;;  %v1542_v13 = vsel %vm1508_vm4, %v10294_v53, -inf }
 0x3b1   : > { %v1285_v48 = vpop.f32.mrb[26].mxu1  ;;  %v10328_v28 = vpop.permute.xlu1 %2183 }
 0x3b2   : > { %v8764_v58 = vpop.f32.mrb[27].mxu1 }
 0x3b5   : > { %v10296_v59 = vpop.f32.mrb[32].mxu0  ;;  %v10331_v38 = vpop.permute.xlu1 %2135 }
 0x3b6   : > { %v8781_v61 = vpop.f32.mrb[33].mxu0  ;;  %v1551_v49 = vsel %vm1508_vm4, %v10296_v59, -inf }
 0x3b7   : > { %v10300_v63 = vpop.f32.mrb[28].mxu1  ;;  %1552 = vmax.xlane.f32.xlu0 %v1551_v49  ;;  %v1450_v0 = vpop.f32.mrb[34].mxu0 }
 0x3b8   : > { %v8775_v2 = vpop.f32.mrb[29].mxu1  ;;  %v8782_v3 = vpop.f32.mrb[35].mxu0  ;;  %v1548_v15 = vsel %vm1508_vm4, %v10300_v63, -inf }
 0x3b9   : > { %v1395_v4 = vpop.f32.mrb[30].mxu1 }
 0x3ba   : > { %2231 = vrot.lane.b32.xlu1 %v10102_v46, %s9808_s21  ;;  %v8776_v5 = vpop.f32.mrb[31].mxu1 }
 0x3bf   : > { %v10304_v6 = vpop.f32.mrb[32].mxu1 }
 0x3c0   : > { %v8787_v7 = vpop.f32.mrb[33].mxu1  ;;  %v1554_v16 = vsel %vm1508_vm4, %v10304_v6, -inf }
 0x3c1   : > { %v1505_v9 = vpop.f32.mrb[34].mxu1 }
 0x3c2   : > { %v8788_v11 = vpop.f32.mrb[35].mxu1 }
 0x3cd   : > { %2279 = vrot.lane.b32.xlu0 %v10076_v42, %s9808_s21 }
 0x3de   : > { %1543 = vmax.xlane.f32.xlu1 %v1542_v13 }
 0x3e2   : > { %1549 = vmax.xlane.f32.xlu1 %v1548_v15 }
 0x3e6   : > { %1555 = vmax.xlane.f32.xlu1 %v1554_v16 }
 0x40e   : > { %v1511_v41 = vpop.xlane.xlu0 %1510 }
 0x40f   : > { %v1557_v43 = vsub.f32 %v10246_v27, %v1511_v41 }
 0x411   : > { %v1573_v47 = vmul.f32 1.442695, %v1557_v43 }
 0x413   : > { %9532 = vpow2.f32 %v1573_v47 }
 0x414   : > { %v1517_v52 = vpop.xlane.xlu0 %1516 }
 0x415   : > { %v1559_v55 = vsub.f32 %v10250_v36, %v1517_v52 }
 0x416   : > { %v1514_v56 = vpop.xlane.xlu1 %1513 }
 0x417   : > { %v1577_v39 = vmul.f32 1.442695, %v1559_v55  ;;  %v1558_v48 = vsub.f32 %v10254_v45, %v1514_v56 }
 0x419   : > { %9534 = vpow2.f32 %v1577_v39  ;;  %v1575_v58 = vmul.f32 1.442695, %v1558_v48 }
 0x41b   : > { %9536 = vpow2.f32 %v1575_v58 }
 0x41c   : > { %v1523_v61 = vpop.xlane.xlu0 %1522 }
 0x41d   : > { %v10335_v49 = vpop.eup %9532  ;;  %v1561_v0 = vsub.f32 %v10258_v54, %v1523_v61 }
 0x41e   : > { %v1605_v27 = vsel %vm1508_vm4, %v10335_v49, 0.0 }
 0x41f   : > { %v1581_v2 = vmul.f32 1.442695, %v1561_v0  ;;  %1606 = vadd.xlane.f32.xlu0 %v1605_v27 }
 0x420   : > { %v1520_v3 = vpop.xlane.xlu0 %1519 }
 0x421   : > { %9538 = vpow2.f32 %v1581_v2  ;;  %v1560_v36 = vsub.f32 %v10262_v57, %v1520_v3 }
 0x423   : > { %v10341_v4 = vpop.eup %9534  ;;  %v1579_v45 = vmul.f32 1.442695, %v1560_v36 }
 0x424   : > { %v1529_v5 = vpop.xlane.xlu0 %1528  ;;  %v1611_v7 = vsel %vm1508_vm4, %v10341_v4, 0.0 }
 0x425   : > { %v10345_v9 = vpop.eup %9536  ;;  %9540 = vpow2.f32 %v1579_v45  ;;  %v1563_v54 = vsub.f32 %v10266_v62, %v1529_v5  ;;  %1612 = vadd.xlane.f32.xlu0 %v1611_v7 }
 0x426   : > { %v1526_v11 = vpop.xlane.xlu1 %1525  ;;  %v1608_v13 = vsel %vm1508_vm4, %v10345_v9, 0.0 }
 0x427   : > { %v1585_v15 = vmul.f32 1.442695, %v1563_v54  ;;  %v1562_v57 = vsub.f32 %v10270_v1, %v1526_v11  ;;  %1609 = vadd.xlane.f32.xlu1 %v1608_v13 }
 0x429   : > { %9542 = vpow2.f32 %v1585_v15  ;;  %v1583_v16 = vmul.f32 1.442695, %v1562_v57 }
 0x42b   : > { %v10351_v41 = vpop.eup %9538  ;;  %9544 = vpow2.f32 %v1583_v16 }
 0x42c   : > { %v1535_v43 = vpop.xlane.xlu0 %1534  ;;  %v1617_v47 = vsel %vm1508_vm4, %v10351_v41, 0.0 }
 0x42d   : > { %v1565_v62 = vsub.f32 %v10274_v8, %v1535_v43  ;;  %1618 = vadd.xlane.f32.xlu0 %v1617_v47 }
 0x42e   : > { %v1532_v52 = vpop.xlane.xlu1 %1531 }
 0x42f   : > { %v10356_v55 = vpop.eup %9540  ;;  %v1589_v56 = vmul.f32 1.442695, %v1565_v62  ;;  %v1564_v39 = vsub.f32 %v10278_v12, %v1532_v52 }
 0x430   : > { %v1614_v1 = vsel %vm1508_vm4, %v10356_v55, 0.0 }
 0x431   : > { %9546 = vpow2.f32 %v1589_v56  ;;  %v1587_v48 = vmul.f32 1.442695, %v1564_v39  ;;  %1615 = vadd.xlane.f32.xlu1 %v1614_v1 }
 0x433   : > { %v10361_v58 = vpop.eup %9542  ;;  %9548 = vpow2.f32 %v1587_v48 }
 0x434   : > { %v1623_v61 = vsel %vm1508_vm4, %v10361_v58, 0.0  ;;  %v1541_v54 = vpop.xlane.xlu0 %1540 }
 0x435   : > { %v10365_v8 = vpop.eup %9544  ;;  %1624 = vadd.xlane.f32.xlu0 %v1623_v61  ;;  %v1567_v11 = vsub.f32 %v10282_v23, %v1541_v54 }
 0x436   : > { %v1538_v0 = vpop.xlane.xlu1 %1537  ;;  %v1620_v27 = vsel %vm1508_vm4, %v10365_v8, 0.0 }
 0x437   : > { %v1566_v12 = vsub.f32 %v10286_v31, %v1538_v0  ;;  %1621 = vadd.xlane.f32.xlu1 %v1620_v27  ;;  %v1593_v15 = vmul.f32 1.442695, %v1567_v11 }
 0x439   : > { %v1591_v2 = vmul.f32 1.442695, %v1566_v12 }
 0x43a   : > { %v10386_v43 = vpop.permute.xlu1 %2231 }
 0x43b   : > { %v10370_v3 = vpop.eup %9546  ;;  %9550 = vpow2.f32 %v1591_v2 }
 0x43c   : > { %v1629_v36 = vsel %vm1508_vm4, %v10370_v3, 0.0  ;;  %v1547_v13 = vpop.xlane.xlu0 %1546  ;;  %9552 = vpow2.f32 %v1593_v15 }
 0x43d   : > { %v10374_v45 = vpop.eup %9548  ;;  %1630 = vadd.xlane.f32.xlu1 %v1629_v36  ;;  %v1569_v57 = vsub.f32 %v10290_v29, %v1547_v13 }
 0x43e   : > { %v1626_v5 = vsel %vm1508_vm4, %v10374_v45, 0.0 }
 0x43f   : > { %v1597_v62 = vmul.f32 1.442695, %v1569_v57 }
 0x441   : > { %1627 = vadd.xlane.f32.xlu1 %v1626_v5  ;;  %9554 = vpow2.f32 %v1597_v62 }
 0x444   : > { %v1553_v16 = vpop.xlane.xlu0 %1552 }
 0x445   : > { %v10378_v7 = vpop.eup %9550  ;;  %v1571_v47 = vsub.f32 %v10296_v59, %v1553_v16 }
 0x446   : > { %v1632_v31 = vsel %vm1508_vm4, %v10378_v7, 0.0  ;;  %v10391_v61 = vpop.eup %9552 }
 0x447   : > { %1633 = vadd.xlane.f32.xlu0 %v1632_v31  ;;  %v1601_v52 = vmul.f32 1.442695, %v1571_v47  ;;  %v1635_v59 = vsel %vm1508_vm4, %v10391_v61, 0.0 }
 0x448   : > { %v10428_v13 = vpop.permute.xlu0 %2279 }
 0x449   : > { %9556 = vpow2.f32 %v1601_v52 }
 0x44b   : > { %v10395_v0 = vpop.eup %9554 }
 0x452   : > { %2327 = vrot.lane.b32.xlu1 %v10114_v50, %s9808_s21 }
 0x453   : > { %v10397_v27 = vpop.eup %9556 }
 0x454   : > { %v1647_v2 = vsel %vm1508_vm4, %v10397_v27, 0.0 }
 0x46b   : > { %v1544_v56 = vpop.xlane.xlu1 %1543 }
 0x46c   : > { %v1568_v39 = vsub.f32 %v10294_v53, %v1544_v56  ;;  %v1641_v53 = vsel %vm1508_vm4, %v10395_v0, 0.0 }
 0x46e   : > { %v1595_v1 = vmul.f32 1.442695, %v1568_v39 }
 0x46f   : > { %v1550_v48 = vpop.xlane.xlu1 %1549 }
 0x470   : > { %9558 = vpow2.f32 %v1595_v1  ;;  %v1570_v23 = vsub.f32 %v10300_v63, %v1550_v48  ;;  %v1805_v1 = vsel %vm1707_vm3, %v10314_v17, 0 }
 0x472   : > { %v1599_v29 = vmul.f32 1.442695, %v1570_v23 }
 0x473   : > { %v1556_v31 = vpop.xlane.xlu1 %1555 }
 0x474   : > { %9560 = vpow2.f32 %v1599_v29  ;;  %v1572_v54 = vsub.f32 %v10304_v6, %v1556_v31 }
 0x476   : > { %1636 = vadd.xlane.f32.xlu1 %v1635_v59  ;;  %v1603_v11 = vmul.f32 1.442695, %v1572_v54 }
 0x478   : > { %9562 = vpow2.f32 %v1603_v11 }
 0x47a   : > { %v10401_v12 = vpop.eup %9558  ;;  %1642 = vadd.xlane.f32.xlu1 %v1641_v53 }
 0x47b   : > { %v1638_v63 = vsel %vm1508_vm4, %v10401_v12, 0.0 }
 0x47c   : > { %1639 = vadd.xlane.f32.xlu0 %v1638_v63 }
 0x47e   : > { %v10407_v36 = vpop.eup %9560  ;;  %1648 = vadd.xlane.f32.xlu1 %v1647_v2  ;;  %v1901_v2 = vsel %vm1707_vm3, %v10318_v22, 0 }
 0x47f   : > { %v1644_v5 = vsel %vm1508_vm4, %v10407_v36, 0.0 }
 0x480   : > { %1645 = vadd.xlane.f32.xlu0 %v1644_v5 }
 0x482   : > { %v10434_v6 = vpop.eup %9562 }
 0x483   : > { %v1650_v47 = vsel %vm1508_vm4, %v10434_v6, 0.0 }
 0x48f   : > { %2423 = vrot.lane.b32.xlu1 %v10122_v51, %s9808_s21 }
 0x493   : > { %2563 = vrot.lane.b32.xlu1 %v9991_v14, %s9809_s22 }
 0x496   : > { %2375 = vrot.lane.b32.xlu0 %v10092_v21, %s9808_s21 }
 0x497   : > { %2561 = vrot.lane.b32.xlu1 %v9991_v14, %s9810_s23 }
 0x49b   : > { %2663 = vrot.lane.b32.xlu1 %v10029_v30, %s9809_s22 }
 0x49f   : > { %2661 = vrot.lane.b32.xlu1 %v10029_v30, %s9810_s23 }
 0x4a3   : > { %2763 = vrot.lane.b32.xlu1 %v10048_v34, %s9809_s22 }
 0x4a7   : > { %2761 = vrot.lane.b32.xlu1 %v10048_v34, %s9810_s23 }
 0x4ab   : > { %2863 = vrot.lane.b32.xlu1 %v10063_v40, %s9809_s22 }
 0x4ac   : > { %v1607_v15 = vpop.xlane.xlu0 %1606 }
 0x4ad   : > { %9564 = vrcp.f32 %v1607_v15 }
 0x4af   : > { %2861 = vrot.lane.b32.xlu1 %v10063_v40, %s9810_s23 }
 0x4b2   : > { %v1613_v57 = vpop.xlane.xlu0 %1612 }
 0x4b3   : > { %9566 = vrcp.f32 %v1613_v57  ;;  %2963 = vrot.lane.b32.xlu1 %v10086_v44, %s9809_s22 }
 0x4b4   : > { %v1610_v16 = vpop.xlane.xlu1 %1609 }
 0x4b5   : > { %9568 = vrcp.f32 %v1610_v16  ;;  %1651 = vadd.xlane.f32.xlu0 %v1650_v47 }
 0x4b7   : > { %v9565_v62 = vpop.eup %9564  ;;  %2961 = vrot.lane.b32.xlu1 %v10086_v44, %s9810_s23 }
 0x4b8   : > { %v1669_v52 = vmul.f32 %v9565_v62, %v10335_v49 }
 0x4ba   : > { %v1619_v56 = vpop.xlane.xlu0 %1618  ;;  %v1685_v39 = vpack.c.bf16 %v1669_v52, %v1669_v52 }
 0x4bb   : > { %9570 = vrcp.f32 %v1619_v56  ;;  %3063 = vrot.lane.b32.xlu1 %v10102_v46, %s9809_s22 }
 0x4bc   : > { %8792 = vmatmul.mubr.msk.bf16.vlgmr.msra.gmra.mrb[36].mxu0 %vm1703_vm5, %v1685_v39 }
 0x4bd   : > { %v9567_v48 = vpop.eup %9566  ;;  %8802 = vmatpush3.bf16.msra.mxu0 %v1805_v1  ;;  %8803 = vmatprep.mubr.msk.bf16.mxu0 %vm9806_vm1, %v9805_v60 }
 0x4be   : > { %v1616_v23 = vpop.xlane.xlu1 %1615  ;;  %8813 = vmatprep.subr.bf16.mxu0 %v9805_v60  ;;  %v1671_v49 = vmul.f32 %v9567_v48, %v10341_v4  ;;  %v1853_v4 = vsel %vm1707_vm3, %v10316_v18, 0 }
 0x4bf   : > { %v9569_v29 = vpop.eup %9568  ;;  %9572 = vrcp.f32 %v1616_v23  ;;  %3061 = vrot.lane.b32.xlu1 %v10102_v46, %s9810_s23 }
 0x4c0   : > { %v1670_v59 = vmul.f32 %v9569_v29, %v10345_v9  ;;  %v1687_v63 = vpack.c.bf16 %v1671_v49, %v1671_v49  ;;  %v2141_v49 = vsel %vm1707_vm3, %v10331_v38, 0  ;;  %v2237_v29 = vsel %vm1707_vm3, %v10386_v43, 0 }
 0x4c2   : > { %v1625_v17 = vpop.xlane.xlu0 %1624  ;;  %v1686_v53 = vpack.c.bf16 %v1670_v59, %v1670_v59 }
 0x4c3   : > { %9574 = vrcp.f32 %v1625_v17  ;;  %3163 = vrot.lane.b32.xlu1 %v10114_v50, %s9809_s22 }
 0x4c4   : > { %8798 = vmatmul.mubr.msk.bf16.vlgmr.msra.gmra.mrb[36].mxu1 %vm1703_vm5, %v1686_v53  ;;  %v1622_v5 = vpop.xlane.xlu1 %1621  ;;  %8804 = vmatmul.mubr.msk.bf16.vlgmr.msra.gmra.mrb[40].mxu0 %vm1703_vm5, %v1687_v63 }
 0x4c5   : > { %v9571_v31 = vpop.eup %9570  ;;  %8808 = vmatpush3.bf16.msra.mxu1 %v1853_v4  ;;  %9576 = vrcp.f32 %v1622_v5  ;;  %8814 = vmatpush3.bf16.msra.mxu0 %v1901_v2 }
 0x4c6   : > { %8815 = vmatprep.mubr.msk.bf16.mxu0 %vm9806_vm1, %v9805_v60  ;;  %8825 = vmatprep.subr.bf16.mxu0 %v9805_v60  ;;  %v1673_v9 = vmul.f32 %v9571_v31, %v10351_v41  ;;  %v1997_v41 = vsel %vm1707_vm3, %v10322_v20, 0 }
 0x4c7   : > { %3161 = vrot.lane.b32.xlu1 %v10114_v50, %s9810_s23  ;;  %8809 = vmatprep.mubr.msk.bf16.mxu1 %vm9806_vm1, %v9805_v60 }
 0x4c8   : > { %8819 = vmatprep.subr.bf16.mxu1 %v9805_v60  ;;  %v1689_v54 = vpack.c.bf16 %v1673_v9, %v1673_v9  ;;  %v2285_v9 = vsel %vm1707_vm3, %v10428_v13, 0 }
 0x4c9   : > { %v9573_v18 = vpop.eup %9572 }
 0x4ca   : > { %v1631_v22 = vpop.xlane.xlu1 %1630  ;;  %v1672_v11 = vmul.f32 %v9573_v18, %v10356_v55  ;;  %v1949_v55 = vsel %vm1707_vm3, %v10320_v26, 0 }
 0x4cb   : > { %9578 = vrcp.f32 %v1631_v22  ;;  %2513 = vrot.lane.b32.xlu0 %v9984_v10, %s9809_s22  ;;  %3263 = vrot.lane.b32.xlu1 %v10122_v51, %s9809_s22 }
 0x4cc   : > { %8816 = vmatmul.mubr.msk.bf16.vlgmr.msra.gmra.mrb[44].mxu0 %vm1703_vm5, %v1689_v54  ;;  %v1688_v15 = vpack.c.bf16 %v1672_v11, %v1672_v11 }
 0x4cd   : > { %v9575_v57 = vpop.eup %9574  ;;  %8826 = vmatpush3.bf16.msra.mxu0 %v1997_v41  ;;  %8827 = vmatprep.mubr.msk.bf16.mxu0 %vm9806_vm1, %v9805_v60 }
 0x4ce   : > { %8810 = vmatmul.mubr.msk.bf16.vlgmr.msra.gmra.mrb[40].mxu1 %vm1703_vm5, %v1688_v15  ;;  %v1628_v16 = vpop.xlane.xlu1 %1627  ;;  %8837 = vmatprep.subr.bf16.mxu0 %v9805_v60  ;;  %v1675_v47 = vmul.f32 %v9575_v57, %v10361_v58  ;;  %v2093_v58 = vsel %vm1707_vm3, %v10326_v35, 0 }
 0x4cf   : > { %v9577_v62 = vpop.eup %9576  ;;  %8820 = vmatpush3.bf16.msra.mxu1 %v1949_v55  ;;  %9580 = vrcp.f32 %v1628_v16  ;;  %2511 = vrot.lane.b32.xlu0 %v9984_v10, %s9810_s23 }
 0x4d0   : > { %3261 = vrot.lane.b32.xlu1 %v10122_v51, %s9810_s23  ;;  %8821 = vmatprep.mubr.msk.bf16.mxu1 %vm9806_vm1, %v9805_v60  ;;  %v1674_v26 = vmul.f32 %v9577_v62, %v10365_v8  ;;  %v1691_v20 = vpack.c.bf16 %v1675_v47, %v1675_v47  ;;  %v2045_v8 = vsel %vm1707_vm3, %v10324_v33, 0 }
 0x4d1   : > { %8831 = vmatprep.subr.bf16.mxu1 %v9805_v60 }
 0x4d2   : > { %v1690_v56 = vpack.c.bf16 %v1674_v26, %v1674_v26 }
 0x4d3   : > { %2613 = vrot.lane.b32.xlu0 %v10010_v24, %s9809_s22 }
 0x4d4   : > { %3551 = vrot.lane.b32.xlu1 %v9991_v14, %s9811_s24  ;;  %8828 = vmatmul.mubr.msk.bf16.vlgmr.msra.gmra.mrb[48].mxu0 %vm1703_vm5, %v1691_v20  ;;  %v1634_v52 = vpop.xlane.xlu0 %1633 }
 0x4d5   : > { %v9579_v39 = vpop.eup %9578  ;;  %8838 = vmatpush3.bf16.msra.mxu0 %v2093_v58  ;;  %9582 = vrcp.f32 %v1634_v52  ;;  %8839 = vmatprep.mubr.msk.bf16.mxu0 %vm9806_vm1, %v9805_v60 }
 0x4d6   : > { %8822 = vmatmul.mubr.msk.bf16.vlgmr.msra.gmra.mrb[44].mxu1 %vm1703_vm5, %v1690_v56  ;;  %8849 = vmatprep.subr.bf16.mxu0 %v9805_v60  ;;  %v1677_v35 = vmul.f32 %v9579_v39, %v10370_v3  ;;  %v2189_v3 = vsel %vm1707_vm3, %v10328_v28, 0 }
 0x4d7   : > { %8832 = vmatpush3.bf16.msra.mxu1 %v2045_v8  ;;  %2611 = vrot.lane.b32.xlu0 %v10010_v24, %s9810_s23 }
 0x4d8   : > { %3647 = vrot.lane.b32.xlu1 %v10029_v30, %s9811_s24  ;;  %8833 = vmatprep.mubr.msk.bf16.mxu1 %vm9806_vm1, %v9805_v60  ;;  %v1693_v33 = vpack.c.bf16 %v1677_v35, %v1677_v35 }
 0x4d9   : > { %v9581_v1 = vpop.eup %9580  ;;  %8843 = vmatprep.subr.bf16.mxu1 %v9805_v60 }
 0x4da   : > { %v1676_v48 = vmul.f32 %v9581_v1, %v10374_v45 }
 0x4db   : > { %2713 = vrot.lane.b32.xlu0 %v10000_v19, %s9809_s22 }
 0x4dc   : > { %3743 = vrot.lane.b32.xlu1 %v10048_v34, %s9811_s24  ;;  %8840 = vmatmul.mubr.msk.bf16.vlgmr.msra.gmra.mrb[52].mxu0 %vm1703_vm5, %v1693_v33  ;;  %v1692_v23 = vpack.c.bf16 %v1676_v48, %v1676_v48 }
 0x4dd   : > { %8850 = vmatpush3.bf16.msra.mxu0 %v2189_v3  ;;  %8851 = vmatprep.mubr.msk.bf16.mxu0 %vm9806_vm1, %v9805_v60 }
 0x4de   : > { %8834 = vmatmul.mubr.msk.bf16.vlgmr.msra.gmra.mrb[48].mxu1 %vm1703_vm5, %v1692_v23  ;;  %8861 = vmatprep.subr.bf16.mxu0 %v9805_v60 }
 0x4df   : > { %v9583_v45 = vpop.eup %9582  ;;  %8844 = vmatpush3.bf16.msra.mxu1 %v2141_v49  ;;  %2711 = vrot.lane.b32.xlu0 %v10000_v19, %s9810_s23 }
 0x4e0   : > { %3839 = vrot.lane.b32.xlu1 %v10063_v40, %s9811_s24  ;;  %8845 = vmatprep.mubr.msk.bf16.mxu1 %vm9806_vm1, %v9805_v60  ;;  %v1678_v28 = vmul.f32 %v9583_v45, %v10378_v7  ;;  %v2328_v7 = vpop.permute.xlu1 %2327 }
 0x4e1   : > { %8855 = vmatprep.subr.bf16.mxu1 %v9805_v60  ;;  %v2333_v41 = vsel %vm1707_vm3, %v2328_v7, 0 }
 0x4e2   : > { %v1694_v38 = vpack.c.bf16 %v1678_v28, %v1678_v28 }
 0x4e3   : > { %2813 = vrot.lane.b32.xlu0 %v10016_v25, %s9809_s22 }
 0x4e4   : > { %3935 = vrot.lane.b32.xlu1 %v10086_v44, %s9811_s24 }
 0x4e6   : > { %8846 = vmatmul.mubr.msk.bf16.vlgmr.msra.gmra.mrb[52].mxu1 %vm1703_vm5, %v1694_v38 }
 0x4e7   : > { %8856 = vmatpush3.bf16.msra.mxu1 %v2237_v29  ;;  %2811 = vrot.lane.b32.xlu0 %v10016_v25, %s9810_s23 }
 0x4e8   : > { %3983 = vrot.lane.b32.xlu1 %v10057_v37, %s9811_s24  ;;  %8857 = vmatprep.mubr.msk.bf16.mxu1 %vm9806_vm1, %v9805_v60 }
 0x4e9   : > { %8867 = vmatprep.subr.bf16.mxu1 %v9805_v60 }
 0x4eb   : > { %2913 = vrot.lane.b32.xlu0 %v10038_v32, %s9809_s22 }
 0x4ec   : > { %4031 = vrot.lane.b32.xlu1 %v10102_v46, %s9811_s24 }
 0x4ef   : > { %2911 = vrot.lane.b32.xlu0 %v10038_v32, %s9810_s23 }
 0x4f3   : > { %3013 = vrot.lane.b32.xlu0 %v10057_v37, %s9809_s22 }
 0x4f7   : > { %3011 = vrot.lane.b32.xlu0 %v10057_v37, %s9810_s23 }
 0x4fb   : > { %3113 = vrot.lane.b32.xlu0 %v10076_v42, %s9809_s22 }
 0x4ff   : > { %3111 = vrot.lane.b32.xlu0 %v10076_v42, %s9810_s23 }
 0x503   : > { %3213 = vrot.lane.b32.xlu0 %v10092_v21, %s9809_s22  ;;  %v1637_v43 = vpop.xlane.xlu1 %1636 }
 0x504   : > { %9584 = vrcp.f32 %v1637_v43 }
 0x507   : > { %3211 = vrot.lane.b32.xlu0 %v10092_v21, %s9810_s23  ;;  %v1643_v59 = vpop.xlane.xlu1 %1642 }
 0x508   : > { %9586 = vrcp.f32 %v1643_v59 }
 0x509   : > { %v1640_v17 = vpop.xlane.xlu0 %1639 }
 0x50a   : > { %9588 = vrcp.f32 %v1640_v17 }
 0x50b   : > { %3503 = vrot.lane.b32.xlu0 %v9984_v10, %s9811_s24  ;;  %v1649_v53 = vpop.xlane.xlu1 %1648 }
 0x50d   : > { %v1646_v63 = vpop.xlane.xlu0 %1645 }
 0x50e   : > { %v9585_v2 = vpop.eup %9584  ;;  %9590 = vrcp.f32 %v1646_v63 }
 0x50f   : > { %3599 = vrot.lane.b32.xlu0 %v10010_v24, %s9811_s24  ;;  %v1679_v4 = vmul.f32 %v9585_v2, %v10391_v61  ;;  %9592 = vrcp.f32 %v1649_v53  ;;  %v2424_v16 = vpop.permute.xlu1 %2423 }
 0x510   : > { %v2429_v62 = vsel %vm1707_vm3, %v2424_v16, 0 }
 0x511   : > { %v1695_v5 = vpack.c.bf16 %v1679_v4, %v1679_v4  ;;  %v2376_v11 = vpop.permute.xlu0 %2375 }
 0x512   : > { %v9587_v31 = vpop.eup %9586 }
 0x513   : > { %3695 = vrot.lane.b32.xlu0 %v10000_v19, %s9811_s24  ;;  %8852 = vmatmul.mubr.msk.bf16.vlgmr.msra.gmra.mrb[56].mxu0 %vm1703_vm5, %v1695_v5  ;;  %v1681_v61 = vmul.f32 %v9587_v31, %v10395_v0 }
 0x514   : > { %v9589_v18 = vpop.eup %9588  ;;  %8862 = vmatpush3.bf16.msra.mxu0 %v2285_v9  ;;  %8863 = vmatprep.mubr.msk.bf16.mxu0 %vm9806_vm1, %v9805_v60 }
 0x515   : > { %v1680_v22 = vmul.f32 %v9589_v18, %v10401_v12  ;;  %8873 = vmatprep.subr.bf16.mxu0 %v9805_v60  ;;  %v1697_v15 = vpack.c.bf16 %v1681_v61, %v1681_v61  ;;  %v2381_v12 = vsel %vm1707_vm3, %v2376_v11, 0 }
 0x517   : > { %3791 = vrot.lane.b32.xlu0 %v10016_v25, %s9811_s24  ;;  %v1696_v13 = vpack.c.bf16 %v1680_v22, %v1680_v22 }
 0x518   : > { %v9591_v54 = vpop.eup %9590 }
 0x519   : > { %8858 = vmatmul.mubr.msk.bf16.vlgmr.msra.gmra.mrb[56].mxu1 %vm1703_vm5, %v1696_v13  ;;  %v9593_v57 = vpop.eup %9592  ;;  %v1682_v0 = vmul.f32 %v9591_v54, %v10407_v36 }
 0x51a   : > { %8868 = vmatpush3.bf16.msra.mxu1 %v2333_v41  ;;  %8869 = vmatprep.mubr.msk.bf16.mxu1 %vm9806_vm1, %v9805_v60  ;;  %v1683_v55 = vmul.f32 %v9593_v57, %v10397_v27  ;;  %v2564_v27 = vpop.permute.xlu1 %2563 }
 0x51b   : > { %3887 = vrot.lane.b32.xlu0 %v10038_v32, %s9811_s24  ;;  %8864 = vmatmul.mubr.msk.bf16.vlgmr.msra.gmra.mrb[60].mxu0 %vm1703_vm5, %v1697_v15  ;;  %v1698_v47 = vpack.c.bf16 %v1682_v0, %v1682_v0  ;;  %v2569_v45 = vsel %vm636_vm2, %v2564_v27, 0 }
 0x51c   : > { %8874 = vmatpush3.bf16.msra.mxu0 %v2381_v12  ;;  %8879 = vmatprep.subr.bf16.mxu1 %v9805_v60  ;;  %v1699_v26 = vpack.c.bf16 %v1683_v55, %v1683_v55 }
 0x51d   : > { %8875 = vmatprep.mubr.msk.bf16.mxu0 %vm9806_vm1, %v9805_v60  ;;  %8885 = vmatprep.subr.bf16.mxu0 %v9805_v60 }
 0x51e   : > { %v2562_v36 = vpop.permute.xlu1 %2561 }
 0x521   : > { %8870 = vmatmul.mubr.msk.bf16.vlgmr.msra.gmra.mrb[60].mxu1 %vm1703_vm5, %v1698_v47 }
 0x522   : > { %8880 = vmatpush3.bf16.msra.mxu1 %v2429_v62  ;;  %8881 = vmatprep.mubr.msk.bf16.mxu1 %vm9806_vm1, %v9805_v60  ;;  %v2664_v20 = vpop.permute.xlu1 %2663 }
 0x523   : > { %8876 = vmatmul.mubr.msk.bf16.vlgmr.msra.gmra.mrb[64].mxu0 %vm1703_vm5, %v1699_v26  ;;  %8891 = vmatprep.subr.bf16.mxu1 %v9805_v60  ;;  %v2669_v43 = vsel %vm636_vm2, %v2664_v20, 0 }
 0x524   : > { %8887 = vmatprep.mubr.msk.bf16.mxu0 %vm9806_vm1, %v9805_v60 }
 0x526   : > { %v2662_v58 = vpop.permute.xlu1 %2661 }
 0x52a   : > { %v2764_v39 = vpop.permute.xlu1 %2763 }
 0x52b   : > { %v2769_v2 = vsel %vm636_vm2, %v2764_v39, 0 }
 0x52e   : > { %v2762_v33 = vpop.permute.xlu1 %2761 }
 0x532   : > { %v2864_v38 = vpop.permute.xlu1 %2863 }
 0x533   : > { %v2869_v18 = vsel %vm636_vm2, %v2864_v38, 0 }
 0x536   : > { %v2862_v7 = vpop.permute.xlu1 %2861 }
 0x53a   : > { %v2964_v53 = vpop.permute.xlu1 %2963 }
 0x53b   : > { %v2969_v41 = vsel %vm636_vm2, %v2964_v53, 0 }
 0x53e   : > { %v2962_v5 = vpop.permute.xlu1 %2961 }
 0x542   : > { %v1652_v52 = vpop.xlane.xlu0 %1651  ;;  %v3064_v61 = vpop.permute.xlu1 %3063 }
 0x543   : > { %9594 = vrcp.f32 %v1652_v52  ;;  %v3069_v55 = vsel %vm636_vm2, %v3064_v61, 0 }
 0x546   : > { %v2514_v56 = vpop.permute.xlu0 %2513  ;;  %v3062_v11 = vpop.permute.xlu1 %3061 }
 0x547   : > { %v2519_v8 = vsel %vm636_vm2, %v2514_v56, 0 }
 0x548   : > { %8886 = vmatpush3.bf16.xpose.msra.mxu0 %v2519_v8 }
 0x549   : > { %8897 = vmatprep.subr.bf16.mxu0 %v9805_v60 }
 0x54a   : > { %v2512_v35 = vpop.permute.xlu0 %2511  ;;  %v3164_v12 = vpop.permute.xlu1 %3163 }
 0x54b   : > { %v3169_v27 = vsel %vm636_vm2, %v3164_v12, 0 }
 0x54d   : > { %v9595_v1 = vpop.eup %9594 }
 0x54e   : > { %v2614_v48 = vpop.permute.xlu0 %2613  ;;  %v1684_v3 = vmul.f32 %v9595_v1, %v10434_v6  ;;  %v3162_v47 = vpop.permute.xlu1 %3161 }
 0x54f   : > { %v2619_v23 = vsel %vm636_vm2, %v2614_v48, 0  ;;  %8888 = vmatmul.mubr.msk.bf16.vlgmr.msra.gmra.mrb[68].mxu0 %vm636_vm2, %v2512_v35 }
 0x550   : > { %8898 = vmatpush3.bf16.xpose.msra.mxu0 %v2619_v23  ;;  %v1700_v49 = vpack.c.bf16 %v1684_v3, %v1684_v3  ;;  %8899 = vmatprep.mubr.msk.bf16.mxu0 %vm9806_vm1, %v9805_v60 }
 0x551   : > { %8909 = vmatprep.subr.bf16.mxu0 %v9805_v60 }
 0x552   : > { %8882 = vmatmul.mubr.msk.bf16.vlgmr.msra.gmra.mrb[64].mxu1 %vm1703_vm5, %v1700_v49  ;;  %v2612_v28 = vpop.permute.xlu0 %2611  ;;  %v3264_v20 = vpop.permute.xlu1 %3263 }
 0x553   : > { %8892 = vmatpush3.bf16.xpose.msra.mxu1 %v2569_v45  ;;  %8893 = vmatprep.mubr.msk.bf16.mxu1 %vm9806_vm1, %v9805_v60  ;;  %v3269_v39 = vsel %vm636_vm2, %v3264_v20, 0 }
 0x554   : > { %8903 = vmatprep.subr.bf16.mxu1 %v9805_v60 }
 0x556   : > { %v2714_v6 = vpop.permute.xlu0 %2713  ;;  %v3262_v56 = vpop.permute.xlu1 %3261 }
 0x557   : > { %v2719_v29 = vsel %vm636_vm2, %v2714_v6, 0  ;;  %8900 = vmatmul.mubr.msk.bf16.vlgmr.msra.gmra.mrb[72].mxu0 %vm636_vm2, %v2612_v28 }
 0x558   : > { %8910 = vmatpush3.bf16.xpose.msra.mxu0 %v2719_v29  ;;  %8911 = vmatprep.mubr.msk.bf16.mxu0 %vm9806_vm1, %v9805_v60 }
 0x559   : > { %8921 = vmatprep.subr.bf16.mxu0 %v9805_v60 }
 0x55a   : > { %8894 = vmatmul.mubr.msk.bf16.vlgmr.msra.gmra.mrb[68].mxu1 %vm636_vm2, %v2562_v36  ;;  %v2712_v59 = vpop.permute.xlu0 %2711  ;;  %v3552_v8 = vpop.permute.xlu1 %3551 }
 0x55b   : > { %8904 = vmatpush3.bf16.xpose.msra.mxu1 %v2669_v43  ;;  %8905 = vmatprep.mubr.msk.bf16.mxu1 %vm9806_vm1, %v9805_v60  ;;  %v3557_v48 = vsel %vm1707_vm3, %v3552_v8, 0 }
 0x55c   : > { %8915 = vmatprep.subr.bf16.mxu1 %v9805_v60 }
 0x55e   : > { %v2814_v17 = vpop.permute.xlu0 %2813 }
 0x55f   : > { %v2819_v63 = vsel %vm636_vm2, %v2814_v17, 0  ;;  %8912 = vmatmul.mubr.msk.bf16.vlgmr.msra.gmra.mrb[76].mxu0 %vm636_vm2, %v2712_v59 }
 0x560   : > { %8922 = vmatpush3.bf16.xpose.msra.mxu0 %v2819_v63  ;;  %8923 = vmatprep.mubr.msk.bf16.mxu0 %vm9806_vm1, %v9805_v60 }
 0x561   : > { %8933 = vmatprep.subr.bf16.mxu0 %v9805_v60 }
 0x562   : > { %8906 = vmatmul.mubr.msk.bf16.vlgmr.msra.gmra.mrb[72].mxu1 %vm636_vm2, %v2662_v58  ;;  %v2812_v4 = vpop.permute.xlu0 %2811 }
 0x563   : > { %8916 = vmatpush3.bf16.xpose.msra.mxu1 %v2769_v2  ;;  %8917 = vmatprep.mubr.msk.bf16.mxu1 %vm9806_vm1, %v9805_v60 }
 0x564   : > { %8927 = vmatprep.subr.bf16.mxu1 %v9805_v60 }
 0x566   : > { %v2914_v31 = vpop.permute.xlu0 %2913 }
 0x567   : > { %v2919_v9 = vsel %vm636_vm2, %v2914_v31, 0  ;;  %8924 = vmatmul.mubr.msk.bf16.vlgmr.msra.gmra.mrb[80].mxu0 %vm636_vm2, %v2812_v4 }
 0x568   : > { %8934 = vmatpush3.bf16.xpose.msra.mxu0 %v2919_v9  ;;  %8935 = vmatprep.mubr.msk.bf16.mxu0 %vm9806_vm1, %v9805_v60 }
 0x569   : > { %8945 = vmatprep.subr.bf16.mxu0 %v9805_v60 }
 0x56a   : > { %8918 = vmatmul.mubr.msk.bf16.vlgmr.msra.gmra.mrb[76].mxu1 %vm636_vm2, %v2762_v33  ;;  %v2912_v22 = vpop.permute.xlu0 %2911 }
 0x56b   : > { %8928 = vmatpush3.bf16.xpose.msra.mxu1 %v2869_v18  ;;  %8929 = vmatprep.mubr.msk.bf16.mxu1 %vm9806_vm1, %v9805_v60 }
 0x56c   : > { %8939 = vmatprep.subr.bf16.mxu1 %v9805_v60 }
 0x56e   : > { %v3014_v13 = vpop.permute.xlu0 %3013 }
 0x56f   : > { %v3019_v54 = vsel %vm636_vm2, %v3014_v13, 0  ;;  %8936 = vmatmul.mubr.msk.bf16.vlgmr.msra.gmra.mrb[84].mxu0 %vm636_vm2, %v2912_v22 }
 0x570   : > { %8946 = vmatpush3.bf16.xpose.msra.mxu0 %v3019_v54  ;;  %8947 = vmatprep.mubr.msk.bf16.mxu0 %vm9806_vm1, %v9805_v60 }
 0x571   : > { %8957 = vmatprep.subr.bf16.mxu0 %v9805_v60 }
 0x572   : > { %8930 = vmatmul.mubr.msk.bf16.vlgmr.msra.gmra.mrb[80].mxu1 %vm636_vm2, %v2862_v7  ;;  %v3012_v15 = vpop.permute.xlu0 %3011 }
 0x573   : > { %8940 = vmatpush3.bf16.xpose.msra.mxu1 %v2969_v41  ;;  %8941 = vmatprep.mubr.msk.bf16.mxu1 %vm9806_vm1, %v9805_v60 }
 0x574   : > { %8951 = vmatprep.subr.bf16.mxu1 %v9805_v60 }
 0x576   : > { %v3114_v57 = vpop.permute.xlu0 %3113 }
 0x577   : > { %v3119_v0 = vsel %vm636_vm2, %v3114_v57, 0  ;;  %8948 = vmatmul.mubr.msk.bf16.vlgmr.msra.gmra.mrb[88].mxu0 %vm636_vm2, %v3012_v15 }
 0x578   : > { %8958 = vmatpush3.bf16.xpose.msra.mxu0 %v3119_v0  ;;  %8959 = vmatprep.mubr.msk.bf16.mxu0 %vm9806_vm1, %v9805_v60 }
 0x579   : > { %8969 = vmatprep.subr.bf16.mxu0 %v9805_v60 }
 0x57a   : > { %8942 = vmatmul.mubr.msk.bf16.vlgmr.msra.gmra.mrb[84].mxu1 %vm636_vm2, %v2962_v5  ;;  %v3112_v16 = vpop.permute.xlu0 %3111 }
 0x57b   : > { %8952 = vmatpush3.bf16.xpose.msra.mxu1 %v3069_v55  ;;  %8953 = vmatprep.mubr.msk.bf16.mxu1 %vm9806_vm1, %v9805_v60 }
 0x57c   : > { %8963 = vmatprep.subr.bf16.mxu1 %v9805_v60 }
 0x57e   : > { %v3214_v62 = vpop.permute.xlu0 %3213 }
 0x57f   : > { %v3219_v26 = vsel %vm636_vm2, %v3214_v62, 0  ;;  %8960 = vmatmul.mubr.msk.bf16.vlgmr.msra.gmra.mrb[92].mxu0 %vm636_vm2, %v3112_v16 }
 0x580   : > { %8970 = vmatpush3.bf16.xpose.msra.mxu0 %v3219_v26  ;;  %8971 = vmatprep.mubr.msk.bf16.mxu0 %vm9806_vm1, %v9805_v60 }
 0x581   : > { %8981 = vmatprep.subr.bf16.mxu0 %v9805_v60 }
 0x582   : > { %8954 = vmatmul.mubr.msk.bf16.vlgmr.msra.gmra.mrb[88].mxu1 %vm636_vm2, %v3062_v11  ;;  %v3212_v36 = vpop.permute.xlu0 %3211 }
 0x583   : > { %8964 = vmatpush3.bf16.xpose.msra.mxu1 %v3169_v27  ;;  %8965 = vmatprep.mubr.msk.bf16.mxu1 %vm9806_vm1, %v9805_v60 }
 0x584   : > { %8975 = vmatprep.subr.bf16.mxu1 %v9805_v60 }
 0x586   : > { %v3504_v58 = vpop.permute.xlu0 %3503 }
 0x587   : > { %v3509_v52 = vsel %vm1707_vm3, %v3504_v58, 0  ;;  %8972 = vmatmul.mubr.msk.bf16.vlgmr.msra.gmra.mrb[96].mxu0 %vm636_vm2, %v3212_v36 }
 0x588   : > { %8982 = vmatpush3.bf16.msra.mxu0 %v3509_v52  ;;  %8983 = vmatprep.mubr.msk.bf16.mxu0 %vm9806_vm1, %v9805_v60 }
 0x589   : > { %8993 = vmatprep.subr.bf16.mxu0 %v9805_v60 }
 0x58a   : > { %8966 = vmatmul.mubr.msk.bf16.vlgmr.msra.gmra.mrb[92].mxu1 %vm636_vm2, %v3162_v47 }
 0x58b   : > { %8976 = vmatpush3.bf16.xpose.msra.mxu1 %v3269_v39  ;;  %8977 = vmatprep.mubr.msk.bf16.mxu1 %vm9806_vm1, %v9805_v60 }
 0x58c   : > { %8987 = vmatprep.subr.bf16.mxu1 %v9805_v60 }
 0x58f   : > { %v1745_v35 = vpop.f32.mrb[36].mxu0 }
 0x590   : > { %v8793_v1 = vpop.f32.mrb[37].mxu0 }
 0x591   : > { %v1748_v33 = vpop.f32.mrb[38].mxu0 }
 0x592   : > { %v8794_v3 = vpop.f32.mrb[39].mxu0  ;;  %8978 = vmatmul.mubr.msk.bf16.vlgmr.msra.gmra.mrb[96].mxu1 %vm636_vm2, %v3262_v56 }
 0x593   : > { %8988 = vmatpush3.bf16.msra.mxu1 %v3557_v48  ;;  %8989 = vmatprep.mubr.msk.bf16.mxu1 %vm9806_vm1, %v9805_v60 }
 0x594   : > { %8999 = vmatprep.subr.bf16.mxu1 %v9805_v60 }
 0x597   : > { %v1793_v23 = vpop.f32.mrb[36].mxu1  ;;  %v1841_v49 = vpop.f32.mrb[40].mxu0 }
 0x598   : > { %v2487_v45 = vcombine.low %v1745_v35, %v1793_v23  ;;  %v8799_v28 = vpop.f32.mrb[37].mxu1  ;;  %v8805_v38 = vpop.f32.mrb[41].mxu0 }
 0x599   : > { %v1796_v6 = vpop.f32.mrb[38].mxu1  ;;  %v1844_v29 = vpop.f32.mrb[42].mxu0 }
 0x59a   : > { %v8800_v7 = vpop.f32.mrb[39].mxu1  ;;  %v8806_v43 = vpop.f32.mrb[43].mxu0 }
 0x59f   : > { %v1937_v59 = vpop.f32.mrb[44].mxu0 }
 0x5a0   : > { %v8817_v17 = vpop.f32.mrb[45].mxu0 }
 0x5a1   : > { %v1889_v53 = vpop.f32.mrb[40].mxu1  ;;  %v1940_v63 = vpop.f32.mrb[46].mxu0 }
 0x5a2   : > { %v2488_v2 = vcombine.low %v1841_v49, %v1889_v53  ;;  %v8811_v4 = vpop.f32.mrb[41].mxu1  ;;  %v8818_v5 = vpop.f32.mrb[47].mxu0 }
 0x5a3   : > { %v1892_v31 = vpop.f32.mrb[42].mxu1 }
 0x5a4   : > { %v2503_v9 = vpack.c.bf16 %v2488_v2, %v2487_v45  ;;  %v8812_v18 = vpop.f32.mrb[43].mxu1 }
 0x5a6   : > { %2507 = vst.msk [vmem:[#allocation2] sm:$0xff] %vm636_vm2, %v2503_v9 }
 0x5a7   : > { %v2033_v22 = vpop.f32.mrb[48].mxu0 }
 0x5a8   : > { %v8829_v61 = vpop.f32.mrb[49].mxu0 }
 0x5a9   : > { %v1985_v13 = vpop.f32.mrb[44].mxu1  ;;  %v2036_v54 = vpop.f32.mrb[50].mxu0 }
 0x5aa   : > { %v2489_v11 = vcombine.low %v1937_v59, %v1985_v13  ;;  %v8823_v41 = vpop.f32.mrb[45].mxu1  ;;  %v8830_v15 = vpop.f32.mrb[51].mxu0 }
 0x5ab   : > { %v1988_v57 = vpop.f32.mrb[46].mxu1 }
 0x5ac   : > { %v8824_v12 = vpop.f32.mrb[47].mxu1 }
 0x5af   : > { %v2129_v0 = vpop.f32.mrb[52].mxu0 }
 0x5b0   : > { %v8841_v55 = vpop.f32.mrb[53].mxu0 }
 0x5b1   : > { %v2081_v16 = vpop.f32.mrb[48].mxu1  ;;  %v2132_v47 = vpop.f32.mrb[54].mxu0 }
 0x5b2   : > { %v2490_v62 = vcombine.low %v2033_v22, %v2081_v16  ;;  %v8835_v26 = vpop.f32.mrb[49].mxu1  ;;  %v8842_v27 = vpop.f32.mrb[55].mxu0 }
 0x5b3   : > { %v2084_v36 = vpop.f32.mrb[50].mxu1 }
 0x5b4   : > { %v2504_v20 = vpack.c.bf16 %v2490_v62, %v2489_v11  ;;  %v8836_v58 = vpop.f32.mrb[51].mxu1 }
 0x5b6   : > { %2508 = vst.msk [vmem:[#allocation2 + $0x8] sm:$0xff] %vm636_vm2, %v2504_v20 }
 0x5b9   : > { %v2177_v52 = vpop.f32.mrb[52].mxu1 }
 0x5ba   : > { %v2491_v56 = vcombine.low %v2129_v0, %v2177_v52  ;;  %v8847_v39 = vpop.f32.mrb[53].mxu1 }
 0x5bb   : > { %v2180_v8 = vpop.f32.mrb[54].mxu1 }
 0x5bc   : > { %v8848_v35 = vpop.f32.mrb[55].mxu1 }
 0x5e6   : > { %v2225_v1 = vpop.f32.mrb[56].mxu0 }
 0x5e7   : > { %v8853_v33 = vpop.f32.mrb[57].mxu0 }
 0x5e8   : > { %v2228_v48 = vpop.f32.mrb[58].mxu0 }
 0x5e9   : > { %v8854_v3 = vpop.f32.mrb[59].mxu0 }
 0x5ec   : > { %v2273_v23 = vpop.f32.mrb[56].mxu1 }
 0x5ed   : > { %v2492_v49 = vcombine.low %v2225_v1, %v2273_v23  ;;  %v8859_v45 = vpop.f32.mrb[57].mxu1 }
 0x5ee   : > { %v2276_v28 = vpop.f32.mrb[58].mxu1  ;;  %v2321_v38 = vpop.f32.mrb[60].mxu0 }
 0x5ef   : > { %v2505_v6 = vpack.c.bf16 %v2492_v49, %v2491_v56  ;;  %v8860_v29 = vpop.f32.mrb[59].mxu1  ;;  %v8865_v7 = vpop.f32.mrb[61].mxu0 }
 0x5f0   : > { %v2324_v43 = vpop.f32.mrb[62].mxu0 }
 0x5f1   : > { %2509 = vst.msk [vmem:[#allocation2 + $0x10] sm:$0xff] %vm636_vm2, %v2505_v6  ;;  %v8866_v59 = vpop.f32.mrb[63].mxu0 }
 0x5f4   : > { %v2369_v17 = vpop.f32.mrb[60].mxu1 }
 0x5f5   : > { %v2493_v53 = vcombine.low %v2321_v38, %v2369_v17  ;;  %v8871_v63 = vpop.f32.mrb[61].mxu1 }
 0x5f6   : > { %v2372_v2 = vpop.f32.mrb[62].mxu1  ;;  %v2417_v4 = vpop.f32.mrb[64].mxu0 }
 0x5f7   : > { %v8872_v5 = vpop.f32.mrb[63].mxu1  ;;  %v8877_v31 = vpop.f32.mrb[65].mxu0 }
 0x5f8   : > { %v2420_v9 = vpop.f32.mrb[66].mxu0 }
 0x5f9   : > { %v8878_v18 = vpop.f32.mrb[67].mxu0 }
 0x622   : > { %v10700_v22 = vpop.f32.mrb[68].mxu0 }
 0x623   : > { %v8889_v61 = vpop.f32.mrb[69].mxu0  ;;  %v3311_v13 = vsel %vm1508_vm4, %v10700_v22, -inf }
 0x624   : > { %3312 = vmax.xlane.f32.xlu0 %v3311_v13  ;;  %v2558_v54 = vpop.f32.mrb[70].mxu0 }
 0x625   : > { %v2465_v11 = vpop.f32.mrb[64].mxu1  ;;  %v8890_v41 = vpop.f32.mrb[71].mxu0 }
 0x626   : > { %v2494_v15 = vcombine.low %v2417_v4, %v2465_v11  ;;  %v8883_v57 = vpop.f32.mrb[65].mxu1 }
 0x627   : > { %v2468_v12 = vpop.f32.mrb[66].mxu1 }
 0x628   : > { %v2506_v0 = vpack.c.bf16 %v2494_v15, %v2493_v53  ;;  %v8884_v55 = vpop.f32.mrb[67].mxu1 }
 0x62a   : > { %2510 = vst.msk [vmem:[#allocation2 + $0x18] sm:$0xff] %vm636_vm2, %v2506_v0  ;;  %v10705_v16 = vpop.f32.mrb[72].mxu0 }
 0x62b   : > { %v8901_v47 = vpop.f32.mrb[73].mxu0  ;;  %v3317_v62 = vsel %vm1508_vm4, %v10705_v16, -inf }
 0x62c   : > { %3318 = vmax.xlane.f32.xlu0 %v3317_v62  ;;  %v2658_v26 = vpop.f32.mrb[74].mxu0 }
 0x62d   : > { %v10709_v27 = vpop.f32.mrb[68].mxu1  ;;  %v8902_v36 = vpop.f32.mrb[75].mxu0 }
 0x62e   : > { %v8895_v20 = vpop.f32.mrb[69].mxu1  ;;  %v3314_v58 = vsel %vm1508_vm4, %v10709_v27, -inf }
 0x62f   : > { %3315 = vmax.xlane.f32.xlu1 %v3314_v58  ;;  %v2608_v52 = vpop.f32.mrb[70].mxu1 }
 0x630   : > { %v8896_v56 = vpop.f32.mrb[71].mxu1 }
 0x632   : > { %v10713_v39 = vpop.f32.mrb[76].mxu0 }
 0x633   : > { %v8913_v8 = vpop.f32.mrb[77].mxu0  ;;  %v3323_v28 = vsel %vm1508_vm4, %v10713_v39, -inf }
 0x634   : > { %v2758_v35 = vpop.f32.mrb[78].mxu0 }
 0x635   : > { %v10715_v1 = vpop.f32.mrb[72].mxu1  ;;  %v8914_v33 = vpop.f32.mrb[79].mxu0 }
 0x636   : > { %v8907_v48 = vpop.f32.mrb[73].mxu1  ;;  %v3320_v3 = vsel %vm1508_vm4, %v10715_v1, -inf }
 0x637   : > { %v2708_v23 = vpop.f32.mrb[74].mxu1  ;;  %3321 = vmax.xlane.f32.xlu0 %v3320_v3 }
 0x638   : > { %v8908_v49 = vpop.f32.mrb[75].mxu1 }
 0x63a   : > { %v10719_v45 = vpop.f32.mrb[80].mxu0 }
 0x63b   : > { %3324 = vmax.xlane.f32.xlu0 %v3323_v28  ;;  %v8925_v38 = vpop.f32.mrb[81].mxu0  ;;  %v3329_v17 = vsel %vm1508_vm4, %v10719_v45, -inf }
 0x63c   : > { %v2858_v6 = vpop.f32.mrb[82].mxu0 }
 0x63d   : > { %v10723_v29 = vpop.f32.mrb[76].mxu1  ;;  %v8926_v7 = vpop.f32.mrb[83].mxu0 }
 0x63e   : > { %v8919_v43 = vpop.f32.mrb[77].mxu1  ;;  %v3326_v59 = vsel %vm1508_vm4, %v10723_v29, -inf }
 0x63f   : > { %3327 = vmax.xlane.f32.xlu1 %v3326_v59  ;;  %v2808_v53 = vpop.f32.mrb[78].mxu1  ;;  %3330 = vmax.xlane.f32.xlu0 %v3329_v17 }
 0x640   : > { %v8920_v63 = vpop.f32.mrb[79].mxu1 }
 0x642   : > { %v10729_v2 = vpop.f32.mrb[84].mxu0 }
 0x643   : > { %v8937_v4 = vpop.f32.mrb[85].mxu0  ;;  %v3335_v5 = vsel %vm1508_vm4, %v10729_v2, -inf }
 0x644   : > { %3336 = vmax.xlane.f32.xlu0 %v3335_v5  ;;  %v2958_v31 = vpop.f32.mrb[86].mxu0 }
 0x645   : > { %v10733_v9 = vpop.f32.mrb[80].mxu1  ;;  %v8938_v18 = vpop.f32.mrb[87].mxu0 }
 0x646   : > { %v8931_v61 = vpop.f32.mrb[81].mxu1  ;;  %v3332_v13 = vsel %vm1508_vm4, %v10733_v9, -inf }
 0x647   : > { %3333 = vmax.xlane.f32.xlu1 %v3332_v13  ;;  %v2908_v54 = vpop.f32.mrb[82].mxu1  ;;  %v10769_v13 = vpop.permute.xlu1 %3647 }
 0x648   : > { %v8932_v11 = vpop.f32.mrb[83].mxu1  ;;  %v10771_v54 = vpop.permute.xlu0 %3599 }
 0x64a   : > { %v10737_v41 = vpop.f32.mrb[88].mxu0 }
 0x64b   : > { %v8949_v15 = vpop.f32.mrb[89].mxu0  ;;  %v3341_v57 = vsel %vm1508_vm4, %v10737_v41, -inf  ;;  %v10773_v11 = vpop.permute.xlu1 %3743 }
 0x64c   : > { %3342 = vmax.xlane.f32.xlu0 %v3341_v57  ;;  %v3058_v12 = vpop.f32.mrb[90].mxu0  ;;  %v10775_v15 = vpop.permute.xlu0 %3695 }
 0x64d   : > { %v10741_v0 = vpop.f32.mrb[84].mxu1  ;;  %v8950_v55 = vpop.f32.mrb[91].mxu0 }
 0x64e   : > { %v8943_v47 = vpop.f32.mrb[85].mxu1  ;;  %v3338_v62 = vsel %vm1508_vm4, %v10741_v0, -inf }
 0x64f   : > { %3339 = vmax.xlane.f32.xlu1 %v3338_v62  ;;  %v3008_v26 = vpop.f32.mrb[86].mxu1  ;;  %v10777_v57 = vpop.permute.xlu1 %3839 }
 0x650   : > { %v8944_v36 = vpop.f32.mrb[87].mxu1  ;;  %v10779_v12 = vpop.permute.xlu0 %3791 }
 0x652   : > { %v10745_v20 = vpop.f32.mrb[92].mxu0 }
 0x653   : > { %v8961_v58 = vpop.f32.mrb[93].mxu0  ;;  %v3347_v52 = vsel %vm1508_vm4, %v10745_v20, -inf  ;;  %v10781_v55 = vpop.permute.xlu1 %3935 }
 0x654   : > { %3348 = vmax.xlane.f32.xlu0 %v3347_v52  ;;  %v3158_v56 = vpop.f32.mrb[94].mxu0  ;;  %v10783_v47 = vpop.permute.xlu0 %3887 }
 0x655   : > { %v10749_v8 = vpop.f32.mrb[88].mxu1  ;;  %v8962_v35 = vpop.f32.mrb[95].mxu0 }
 0x656   : > { %v8955_v33 = vpop.f32.mrb[89].mxu1  ;;  %v3344_v48 = vsel %vm1508_vm4, %v10749_v8, -inf }
 0x657   : > { %3345 = vmax.xlane.f32.xlu1 %v3344_v48  ;;  %v3108_v3 = vpop.f32.mrb[90].mxu1  ;;  %v10785_v26 = vpop.permute.xlu1 %3983 }
 0x658   : > { %v8956_v23 = vpop.f32.mrb[91].mxu1 }
 0x65a   : > { %v10753_v49 = vpop.f32.mrb[96].mxu0 }
 0x65b   : > { %v8973_v28 = vpop.f32.mrb[97].mxu0  ;;  %v3353_v38 = vsel %vm1508_vm4, %v10753_v49, -inf  ;;  %v10788_v52 = vpop.permute.xlu1 %4031 }
 0x65c   : > { %3354 = vmax.xlane.f32.xlu0 %v3353_v38  ;;  %v3258_v6 = vpop.f32.mrb[98].mxu0 }
 0x65d   : > { %v10757_v7 = vpop.f32.mrb[92].mxu1  ;;  %v8974_v43 = vpop.f32.mrb[99].mxu0 }
 0x65e   : > { %v8967_v59 = vpop.f32.mrb[93].mxu1  ;;  %v3350_v17 = vsel %vm1508_vm4, %v10757_v7, -inf }
 0x65f   : > { %3351 = vmax.xlane.f32.xlu1 %v3350_v17  ;;  %v3208_v53 = vpop.f32.mrb[94].mxu1 }
 0x660   : > { %v8968_v63 = vpop.f32.mrb[95].mxu1 }
 0x665   : > { %v10761_v4 = vpop.f32.mrb[96].mxu1 }
 0x666   : > { %v8979_v5 = vpop.f32.mrb[97].mxu1  ;;  %v3356_v61 = vsel %vm1508_vm4, %v10761_v4, -inf }
 0x667   : > { %v3308_v31 = vpop.f32.mrb[98].mxu1 }
 0x668   : > { %v8980_v18 = vpop.f32.mrb[99].mxu1 }
 0x670   : > { %4127 = vrot.lane.b32.xlu1 %v10114_v50, %s9811_s24 }
 0x672   : > { %4079 = vrot.lane.b32.xlu0 %v10076_v42, %s9811_s24 }
 0x694   : > { %3357 = vmax.xlane.f32.xlu1 %v3356_v61 }
 0x6b1   : > { %v3313_v62 = vpop.xlane.xlu0 %3312 }
 0x6b2   : > { %v3359_v36 = vsub.f32 %v10700_v22, %v3313_v62 }
 0x6b4   : > { %v3375_v58 = vmul.f32 1.442695, %v3359_v36 }
 0x6b6   : > { %9596 = vpow2.f32 %v3375_v58 }
 0x6b9   : > { %v3319_v56 = vpop.xlane.xlu0 %3318 }
 0x6ba   : > { %v3361_v35 = vsub.f32 %v10705_v16, %v3319_v56 }
 0x6bc   : > { %v3379_v33 = vmul.f32 1.442695, %v3361_v35  ;;  %v3316_v48 = vpop.xlane.xlu1 %3315 }
 0x6bd   : > { %v3360_v3 = vsub.f32 %v10709_v27, %v3316_v48 }
 0x6be   : > { %9598 = vpow2.f32 %v3379_v33 }
 0x6bf   : > { %v3377_v23 = vmul.f32 1.442695, %v3360_v3 }
 0x6c0   : > { %v10792_v28 = vpop.eup %9596 }
 0x6c1   : > { %9600 = vpow2.f32 %v3377_v23  ;;  %v3407_v38 = vsel %vm1508_vm4, %v10792_v28, 0.0 }
 0x6c2   : > { %3408 = vadd.xlane.f32.xlu0 %v3407_v38 }
 0x6c4   : > { %v3322_v22 = vpop.xlane.xlu0 %3321 }
 0x6c5   : > { %v3362_v6 = vsub.f32 %v10715_v1, %v3322_v22 }
 0x6c7   : > { %v3381_v43 = vmul.f32 1.442695, %v3362_v6 }
 0x6c8   : > { %v10797_v59 = vpop.eup %9598  ;;  %v3325_v16 = vpop.xlane.xlu0 %3324 }
 0x6c9   : > { %9602 = vpow2.f32 %v3381_v43  ;;  %v3363_v17 = vsub.f32 %v10713_v39, %v3325_v16  ;;  %v3413_v27 = vsel %vm1508_vm4, %v10797_v59, 0.0 }
 0x6ca   : > { %3414 = vadd.xlane.f32.xlu0 %v3413_v27 }
 0x6cb   : > { %v10802_v53 = vpop.eup %9600  ;;  %v3383_v63 = vmul.f32 1.442695, %v3363_v17 }
 0x6cc   : > { %v3328_v5 = vpop.xlane.xlu1 %3327  ;;  %v3331_v31 = vpop.xlane.xlu0 %3330  ;;  %v3410_v18 = vsel %vm1508_vm4, %v10802_v53, 0.0 }
 0x6cd   : > { %9604 = vpow2.f32 %v3383_v63  ;;  %v3364_v1 = vsub.f32 %v10723_v29, %v3328_v5  ;;  %v3365_v61 = vsub.f32 %v10719_v45, %v3331_v31  ;;  %3411 = vadd.xlane.f32.xlu1 %v3410_v18 }
 0x6cf   : > { %v3385_v62 = vmul.f32 1.442695, %v3364_v1  ;;  %v3387_v39 = vmul.f32 1.442695, %v3365_v61 }
 0x6d1   : > { %9606 = vpow2.f32 %v3385_v62  ;;  %v3337_v36 = vpop.xlane.xlu0 %3336 }
 0x6d2   : > { %9608 = vpow2.f32 %v3387_v39  ;;  %v3367_v56 = vsub.f32 %v10729_v2, %v3337_v36 }
 0x6d3   : > { %v10808_v58 = vpop.eup %9602 }
 0x6d4   : > { %v3334_v35 = vpop.xlane.xlu1 %3333  ;;  %v3416_v33 = vsel %vm1508_vm4, %v10808_v58, 0.0  ;;  %v3391_v45 = vmul.f32 1.442695, %v3367_v56 }
 0x6d5   : > { %v3366_v48 = vsub.f32 %v10733_v9, %v3334_v35  ;;  %3417 = vadd.xlane.f32.xlu1 %v3416_v33 }
 0x6d7   : > { %v10814_v29 = vpop.eup %9604  ;;  %v3389_v3 = vmul.f32 1.442695, %v3366_v48 }
 0x6d8   : > { %v3419_v23 = vsel %vm1508_vm4, %v10814_v29, 0.0 }
 0x6d9   : > { %9610 = vpow2.f32 %v3389_v3  ;;  %3420 = vadd.xlane.f32.xlu0 %v3419_v23  ;;  %v3343_v38 = vpop.xlane.xlu0 %3342 }
 0x6da   : > { %v3369_v22 = vsub.f32 %v10737_v41, %v3343_v38  ;;  %9612 = vpow2.f32 %v3391_v45 }
 0x6db   : > { %v10819_v2 = vpop.eup %9606 }
 0x6dc   : > { %v10821_v6 = vpop.eup %9608  ;;  %v3395_v43 = vmul.f32 1.442695, %v3369_v22  ;;  %v3340_v9 = vpop.xlane.xlu1 %3339  ;;  %v3422_v16 = vsel %vm1508_vm4, %v10819_v2, 0.0 }
 0x6dd   : > { %v3368_v17 = vsub.f32 %v10741_v0, %v3340_v9  ;;  %3423 = vadd.xlane.f32.xlu1 %v3422_v16  ;;  %v3425_v27 = vsel %vm1508_vm4, %v10821_v6, 0.0 }
 0x6de   : > { %3426 = vadd.xlane.f32.xlu0 %v3425_v27  ;;  %9614 = vpow2.f32 %v3395_v43 }
 0x6df   : > { %v3393_v63 = vmul.f32 1.442695, %v3368_v17 }
 0x6e1   : > { %9616 = vpow2.f32 %v3393_v63  ;;  %v3349_v41 = vpop.xlane.xlu0 %3348 }
 0x6e2   : > { %v3371_v5 = vsub.f32 %v10745_v20, %v3349_v41 }
 0x6e3   : > { %v10829_v31 = vpop.eup %9610 }
 0x6e4   : > { %v3399_v18 = vmul.f32 1.442695, %v3371_v5  ;;  %v3346_v1 = vpop.xlane.xlu1 %3345  ;;  %v3428_v61 = vsel %vm1508_vm4, %v10829_v31, 0.0  ;;  %v10833_v62 = vpop.eup %9612 }
 0x6e5   : > { %v3370_v0 = vsub.f32 %v10749_v8, %v3346_v1  ;;  %3429 = vadd.xlane.f32.xlu1 %v3428_v61  ;;  %v3431_v36 = vsel %vm1508_vm4, %v10833_v62, 0.0 }
 0x6e6   : > { %9618 = vpow2.f32 %v3399_v18 }
 0x6e7   : > { %v3397_v39 = vmul.f32 1.442695, %v3370_v0 }
 0x6e8   : > { %v10838_v56 = vpop.eup %9614 }
 0x6e9   : > { %9620 = vpow2.f32 %v3397_v39  ;;  %3432 = vadd.xlane.f32.xlu1 %v3431_v36  ;;  %v3437_v48 = vsel %vm1508_vm4, %v10838_v56, 0.0  ;;  %v3355_v9 = vpop.xlane.xlu0 %3354 }
 0x6ea   : > { %v3373_v16 = vsub.f32 %v10753_v49, %v3355_v9 }
 0x6eb   : > { %v10840_v20 = vpop.eup %9616 }
 0x6ec   : > { %v3352_v35 = vpop.xlane.xlu1 %3351  ;;  %v3434_v33 = vsel %vm1508_vm4, %v10840_v20, 0.0  ;;  %v3403_v17 = vmul.f32 1.442695, %v3373_v16  ;;  %v3701_v16 = vsel %vm1707_vm3, %v10775_v15, 0 }
 0x6ed   : > { %v3372_v8 = vsub.f32 %v10757_v7, %v3352_v35  ;;  %3435 = vadd.xlane.f32.xlu0 %v3434_v33  ;;  %3438 = vadd.xlane.f32.xlu1 %v3437_v48 }
 0x6ef   : > { %v3401_v45 = vmul.f32 1.442695, %v3372_v8  ;;  %v3605_v8 = vsel %vm1707_vm3, %v10771_v54, 0 }
 0x6f0   : > { %v10847_v3 = vpop.eup %9618  ;;  %v10864_v27 = vpop.permute.xlu1 %4127 }
 0x6f1   : > { %9622 = vpow2.f32 %v3401_v45  ;;  %v3443_v23 = vsel %vm1508_vm4, %v10847_v3, 0.0 }
 0x6f2   : > { %3444 = vadd.xlane.f32.xlu1 %v3443_v23  ;;  %9624 = vpow2.f32 %v3403_v17 }
 0x6f3   : > { %v10851_v38 = vpop.eup %9620 }
 0x6f4   : > { %v3440_v22 = vsel %vm1508_vm4, %v10851_v38, 0.0 }
 0x6f5   : > { %3441 = vadd.xlane.f32.xlu0 %v3440_v22 }
 0x6fb   : > { %v10855_v43 = vpop.eup %9622 }
 0x6fc   : > { %v3446_v7 = vsel %vm1508_vm4, %v10855_v43, 0.0  ;;  %v10867_v5 = vpop.eup %9624 }
 0x6fd   : > { %3447 = vadd.xlane.f32.xlu0 %v3446_v7  ;;  %v3449_v1 = vsel %vm1508_vm4, %v10867_v5, 0.0 }
 0x703   : > { %4223 = vrot.lane.b32.xlu1 %v10122_v51, %s9811_s24 }
 0x713   : > { %4175 = vrot.lane.b32.xlu0 %v10092_v21, %s9811_s24 }
 0x721   : > { %v3358_v63 = vpop.xlane.xlu1 %3357 }
 0x722   : > { %v3374_v41 = vsub.f32 %v10761_v4, %v3358_v63  ;;  %v10887_v4 = vpop.permute.xlu0 %4079 }
 0x724   : > { %v3405_v18 = vmul.f32 1.442695, %v3374_v41 }
 0x726   : > { %9626 = vpow2.f32 %v3405_v18 }
 0x727   : > { %3450 = vadd.xlane.f32.xlu1 %v3449_v1  ;;  %v3749_v1 = vsel %vm1707_vm3, %v10773_v11, 0 }
 0x730   : > { %v10871_v61 = vpop.eup %9626 }
 0x731   : > { %v3452_v49 = vsel %vm1508_vm4, %v10871_v61, 0.0 }
 0x732   : > { %3453 = vadd.xlane.f32.xlu0 %v3452_v49 }
 0x738   : > { %4380 = vrot.lane.b32.xlu1 %v9991_v14, %s9812_s25 }
 0x73c   : > { %4378 = vrot.lane.b32.xlu1 %v9991_v14, %s9813_s26 }
 0x740   : > { %4480 = vrot.lane.b32.xlu1 %v10029_v30, %s9812_s25 }
 0x744   : > { %4478 = vrot.lane.b32.xlu1 %v10029_v30, %s9813_s26 }
 0x748   : > { %4330 = vrot.lane.b32.xlu0 %v9984_v10, %s9812_s25  ;;  %4580 = vrot.lane.b32.xlu1 %v10048_v34, %s9812_s25 }
 0x74c   : > { %4328 = vrot.lane.b32.xlu0 %v9984_v10, %s9813_s26  ;;  %4578 = vrot.lane.b32.xlu1 %v10048_v34, %s9813_s26 }
 0x74f   : > { %v3409_v0 = vpop.xlane.xlu0 %3408 }
 0x750   : > { %9628 = vrcp.f32 %v3409_v0  ;;  %4430 = vrot.lane.b32.xlu0 %v10010_v24, %s9812_s25  ;;  %4680 = vrot.lane.b32.xlu1 %v10063_v40, %s9812_s25 }
 0x754   : > { %4428 = vrot.lane.b32.xlu0 %v10010_v24, %s9813_s26  ;;  %4678 = vrot.lane.b32.xlu1 %v10063_v40, %s9813_s26 }
 0x757   : > { %v3415_v39 = vpop.xlane.xlu0 %3414 }
 0x758   : > { %9630 = vrcp.f32 %v3415_v39  ;;  %4530 = vrot.lane.b32.xlu0 %v10000_v19, %s9812_s25  ;;  %4780 = vrot.lane.b32.xlu1 %v10086_v44, %s9812_s25 }
 0x75a   : > { %v9629_v36 = vpop.eup %9628  ;;  %v3412_v35 = vpop.xlane.xlu1 %3411 }
 0x75b   : > { %9632 = vrcp.f32 %v3412_v35  ;;  %v3471_v33 = vmul.f32 %v9629_v36, %v10792_v28  ;;  %v3797_v36 = vsel %vm1707_vm3, %v10779_v12, 0  ;;  %v3845_v12 = vsel %vm1707_vm3, %v10777_v57, 0 }
 0x75c   : > { %4528 = vrot.lane.b32.xlu0 %v10000_v19, %s9813_s26  ;;  %4778 = vrot.lane.b32.xlu1 %v10086_v44, %s9813_s26  ;;  %v3893_v57 = vsel %vm1707_vm3, %v10783_v47, 0  ;;  %v3941_v47 = vsel %vm1707_vm3, %v10781_v55, 0 }
 0x75d   : > { %v3487_v48 = vpack.c.bf16 %v3471_v33, %v3471_v33 }
 0x75f   : > { %8984 = vmatmul.mubr.msk.bf16.vlgmr.msra.gmra.mrb[100].mxu0 %vm1703_vm5, %v3487_v48 }
 0x760   : > { %8994 = vmatpush3.bf16.msra.mxu0 %v3605_v8  ;;  %4630 = vrot.lane.b32.xlu0 %v10016_v25, %s9812_s25 }
 0x761   : > { %4880 = vrot.lane.b32.xlu1 %v10102_v46, %s9812_s25  ;;  %8995 = vmatprep.mubr.msk.bf16.mxu0 %vm9806_vm1, %v9805_v60 }
 0x762   : > { %v9631_v28 = vpop.eup %9630  ;;  %v3418_v45 = vpop.xlane.xlu1 %3417  ;;  %9005 = vmatprep.subr.bf16.mxu0 %v9805_v60 }
 0x763   : > { %9634 = vrcp.f32 %v3418_v45  ;;  %v3473_v23 = vmul.f32 %v9631_v28, %v10797_v59 }
 0x764   : > { %4628 = vrot.lane.b32.xlu0 %v10016_v25, %s9813_s26 }
 0x765   : > { %v9633_v54 = vpop.eup %9632  ;;  %4878 = vrot.lane.b32.xlu1 %v10102_v46, %s9813_s26  ;;  %v3489_v22 = vpack.c.bf16 %v3473_v23, %v3473_v23 }
 0x766   : > { %v3421_v7 = vpop.xlane.xlu0 %3420  ;;  %v3472_v9 = vmul.f32 %v9633_v54, %v10802_v53  ;;  %v3653_v53 = vsel %vm1707_vm3, %v10769_v13, 0 }
 0x767   : > { %9636 = vrcp.f32 %v3421_v7  ;;  %8996 = vmatmul.mubr.msk.bf16.vlgmr.msra.gmra.mrb[104].mxu0 %vm1703_vm5, %v3489_v22 }
 0x768   : > { %9006 = vmatpush3.bf16.msra.mxu0 %v3701_v16  ;;  %4730 = vrot.lane.b32.xlu0 %v10038_v32, %s9812_s25  ;;  %v3488_v59 = vpack.c.bf16 %v3472_v9, %v3472_v9 }
 0x769   : > { %4980 = vrot.lane.b32.xlu1 %v10114_v50, %s9812_s25  ;;  %9007 = vmatprep.mubr.msk.bf16.mxu0 %vm9806_vm1, %v9805_v60 }
 0x76a   : > { %8990 = vmatmul.mubr.msk.bf16.vlgmr.msra.gmra.mrb[100].mxu1 %vm1703_vm5, %v3488_v59  ;;  %v3424_v15 = vpop.xlane.xlu1 %3423  ;;  %9017 = vmatprep.subr.bf16.mxu0 %v9805_v60  ;;  %v3989_v59 = vsel %vm1707_vm3, %v10785_v26, 0 }
 0x76b   : > { %9000 = vmatpush3.bf16.msra.mxu1 %v3653_v53  ;;  %9638 = vrcp.f32 %v3424_v15  ;;  %v3427_v17 = vpop.xlane.xlu0 %3426  ;;  %9001 = vmatprep.mubr.msk.bf16.mxu1 %vm9806_vm1, %v9805_v60 }
 0x76c   : > { %9640 = vrcp.f32 %v3427_v17  ;;  %4728 = vrot.lane.b32.xlu0 %v10038_v32, %s9813_s26  ;;  %9011 = vmatprep.subr.bf16.mxu1 %v9805_v60  ;;  %v4037_v17 = vsel %vm1707_vm3, %v10788_v52, 0 }
 0x76d   : > { %v9635_v63 = vpop.eup %9634  ;;  %4978 = vrot.lane.b32.xlu1 %v10114_v50, %s9813_s26 }
 0x76e   : > { %v3474_v13 = vmul.f32 %v9635_v63, %v10808_v58 }
 0x770   : > { %4830 = vrot.lane.b32.xlu0 %v10057_v37, %s9812_s25  ;;  %v3490_v41 = vpack.c.bf16 %v3474_v13, %v3474_v13 }
 0x771   : > { %v9637_v18 = vpop.eup %9636  ;;  %5080 = vrot.lane.b32.xlu1 %v10122_v51, %s9812_s25 }
 0x772   : > { %9002 = vmatmul.mubr.msk.bf16.vlgmr.msra.gmra.mrb[104].mxu1 %vm1703_vm5, %v3490_v41  ;;  %v3430_v49 = vpop.xlane.xlu1 %3429  ;;  %v3475_v0 = vmul.f32 %v9637_v18, %v10814_v29 }
 0x773   : > { %9012 = vmatpush3.bf16.msra.mxu1 %v3749_v1  ;;  %9642 = vrcp.f32 %v3430_v49  ;;  %9013 = vmatprep.mubr.msk.bf16.mxu1 %vm9806_vm1, %v9805_v60 }
 0x774   : > { %4828 = vrot.lane.b32.xlu0 %v10057_v37, %s9813_s26  ;;  %v3491_v58 = vpack.c.bf16 %v3475_v0, %v3475_v0  ;;  %9023 = vmatprep.subr.bf16.mxu1 %v9805_v60 }
 0x775   : > { %v9639_v39 = vpop.eup %9638  ;;  %5078 = vrot.lane.b32.xlu1 %v10122_v51, %s9813_s26 }
 0x776   : > { %v9641_v11 = vpop.eup %9640  ;;  %v3433_v29 = vpop.xlane.xlu1 %3432  ;;  %9008 = vmatmul.mubr.msk.bf16.vlgmr.msra.gmra.mrb[108].mxu0 %vm1703_vm5, %v3491_v58  ;;  %v3476_v35 = vmul.f32 %v9639_v39, %v10819_v2 }
 0x777   : > { %9644 = vrcp.f32 %v3433_v29  ;;  %9018 = vmatpush3.bf16.msra.mxu0 %v3797_v36  ;;  %9019 = vmatprep.mubr.msk.bf16.mxu0 %vm9806_vm1, %v9805_v60  ;;  %v3477_v48 = vmul.f32 %v9641_v11, %v10821_v6 }
 0x778   : > { %4930 = vrot.lane.b32.xlu0 %v10076_v42, %s9812_s25  ;;  %v3492_v33 = vpack.c.bf16 %v3476_v35, %v3476_v35  ;;  %9029 = vmatprep.subr.bf16.mxu0 %v9805_v60 }
 0x779   : > { %5368 = vrot.lane.b32.xlu1 %v9991_v14, %s9814_s28  ;;  %v3493_v6 = vpack.c.bf16 %v3477_v48, %v3477_v48 }
 0x77a   : > { %9014 = vmatmul.mubr.msk.bf16.vlgmr.msra.gmra.mrb[108].mxu1 %vm1703_vm5, %v3492_v33  ;;  %v3439_v2 = vpop.xlane.xlu1 %3438  ;;  %v3436_v8 = vpop.xlane.xlu0 %3435 }
 0x77b   : > { %9024 = vmatpush3.bf16.msra.mxu1 %v3845_v12  ;;  %9646 = vrcp.f32 %v3439_v2  ;;  %9025 = vmatprep.mubr.msk.bf16.mxu1 %vm9806_vm1, %v9805_v60 }
 0x77c   : > { %9648 = vrcp.f32 %v3436_v8  ;;  %4928 = vrot.lane.b32.xlu0 %v10076_v42, %s9813_s26  ;;  %9035 = vmatprep.subr.bf16.mxu1 %v9805_v60 }
 0x77d   : > { %v9643_v28 = vpop.eup %9642  ;;  %5464 = vrot.lane.b32.xlu1 %v10029_v30, %s9814_s28 }
 0x77e   : > { %9020 = vmatmul.mubr.msk.bf16.vlgmr.msra.gmra.mrb[112].mxu0 %vm1703_vm5, %v3493_v6  ;;  %v3478_v45 = vmul.f32 %v9643_v28, %v10829_v31 }
 0x77f   : > { %9030 = vmatpush3.bf16.msra.mxu0 %v3893_v57  ;;  %v3445_v23 = vpop.xlane.xlu1 %3444  ;;  %9031 = vmatprep.mubr.msk.bf16.mxu0 %vm9806_vm1, %v9805_v60 }
 0x780   : > { %5030 = vrot.lane.b32.xlu0 %v10092_v21, %s9812_s25  ;;  %v3494_v54 = vpack.c.bf16 %v3478_v45, %v3478_v45  ;;  %9041 = vmatprep.subr.bf16.mxu0 %v9805_v60  ;;  %9650 = vrcp.f32 %v3445_v23 }
 0x781   : > { %v9645_v22 = vpop.eup %9644  ;;  %5560 = vrot.lane.b32.xlu1 %v10048_v34, %s9814_s28 }
 0x782   : > { %9026 = vmatmul.mubr.msk.bf16.vlgmr.msra.gmra.mrb[112].mxu1 %vm1703_vm5, %v3494_v54  ;;  %v3442_v31 = vpop.xlane.xlu0 %3441  ;;  %v3479_v7 = vmul.f32 %v9645_v22, %v10833_v62 }
 0x783   : > { %9036 = vmatpush3.bf16.msra.mxu1 %v3941_v47  ;;  %9652 = vrcp.f32 %v3442_v31  ;;  %9037 = vmatprep.mubr.msk.bf16.mxu1 %vm9806_vm1, %v9805_v60  ;;  %v4224_v0 = vpop.permute.xlu1 %4223 }
 0x784   : > { %5028 = vrot.lane.b32.xlu0 %v10092_v21, %s9813_s26  ;;  %v3495_v9 = vpack.c.bf16 %v3479_v7, %v3479_v7  ;;  %9047 = vmatprep.subr.bf16.mxu1 %v9805_v60  ;;  %v4229_v39 = vsel %vm1707_vm3, %v4224_v0, 0 }
 0x785   : > { %v9647_v16 = vpop.eup %9646  ;;  %5656 = vrot.lane.b32.xlu1 %v10063_v40, %s9814_s28 }
 0x786   : > { %v9649_v55 = vpop.eup %9648  ;;  %9032 = vmatmul.mubr.msk.bf16.vlgmr.msra.gmra.mrb[116].mxu0 %vm1703_vm5, %v3495_v9  ;;  %v3481_v53 = vmul.f32 %v9647_v16, %v10838_v56  ;;  %v4085_v56 = vsel %vm1707_vm3, %v10887_v4, 0  ;;  %v4133_v4 = vsel %vm1707_vm3, %v10864_v27, 0 }
 0x787   : > { %9042 = vmatpush3.bf16.msra.mxu0 %v3989_v59  ;;  %v3480_v62 = vmul.f32 %v9649_v55, %v10840_v20  ;;  %9043 = vmatprep.mubr.msk.bf16.mxu0 %vm9806_vm1, %v9805_v60 }
 0x788   : > { %5320 = vrot.lane.b32.xlu0 %v9984_v10, %s9814_s28  ;;  %9053 = vmatprep.subr.bf16.mxu0 %v9805_v60  ;;  %v3497_v63 = vpack.c.bf16 %v3481_v53, %v3481_v53 }
 0x789   : > { %5752 = vrot.lane.b32.xlu1 %v10086_v44, %s9814_s28  ;;  %v3496_v15 = vpack.c.bf16 %v3480_v62, %v3480_v62 }
 0x78a   : > { %v3448_v26 = vpop.xlane.xlu0 %3447  ;;  %v9651_v20 = vpop.eup %9650 }
 0x78b   : > { %9038 = vmatmul.mubr.msk.bf16.vlgmr.msra.gmra.mrb[116].mxu1 %vm1703_vm5, %v3496_v15  ;;  %9654 = vrcp.f32 %v3448_v26  ;;  %v3483_v18 = vmul.f32 %v9651_v20, %v10847_v3 }
 0x78c   : > { %9048 = vmatpush3.bf16.msra.mxu1 %v4037_v17  ;;  %5416 = vrot.lane.b32.xlu0 %v10010_v24, %s9814_s28 }
 0x78d   : > { %v9653_v13 = vpop.eup %9652  ;;  %5800 = vrot.lane.b32.xlu1 %v10057_v37, %s9814_s28  ;;  %9049 = vmatprep.mubr.msk.bf16.mxu1 %vm9806_vm1, %v9805_v60 }
 0x78e   : > { %9044 = vmatmul.mubr.msk.bf16.vlgmr.msra.gmra.mrb[120].mxu0 %vm1703_vm5, %v3497_v63  ;;  %9059 = vmatprep.subr.bf16.mxu1 %v9805_v60  ;;  %v3482_v52 = vmul.f32 %v9653_v13, %v10851_v38  ;;  %v4176_v1 = vpop.permute.xlu0 %4175  ;;  %v3499_v38 = vpack.c.bf16 %v3483_v18, %v3483_v18 }
 0x78f   : > { %9054 = vmatpush3.bf16.msra.mxu0 %v4085_v56  ;;  %9055 = vmatprep.mubr.msk.bf16.mxu0 %vm9806_vm1, %v9805_v60  ;;  %v4181_v3 = vsel %vm1707_vm3, %v4176_v1, 0 }
 0x790   : > { %5512 = vrot.lane.b32.xlu0 %v10000_v19, %s9814_s28  ;;  %v3498_v41 = vpack.c.bf16 %v3482_v52, %v3482_v52  ;;  %9065 = vmatprep.subr.bf16.mxu0 %v9805_v60 }
 0x791   : > { %5848 = vrot.lane.b32.xlu1 %v10102_v46, %s9814_s28 }
 0x793   : > { %9050 = vmatmul.mubr.msk.bf16.vlgmr.msra.gmra.mrb[120].mxu1 %vm1703_vm5, %v3498_v41 }
 0x794   : > { %9060 = vmatpush3.bf16.msra.mxu1 %v4133_v4  ;;  %5608 = vrot.lane.b32.xlu0 %v10016_v25, %s9814_s28 }
 0x795   : > { %v9655_v49 = vpop.eup %9654  ;;  %9061 = vmatprep.mubr.msk.bf16.mxu1 %vm9806_vm1, %v9805_v60  ;;  %9071 = vmatprep.subr.bf16.mxu1 %v9805_v60 }
 0x796   : > { %9056 = vmatmul.mubr.msk.bf16.vlgmr.msra.gmra.mrb[124].mxu0 %vm1703_vm5, %v3499_v38  ;;  %v3484_v27 = vmul.f32 %v9655_v49, %v10855_v43 }
 0x797   : > { %9066 = vmatpush3.bf16.msra.mxu0 %v4181_v3  ;;  %9067 = vmatprep.mubr.msk.bf16.mxu0 %vm9806_vm1, %v9805_v60 }
 0x798   : > { %5704 = vrot.lane.b32.xlu0 %v10038_v32, %s9814_s28  ;;  %v3500_v58 = vpack.c.bf16 %v3484_v27, %v3484_v27  ;;  %9077 = vmatprep.subr.bf16.mxu0 %v9805_v60 }
 0x79b   : > { %9062 = vmatmul.mubr.msk.bf16.vlgmr.msra.gmra.mrb[124].mxu1 %vm1703_vm5, %v3500_v58 }
 0x79c   : > { %9072 = vmatpush3.bf16.msra.mxu1 %v4229_v39  ;;  %9073 = vmatprep.mubr.msk.bf16.mxu1 %vm9806_vm1, %v9805_v60 }
 0x79d   : > { %9083 = vmatprep.subr.bf16.mxu1 %v9805_v60 }
 0x7b4   : > { %v3451_v43 = vpop.xlane.xlu1 %3450 }
 0x7b5   : > { %9656 = vrcp.f32 %v3451_v43 }
 0x7b8   : > { %v4381_v11 = vpop.permute.xlu1 %4380 }
 0x7b9   : > { %v4386_v31 = vsel %vm636_vm2, %v4381_v11, 0 }
 0x7bc   : > { %v4379_v36 = vpop.permute.xlu1 %4378 }
 0x7bf   : > { %v9657_v29 = vpop.eup %9656  ;;  %v3454_v35 = vpop.xlane.xlu0 %3453 }
 0x7c0   : > { %9658 = vrcp.f32 %v3454_v35  ;;  %v4481_v33 = vpop.permute.xlu1 %4480  ;;  %v3485_v48 = vmul.f32 %v9657_v29, %v10867_v5 }
 0x7c1   : > { %v4486_v59 = vsel %vm636_vm2, %v4481_v33, 0 }
 0x7c2   : > { %v3501_v12 = vpack.c.bf16 %v3485_v48, %v3485_v48 }
 0x7c3   : > { %v4331_v2 = vpop.permute.xlu0 %4330 }
 0x7c4   : > { %v4336_v8 = vsel %vm636_vm2, %v4331_v2, 0  ;;  %v4479_v6 = vpop.permute.xlu1 %4478  ;;  %9068 = vmatmul.mubr.msk.bf16.vlgmr.msra.gmra.mrb[128].mxu0 %vm1703_vm5, %v3501_v12 }
 0x7c5   : > { %9078 = vmatpush3.bf16.xpose.msra.mxu0 %v4336_v8  ;;  %9079 = vmatprep.mubr.msk.bf16.mxu0 %vm9806_vm1, %v9805_v60 }
 0x7c6   : > { %9089 = vmatprep.subr.bf16.mxu0 %v9805_v60 }
 0x7c7   : > { %v4329_v28 = vpop.permute.xlu0 %4328 }
 0x7c8   : > { %v4581_v57 = vpop.permute.xlu1 %4580 }
 0x7c9   : > { %v4586_v17 = vsel %vm636_vm2, %v4581_v57, 0 }
 0x7ca   : > { %v9659_v45 = vpop.eup %9658 }
 0x7cb   : > { %v4431_v23 = vpop.permute.xlu0 %4430  ;;  %v3486_v54 = vmul.f32 %v9659_v45, %v10871_v61 }
 0x7cc   : > { %v4436_v5 = vsel %vm636_vm2, %v4431_v23, 0  ;;  %v4579_v22 = vpop.permute.xlu1 %4578  ;;  %9080 = vmatmul.mubr.msk.bf16.vlgmr.msra.gmra.mrb[132].mxu0 %vm636_vm2, %v4329_v28 }
 0x7cd   : > { %9090 = vmatpush3.bf16.xpose.msra.mxu0 %v4436_v5  ;;  %v3502_v47 = vpack.c.bf16 %v3486_v54, %v3486_v54  ;;  %9091 = vmatprep.mubr.msk.bf16.mxu0 %vm9806_vm1, %v9805_v60 }
 0x7ce   : > { %9101 = vmatprep.subr.bf16.mxu0 %v9805_v60 }
 0x7cf   : > { %9074 = vmatmul.mubr.msk.bf16.vlgmr.msra.gmra.mrb[128].mxu1 %vm1703_vm5, %v3502_v47  ;;  %v4429_v7 = vpop.permute.xlu0 %4428 }
 0x7d0   : > { %9084 = vmatpush3.bf16.xpose.msra.mxu1 %v4386_v31  ;;  %v4681_v9 = vpop.permute.xlu1 %4680  ;;  %9085 = vmatprep.mubr.msk.bf16.mxu1 %vm9806_vm1, %v9805_v60 }
 0x7d1   : > { %9095 = vmatprep.subr.bf16.mxu1 %v9805_v60  ;;  %v4686_v52 = vsel %vm636_vm2, %v4681_v9, 0 }
 0x7d3   : > { %v4531_v61 = vpop.permute.xlu0 %4530 }
 0x7d4   : > { %v4536_v16 = vsel %vm636_vm2, %v4531_v61, 0  ;;  %9092 = vmatmul.mubr.msk.bf16.vlgmr.msra.gmra.mrb[136].mxu0 %vm636_vm2, %v4429_v7  ;;  %v4679_v55 = vpop.permute.xlu1 %4678 }
 0x7d5   : > { %9102 = vmatpush3.bf16.xpose.msra.mxu0 %v4536_v16  ;;  %9103 = vmatprep.mubr.msk.bf16.mxu0 %vm9806_vm1, %v9805_v60 }
 0x7d6   : > { %9113 = vmatprep.subr.bf16.mxu0 %v9805_v60 }
 0x7d7   : > { %9086 = vmatmul.mubr.msk.bf16.vlgmr.msra.gmra.mrb[132].mxu1 %vm636_vm2, %v4379_v36  ;;  %v4529_v62 = vpop.permute.xlu0 %4528 }
 0x7d8   : > { %9096 = vmatpush3.bf16.xpose.msra.mxu1 %v4486_v59  ;;  %9097 = vmatprep.mubr.msk.bf16.mxu1 %vm9806_vm1, %v9805_v60  ;;  %v4781_v15 = vpop.permute.xlu1 %4780 }
 0x7d9   : > { %9107 = vmatprep.subr.bf16.mxu1 %v9805_v60  ;;  %v4786_v49 = vsel %vm636_vm2, %v4781_v15, 0 }
 0x7db   : > { %v4631_v53 = vpop.permute.xlu0 %4630 }
 0x7dc   : > { %v4636_v26 = vsel %vm636_vm2, %v4631_v53, 0  ;;  %9104 = vmatmul.mubr.msk.bf16.vlgmr.msra.gmra.mrb[140].mxu0 %vm636_vm2, %v4529_v62  ;;  %v4779_v63 = vpop.permute.xlu1 %4778 }
 0x7dd   : > { %9114 = vmatpush3.bf16.xpose.msra.mxu0 %v4636_v26  ;;  %9115 = vmatprep.mubr.msk.bf16.mxu0 %vm9806_vm1, %v9805_v60 }
 0x7de   : > { %9125 = vmatprep.subr.bf16.mxu0 %v9805_v60 }
 0x7df   : > { %9098 = vmatmul.mubr.msk.bf16.vlgmr.msra.gmra.mrb[136].mxu1 %vm636_vm2, %v4479_v6  ;;  %v4629_v20 = vpop.permute.xlu0 %4628 }
 0x7e0   : > { %9108 = vmatpush3.bf16.xpose.msra.mxu1 %v4586_v17  ;;  %9109 = vmatprep.mubr.msk.bf16.mxu1 %vm9806_vm1, %v9805_v60  ;;  %v4881_v18 = vpop.permute.xlu1 %4880 }
 0x7e1   : > { %9119 = vmatprep.subr.bf16.mxu1 %v9805_v60  ;;  %v4886_v39 = vsel %vm636_vm2, %v4881_v18, 0 }
 0x7e3   : > { %v4731_v13 = vpop.permute.xlu0 %4730 }
 0x7e4   : > { %v4736_v56 = vsel %vm636_vm2, %v4731_v13, 0  ;;  %9116 = vmatmul.mubr.msk.bf16.vlgmr.msra.gmra.mrb[144].mxu0 %vm636_vm2, %v4629_v20  ;;  %v4879_v38 = vpop.permute.xlu1 %4878 }
 0x7e5   : > { %9126 = vmatpush3.bf16.xpose.msra.mxu0 %v4736_v56  ;;  %9127 = vmatprep.mubr.msk.bf16.mxu0 %vm9806_vm1, %v9805_v60 }
 0x7e6   : > { %9137 = vmatprep.subr.bf16.mxu0 %v9805_v60 }
 0x7e7   : > { %9110 = vmatmul.mubr.msk.bf16.vlgmr.msra.gmra.mrb[140].mxu1 %vm636_vm2, %v4579_v22  ;;  %v4729_v41 = vpop.permute.xlu0 %4728 }
 0x7e8   : > { %9120 = vmatpush3.bf16.xpose.msra.mxu1 %v4686_v52  ;;  %9121 = vmatprep.mubr.msk.bf16.mxu1 %vm9806_vm1, %v9805_v60  ;;  %v4981_v0 = vpop.permute.xlu1 %4980 }
 0x7e9   : > { %9131 = vmatprep.subr.bf16.mxu1 %v9805_v60  ;;  %v4986_v35 = vsel %vm636_vm2, %v4981_v0, 0 }
 0x7eb   : > { %v4831_v4 = vpop.permute.xlu0 %4830 }
 0x7ec   : > { %v4836_v1 = vsel %vm636_vm2, %v4831_v4, 0  ;;  %9128 = vmatmul.mubr.msk.bf16.vlgmr.msra.gmra.mrb[148].mxu0 %vm636_vm2, %v4729_v41  ;;  %v4979_v11 = vpop.permute.xlu1 %4978 }
 0x7ed   : > { %9138 = vmatpush3.bf16.xpose.msra.mxu0 %v4836_v1  ;;  %9139 = vmatprep.mubr.msk.bf16.mxu0 %vm9806_vm1, %v9805_v60 }
 0x7ee   : > { %9149 = vmatprep.subr.bf16.mxu0 %v9805_v60 }
 0x7ef   : > { %9122 = vmatmul.mubr.msk.bf16.vlgmr.msra.gmra.mrb[144].mxu1 %vm636_vm2, %v4679_v55  ;;  %v4829_v3 = vpop.permute.xlu0 %4828 }
 0x7f0   : > { %9132 = vmatpush3.bf16.xpose.msra.mxu1 %v4786_v49  ;;  %9133 = vmatprep.mubr.msk.bf16.mxu1 %vm9806_vm1, %v9805_v60  ;;  %v5081_v48 = vpop.permute.xlu1 %5080 }
 0x7f1   : > { %9143 = vmatprep.subr.bf16.mxu1 %v9805_v60  ;;  %v5086_v6 = vsel %vm636_vm2, %v5081_v48, 0 }
 0x7f3   : > { %v4931_v27 = vpop.permute.xlu0 %4930 }
 0x7f4   : > { %v4936_v58 = vsel %vm636_vm2, %v4931_v27, 0  ;;  %9140 = vmatmul.mubr.msk.bf16.vlgmr.msra.gmra.mrb[152].mxu0 %vm636_vm2, %v4829_v3  ;;  %v5079_v8 = vpop.permute.xlu1 %5078 }
 0x7f5   : > { %9150 = vmatpush3.bf16.xpose.msra.mxu0 %v4936_v58  ;;  %9151 = vmatprep.mubr.msk.bf16.mxu0 %vm9806_vm1, %v9805_v60 }
 0x7f6   : > { %9161 = vmatprep.subr.bf16.mxu0 %v9805_v60 }
 0x7f7   : > { %9134 = vmatmul.mubr.msk.bf16.vlgmr.msra.gmra.mrb[148].mxu1 %vm636_vm2, %v4779_v63  ;;  %v4929_v43 = vpop.permute.xlu0 %4928 }
 0x7f8   : > { %9144 = vmatpush3.bf16.xpose.msra.mxu1 %v4886_v39  ;;  %9145 = vmatprep.mubr.msk.bf16.mxu1 %vm9806_vm1, %v9805_v60  ;;  %v5369_v28 = vpop.permute.xlu1 %5368 }
 0x7f9   : > { %9155 = vmatprep.subr.bf16.mxu1 %v9805_v60  ;;  %v5374_v57 = vsel %vm1707_vm3, %v5369_v28, 0 }
 0x7fb   : > { %v5031_v36 = vpop.permute.xlu0 %5030 }
 0x7fc   : > { %v5036_v29 = vsel %vm636_vm2, %v5031_v36, 0  ;;  %9152 = vmatmul.mubr.msk.bf16.vlgmr.msra.gmra.mrb[156].mxu0 %vm636_vm2, %v4929_v43 }
 0x7fd   : > { %9162 = vmatpush3.bf16.xpose.msra.mxu0 %v5036_v29  ;;  %9163 = vmatprep.mubr.msk.bf16.mxu0 %vm9806_vm1, %v9805_v60 }
 0x7fe   : > { %9173 = vmatprep.subr.bf16.mxu0 %v9805_v60 }
 0x7ff   : > { %9146 = vmatmul.mubr.msk.bf16.vlgmr.msra.gmra.mrb[152].mxu1 %vm636_vm2, %v4879_v38  ;;  %v5029_v33 = vpop.permute.xlu0 %5028 }
 0x800   : > { %9156 = vmatpush3.bf16.xpose.msra.mxu1 %v4986_v35  ;;  %9157 = vmatprep.mubr.msk.bf16.mxu1 %vm9806_vm1, %v9805_v60 }
 0x801   : > { %9167 = vmatprep.subr.bf16.mxu1 %v9805_v60 }
 0x803   : > { %v5321_v12 = vpop.permute.xlu0 %5320 }
 0x804   : > { %v5326_v2 = vsel %vm1707_vm3, %v5321_v12, 0  ;;  %9164 = vmatmul.mubr.msk.bf16.vlgmr.msra.gmra.mrb[160].mxu0 %vm636_vm2, %v5029_v33 }
 0x805   : > { %9174 = vmatpush3.bf16.msra.mxu0 %v5326_v2  ;;  %9175 = vmatprep.mubr.msk.bf16.mxu0 %vm9806_vm1, %v9805_v60 }
 0x806   : > { %9185 = vmatprep.subr.bf16.mxu0 %v9805_v60 }
 0x807   : > { %9158 = vmatmul.mubr.msk.bf16.vlgmr.msra.gmra.mrb[156].mxu1 %vm636_vm2, %v4979_v11 }
 0x808   : > { %9168 = vmatpush3.bf16.xpose.msra.mxu1 %v5086_v6  ;;  %9169 = vmatprep.mubr.msk.bf16.mxu1 %vm9806_vm1, %v9805_v60 }
 0x809   : > { %9179 = vmatprep.subr.bf16.mxu1 %v9805_v60 }
 0x80f   : > { %9170 = vmatmul.mubr.msk.bf16.vlgmr.msra.gmra.mrb[160].mxu1 %vm636_vm2, %v5079_v8 }
 0x810   : > { %9180 = vmatpush3.bf16.msra.mxu1 %v5374_v57  ;;  %9181 = vmatprep.mubr.msk.bf16.mxu1 %vm9806_vm1, %v9805_v60 }
 0x811   : > { %9191 = vmatprep.subr.bf16.mxu1 %v9805_v60 }
 0x832   : > { %v3545_v45 = vpop.f32.mrb[100].mxu0 }
 0x833   : > { %v8985_v23 = vpop.f32.mrb[101].mxu0 }
 0x834   : > { %v3548_v54 = vpop.f32.mrb[102].mxu0 }
 0x835   : > { %v8986_v5 = vpop.f32.mrb[103].mxu0 }
 0x83a   : > { %v3641_v22 = vpop.f32.mrb[104].mxu0 }
 0x83b   : > { %v8997_v47 = vpop.f32.mrb[105].mxu0 }
 0x83c   : > { %v3644_v31 = vpop.f32.mrb[106].mxu0 }
 0x83d   : > { %v3593_v7 = vpop.f32.mrb[100].mxu1  ;;  %v8998_v9 = vpop.f32.mrb[107].mxu0 }
 0x83e   : > { %v4287_v61 = vcombine.low %v3545_v45, %v3593_v7  ;;  %v8991_v16 = vpop.f32.mrb[101].mxu1 }
 0x83f   : > { %v3596_v55 = vpop.f32.mrb[102].mxu1 }
 0x840   : > { %v8992_v59 = vpop.f32.mrb[103].mxu1 }
 0x845   : > { %v3689_v62 = vpop.f32.mrb[104].mxu1 }
 0x846   : > { %v4288_v53 = vcombine.low %v3641_v22, %v3689_v62  ;;  %v9003_v15 = vpop.f32.mrb[105].mxu1 }
 0x847   : > { %v3692_v26 = vpop.f32.mrb[106].mxu1 }
 0x848   : > { %v11153_v17 = vpack.c.bf16 %v4288_v53, %v4287_v61  ;;  %v9004_v20 = vpop.f32.mrb[107].mxu1 }
 0x849   : > { %v3737_v63 = vpop.f32.mrb[108].mxu0 }
 0x84a   : > { %v9009_v13 = vpop.f32.mrb[109].mxu0 }
 0x84b   : > { %v3740_v56 = vpop.f32.mrb[110].mxu0 }
 0x84c   : > { %v9010_v52 = vpop.f32.mrb[111].mxu0 }
 0x84d   : > { %v3785_v41 = vpop.f32.mrb[108].mxu1 }
 0x84e   : > { %v4289_v18 = vcombine.low %v3737_v63, %v3785_v41  ;;  %v9015_v4 = vpop.f32.mrb[109].mxu1 }
 0x84f   : > { %v3788_v1 = vpop.f32.mrb[110].mxu1 }
 0x850   : > { %v9016_v38 = vpop.f32.mrb[111].mxu1 }
 0x851   : > { %v3833_v49 = vpop.f32.mrb[112].mxu0 }
 0x852   : > { %v9021_v3 = vpop.f32.mrb[113].mxu0 }
 0x853   : > { %v3836_v27 = vpop.f32.mrb[114].mxu0 }
 0x854   : > { %v9022_v0 = vpop.f32.mrb[115].mxu0 }
 0x855   : > { %v3881_v58 = vpop.f32.mrb[112].mxu1 }
 0x856   : > { %v4290_v39 = vcombine.low %v3833_v49, %v3881_v58  ;;  %v9027_v43 = vpop.f32.mrb[113].mxu1 }
 0x857   : > { %v3884_v11 = vpop.f32.mrb[114].mxu1 }
 0x858   : > { %v11155_v36 = vpack.c.bf16 %v4290_v39, %v4289_v18  ;;  %v9028_v29 = vpop.f32.mrb[115].mxu1 }
 0x859   : > { %v3929_v35 = vpop.f32.mrb[116].mxu0 }
 0x85a   : > { %v9033_v33 = vpop.f32.mrb[117].mxu0 }
 0x85b   : > { %v3932_v48 = vpop.f32.mrb[118].mxu0 }
 0x85c   : > { %v9034_v12 = vpop.f32.mrb[119].mxu0 }
 0x85e   : > { %v3977_v2 = vpop.f32.mrb[116].mxu1 }
 0x85f   : > { %v4291_v8 = vcombine.low %v3929_v35, %v3977_v2  ;;  %v9039_v6 = vpop.f32.mrb[117].mxu1 }
 0x860   : > { %v3980_v28 = vpop.f32.mrb[118].mxu1 }
 0x861   : > { %v9040_v57 = vpop.f32.mrb[119].mxu1  ;;  %v4025_v45 = vpop.f32.mrb[120].mxu0 }
 0x862   : > { %v9045_v23 = vpop.f32.mrb[121].mxu0 }
 0x863   : > { %v4028_v54 = vpop.f32.mrb[122].mxu0 }
 0x864   : > { %v9046_v5 = vpop.f32.mrb[123].mxu0 }
 0x866   : > { %v4073_v22 = vpop.f32.mrb[120].mxu1 }
 0x867   : > { %v4292_v47 = vcombine.low %v4025_v45, %v4073_v22  ;;  %v9051_v31 = vpop.f32.mrb[121].mxu1 }
 0x868   : > { %v4076_v7 = vpop.f32.mrb[122].mxu1 }
 0x869   : > { %v11157_v9 = vpack.c.bf16 %v4292_v47, %v4291_v8  ;;  %v9052_v61 = vpop.f32.mrb[123].mxu1  ;;  %v4121_v16 = vpop.f32.mrb[124].mxu0 }
 0x86a   : > { %v9057_v55 = vpop.f32.mrb[125].mxu0 }
 0x86b   : > { %v4124_v59 = vpop.f32.mrb[126].mxu0 }
 0x86c   : > { %v9058_v62 = vpop.f32.mrb[127].mxu0 }
 0x86e   : > { %v4169_v53 = vpop.f32.mrb[124].mxu1 }
 0x86f   : > { %v4293_v15 = vcombine.low %v4121_v16, %v4169_v53  ;;  %v9063_v26 = vpop.f32.mrb[125].mxu1 }
 0x870   : > { %v4172_v20 = vpop.f32.mrb[126].mxu1 }
 0x871   : > { %v9064_v63 = vpop.f32.mrb[127].mxu1 }
 0x897   : > { %v4217_v13 = vpop.f32.mrb[128].mxu0 }
 0x898   : > { %v9069_v56 = vpop.f32.mrb[129].mxu0 }
 0x899   : > { %v4220_v52 = vpop.f32.mrb[130].mxu0 }
 0x89a   : > { %v9070_v41 = vpop.f32.mrb[131].mxu0 }
 0x89f   : > { %v11159_v18 = vpop.f32.mrb[132].mxu0 }
 0x8a0   : > { %v9081_v4 = vpop.f32.mrb[133].mxu0  ;;  %v5128_v1 = vsel %vm1508_vm4, %v11159_v18, -inf }
 0x8a1   : > { %5129 = vmax.xlane.f32.xlu0 %v5128_v1  ;;  %v4375_v38 = vpop.f32.mrb[134].mxu0 }
 0x8a2   : > { %v4265_v49 = vpop.f32.mrb[128].mxu1  ;;  %v9082_v3 = vpop.f32.mrb[135].mxu0 }
 0x8a3   : > { %v4294_v27 = vcombine.low %v4217_v13, %v4265_v49  ;;  %v9075_v0 = vpop.f32.mrb[129].mxu1 }
 0x8a4   : > { %v4268_v58 = vpop.f32.mrb[130].mxu1 }
 0x8a5   : > { %v11163_v39 = vpack.c.bf16 %v4294_v27, %v4293_v15  ;;  %v9076_v43 = vpop.f32.mrb[131].mxu1 }
 0x8a7   : > { %v11165_v11 = vpop.f32.mrb[136].mxu0 }
 0x8a8   : > { %v9093_v29 = vpop.f32.mrb[137].mxu0  ;;  %v5134_v35 = vsel %vm1508_vm4, %v11165_v11, -inf }
 0x8a9   : > { %5135 = vmax.xlane.f32.xlu0 %v5134_v35  ;;  %v4475_v33 = vpop.f32.mrb[138].mxu0 }
 0x8aa   : > { %v11169_v48 = vpop.f32.mrb[132].mxu1  ;;  %v9094_v12 = vpop.f32.mrb[139].mxu0 }
 0x8ab   : > { %v9087_v2 = vpop.f32.mrb[133].mxu1  ;;  %v5131_v8 = vsel %vm1508_vm4, %v11169_v48, -inf }
 0x8ac   : > { %5132 = vmax.xlane.f32.xlu1 %v5131_v8  ;;  %v4425_v6 = vpop.f32.mrb[134].mxu1 }
 0x8ad   : > { %v9088_v28 = vpop.f32.mrb[135].mxu1 }
 0x8af   : > { %v11173_v57 = vpop.f32.mrb[140].mxu0 }
 0x8b0   : > { %v9105_v45 = vpop.f32.mrb[141].mxu0  ;;  %v5140_v16 = vsel %vm1508_vm4, %v11173_v57, -inf }
 0x8b1   : > { %v4575_v23 = vpop.f32.mrb[142].mxu0 }
 0x8b2   : > { %v11175_v54 = vpop.f32.mrb[136].mxu1  ;;  %v9106_v5 = vpop.f32.mrb[143].mxu0 }
 0x8b3   : > { %v9099_v22 = vpop.f32.mrb[137].mxu1  ;;  %v5137_v47 = vsel %vm1508_vm4, %v11175_v54, -inf }
 0x8b4   : > { %v4525_v31 = vpop.f32.mrb[138].mxu1  ;;  %5138 = vmax.xlane.f32.xlu0 %v5137_v47 }
 0x8b5   : > { %v9100_v7 = vpop.f32.mrb[139].mxu1 }
 0x8b7   : > { %v11179_v61 = vpop.f32.mrb[144].mxu0 }
 0x8b8   : > { %5141 = vmax.xlane.f32.xlu0 %v5140_v16  ;;  %v9117_v55 = vpop.f32.mrb[145].mxu0  ;;  %v5146_v20 = vsel %vm1508_vm4, %v11179_v61, -inf }
 0x8b9   : > { %v4675_v59 = vpop.f32.mrb[146].mxu0 }
 0x8ba   : > { %v11183_v62 = vpop.f32.mrb[140].mxu1  ;;  %v9118_v53 = vpop.f32.mrb[147].mxu0 }
 0x8bb   : > { %v9111_v15 = vpop.f32.mrb[141].mxu1  ;;  %v5143_v26 = vsel %vm1508_vm4, %v11183_v62, -inf }
 0x8bc   : > { %5144 = vmax.xlane.f32.xlu1 %v5143_v26  ;;  %v4625_v63 = vpop.f32.mrb[142].mxu1  ;;  %5147 = vmax.xlane.f32.xlu0 %v5146_v20 }
 0x8bd   : > { %v9112_v13 = vpop.f32.mrb[143].mxu1 }
 0x8bf   : > { %v11189_v56 = vpop.f32.mrb[148].mxu0 }
 0x8c0   : > { %v9129_v52 = vpop.f32.mrb[149].mxu0  ;;  %v5152_v41 = vsel %vm1508_vm4, %v11189_v56, -inf }
 0x8c1   : > { %5153 = vmax.xlane.f32.xlu0 %v5152_v41  ;;  %v4775_v4 = vpop.f32.mrb[150].mxu0 }
 0x8c2   : > { %v11193_v1 = vpop.f32.mrb[144].mxu1  ;;  %v9130_v38 = vpop.f32.mrb[151].mxu0 }
 0x8c3   : > { %v9123_v49 = vpop.f32.mrb[145].mxu1  ;;  %v5149_v3 = vsel %vm1508_vm4, %v11193_v1, -inf }
 0x8c4   : > { %5150 = vmax.xlane.f32.xlu1 %v5149_v3  ;;  %v4725_v27 = vpop.f32.mrb[146].mxu1 }
 0x8c5   : > { %v9124_v0 = vpop.f32.mrb[147].mxu1 }
 0x8c7   : > { %v11197_v58 = vpop.f32.mrb[152].mxu0 }
 0x8c8   : > { %v9141_v43 = vpop.f32.mrb[153].mxu0  ;;  %v5158_v29 = vsel %vm1508_vm4, %v11197_v58, -inf }
 0x8c9   : > { %5159 = vmax.xlane.f32.xlu0 %v5158_v29  ;;  %v4875_v35 = vpop.f32.mrb[154].mxu0  ;;  %v11229_v29 = vpop.permute.xlu1 %5464 }
 0x8ca   : > { %v11201_v33 = vpop.f32.mrb[148].mxu1  ;;  %v9142_v12 = vpop.f32.mrb[155].mxu0 }
 0x8cb   : > { %v9135_v2 = vpop.f32.mrb[149].mxu1  ;;  %v5155_v8 = vsel %vm1508_vm4, %v11201_v33, -inf  ;;  %v11231_v35 = vpop.permute.xlu0 %5416 }
 0x8cc   : > { %5156 = vmax.xlane.f32.xlu1 %v5155_v8  ;;  %v4825_v6 = vpop.f32.mrb[150].mxu1 }
 0x8cd   : > { %v9136_v28 = vpop.f32.mrb[151].mxu1  ;;  %v11233_v12 = vpop.permute.xlu1 %5560 }
 0x8cf   : > { %v11205_v45 = vpop.f32.mrb[156].mxu0  ;;  %v11235_v2 = vpop.permute.xlu0 %5512 }
 0x8d0   : > { %v9153_v23 = vpop.f32.mrb[157].mxu0  ;;  %v5164_v5 = vsel %vm1508_vm4, %v11205_v45, -inf }
 0x8d1   : > { %5165 = vmax.xlane.f32.xlu0 %v5164_v5  ;;  %v4975_v22 = vpop.f32.mrb[158].mxu0  ;;  %v11237_v8 = vpop.permute.xlu1 %5656 }
 0x8d2   : > { %v11209_v47 = vpop.f32.mrb[152].mxu1  ;;  %v9154_v31 = vpop.f32.mrb[159].mxu0 }
 0x8d3   : > { %v9147_v7 = vpop.f32.mrb[153].mxu1  ;;  %v5161_v16 = vsel %vm1508_vm4, %v11209_v47, -inf  ;;  %v11239_v6 = vpop.permute.xlu0 %5608 }
 0x8d4   : > { %5162 = vmax.xlane.f32.xlu1 %v5161_v16  ;;  %v4925_v55 = vpop.f32.mrb[154].mxu1 }
 0x8d5   : > { %v9148_v59 = vpop.f32.mrb[155].mxu1  ;;  %v11241_v28 = vpop.permute.xlu1 %5752 }
 0x8d7   : > { %v11213_v53 = vpop.f32.mrb[160].mxu0  ;;  %v11243_v23 = vpop.permute.xlu0 %5704 }
 0x8d8   : > { %v9165_v15 = vpop.f32.mrb[161].mxu0  ;;  %v5170_v26 = vsel %vm1508_vm4, %v11213_v53, -inf }
 0x8d9   : > { %5171 = vmax.xlane.f32.xlu0 %v5170_v26  ;;  %v5075_v20 = vpop.f32.mrb[162].mxu0  ;;  %v11245_v22 = vpop.permute.xlu1 %5800 }
 0x8da   : > { %v11217_v63 = vpop.f32.mrb[156].mxu1  ;;  %v9166_v13 = vpop.f32.mrb[163].mxu0 }
 0x8db   : > { %v9159_v52 = vpop.f32.mrb[157].mxu1  ;;  %v5167_v41 = vsel %vm1508_vm4, %v11217_v63, -inf }
 0x8dc   : > { %5168 = vmax.xlane.f32.xlu1 %v5167_v41  ;;  %v5025_v4 = vpop.f32.mrb[158].mxu1 }
 0x8dd   : > { %v9160_v38 = vpop.f32.mrb[159].mxu1  ;;  %v11248_v16 = vpop.permute.xlu1 %5848 }
 0x8e2   : > { %v11221_v49 = vpop.f32.mrb[160].mxu1 }
 0x8e3   : > { %v9171_v3 = vpop.f32.mrb[161].mxu1  ;;  %v5173_v43 = vsel %vm1508_vm4, %v11221_v49, -inf }
 0x8e4   : > { %v5125_v27 = vpop.f32.mrb[162].mxu1 }
 0x8e5   : > { %v9172_v0 = vpop.f32.mrb[163].mxu1 }
 0x8ed   : > { %5944 = vrot.lane.b32.xlu1 %v10114_v50, %s9814_s28 }
 0x8ef   : > { %5896 = vrot.lane.b32.xlu0 %v10076_v42, %s9814_s28 }
 0x911   : > { %5174 = vmax.xlane.f32.xlu1 %v5173_v43 }
 0x92e   : > { %v5130_v5 = vpop.xlane.xlu0 %5129 }
 0x92f   : > { %v5176_v31 = vsub.f32 %v11159_v18, %v5130_v5 }
 0x931   : > { %v5192_v7 = vmul.f32 1.442695, %v5176_v31 }
 0x933   : > { %9660 = vpow2.f32 %v5192_v7 }
 0x936   : > { %v5136_v55 = vpop.xlane.xlu0 %5135 }
 0x937   : > { %v5178_v59 = vsub.f32 %v11165_v11, %v5136_v55 }
 0x939   : > { %v5196_v15 = vmul.f32 1.442695, %v5178_v59  ;;  %v5133_v26 = vpop.xlane.xlu1 %5132 }
 0x93a   : > { %v5177_v20 = vsub.f32 %v11169_v48, %v5133_v26 }
 0x93b   : > { %9662 = vpow2.f32 %v5196_v15 }
 0x93c   : > { %v5194_v13 = vmul.f32 1.442695, %v5177_v20 }
 0x93d   : > { %v11252_v52 = vpop.eup %9660 }
 0x93e   : > { %9664 = vpow2.f32 %v5194_v13  ;;  %v5224_v41 = vsel %vm1508_vm4, %v11252_v52, 0.0 }
 0x93f   : > { %5225 = vadd.xlane.f32.xlu0 %v5224_v41 }
 0x941   : > { %v5139_v18 = vpop.xlane.xlu0 %5138 }
 0x942   : > { %v5179_v4 = vsub.f32 %v11175_v54, %v5139_v18 }
 0x944   : > { %v5198_v38 = vmul.f32 1.442695, %v5179_v4 }
 0x945   : > { %v11257_v3 = vpop.eup %9662  ;;  %v5142_v11 = vpop.xlane.xlu0 %5141 }
 0x946   : > { %9666 = vpow2.f32 %v5198_v38  ;;  %v5180_v27 = vsub.f32 %v11173_v57, %v5142_v11  ;;  %v5230_v48 = vsel %vm1508_vm4, %v11257_v3, 0.0 }
 0x947   : > { %5231 = vadd.xlane.f32.xlu0 %v5230_v48 }
 0x948   : > { %v11262_v0 = vpop.eup %9664  ;;  %v5200_v43 = vmul.f32 1.442695, %v5180_v27 }
 0x949   : > { %v5145_v5 = vpop.xlane.xlu1 %5144  ;;  %v5148_v31 = vpop.xlane.xlu0 %5147  ;;  %v5227_v7 = vsel %vm1508_vm4, %v11262_v0, 0.0 }
 0x94a   : > { %9668 = vpow2.f32 %v5200_v43  ;;  %v5181_v54 = vsub.f32 %v11183_v62, %v5145_v5  ;;  %v5182_v55 = vsub.f32 %v11179_v61, %v5148_v31  ;;  %5228 = vadd.xlane.f32.xlu1 %v5227_v7 }
 0x94c   : > { %v5202_v59 = vmul.f32 1.442695, %v5181_v54  ;;  %v5204_v57 = vmul.f32 1.442695, %v5182_v55 }
 0x94e   : > { %9670 = vpow2.f32 %v5202_v59  ;;  %v5154_v15 = vpop.xlane.xlu0 %5153 }
 0x94f   : > { %9672 = vpow2.f32 %v5204_v57  ;;  %v5184_v20 = vsub.f32 %v11189_v56, %v5154_v15 }
 0x950   : > { %v11268_v26 = vpop.eup %9666 }
 0x951   : > { %v5151_v13 = vpop.xlane.xlu1 %5150  ;;  %v5233_v41 = vsel %vm1508_vm4, %v11268_v26, 0.0  ;;  %v5208_v61 = vmul.f32 1.442695, %v5184_v20 }
 0x952   : > { %v5183_v18 = vsub.f32 %v11193_v1, %v5151_v13  ;;  %5234 = vadd.xlane.f32.xlu1 %v5233_v41 }
 0x954   : > { %v11274_v62 = vpop.eup %9668  ;;  %v5206_v4 = vmul.f32 1.442695, %v5183_v18 }
 0x955   : > { %v5236_v38 = vsel %vm1508_vm4, %v11274_v62, 0.0 }
 0x956   : > { %9674 = vpow2.f32 %v5206_v4  ;;  %5237 = vadd.xlane.f32.xlu0 %v5236_v38  ;;  %v5160_v11 = vpop.xlane.xlu0 %5159 }
 0x957   : > { %v5186_v27 = vsub.f32 %v11197_v58, %v5160_v11  ;;  %9676 = vpow2.f32 %v5208_v61 }
 0x958   : > { %v11279_v56 = vpop.eup %9670 }
 0x959   : > { %v11281_v48 = vpop.eup %9672  ;;  %v5212_v43 = vmul.f32 1.442695, %v5186_v27  ;;  %v5157_v1 = vpop.xlane.xlu1 %5156  ;;  %v5239_v5 = vsel %vm1508_vm4, %v11279_v56, 0.0 }
 0x95a   : > { %v5185_v31 = vsub.f32 %v11201_v33, %v5157_v1  ;;  %5240 = vadd.xlane.f32.xlu1 %v5239_v5  ;;  %v5242_v7 = vsel %vm1508_vm4, %v11281_v48, 0.0 }
 0x95b   : > { %5243 = vadd.xlane.f32.xlu0 %v5242_v7  ;;  %9678 = vpow2.f32 %v5212_v43 }
 0x95c   : > { %v5210_v54 = vmul.f32 1.442695, %v5185_v31 }
 0x95e   : > { %9680 = vpow2.f32 %v5210_v54  ;;  %v5166_v58 = vpop.xlane.xlu0 %5165 }
 0x95f   : > { %v5188_v55 = vsub.f32 %v11205_v45, %v5166_v58 }
 0x960   : > { %v11289_v59 = vpop.eup %9674 }
 0x961   : > { %v5216_v57 = vmul.f32 1.442695, %v5188_v55  ;;  %v5163_v15 = vpop.xlane.xlu1 %5162  ;;  %v5245_v20 = vsel %vm1508_vm4, %v11289_v59, 0.0  ;;  %v11293_v13 = vpop.eup %9676 }
 0x962   : > { %v5187_v33 = vsub.f32 %v11209_v47, %v5163_v15  ;;  %5246 = vadd.xlane.f32.xlu1 %v5245_v20  ;;  %v5248_v18 = vsel %vm1508_vm4, %v11293_v13, 0.0 }
 0x963   : > { %9682 = vpow2.f32 %v5216_v57 }
 0x964   : > { %v5214_v41 = vmul.f32 1.442695, %v5187_v33 }
 0x965   : > { %v11298_v61 = vpop.eup %9678 }
 0x966   : > { %9684 = vpow2.f32 %v5214_v41  ;;  %5249 = vadd.xlane.f32.xlu1 %v5248_v18  ;;  %v5254_v11 = vsel %vm1508_vm4, %v11298_v61, 0.0  ;;  %v5172_v54 = vpop.xlane.xlu0 %5171 }
 0x967   : > { %v5190_v58 = vsub.f32 %v11213_v53, %v5172_v54 }
 0x968   : > { %v11300_v45 = vpop.eup %9680 }
 0x969   : > { %v5169_v4 = vpop.xlane.xlu1 %5168  ;;  %v5251_v38 = vsel %vm1508_vm4, %v11300_v45, 0.0  ;;  %v5220_v55 = vmul.f32 1.442695, %v5190_v58 }
 0x96a   : > { %v5189_v47 = vsub.f32 %v11217_v63, %v5169_v4  ;;  %5252 = vadd.xlane.f32.xlu0 %v5251_v38  ;;  %5255 = vadd.xlane.f32.xlu1 %v5254_v11 }
 0x96c   : > { %v5218_v27 = vmul.f32 1.442695, %v5189_v47 }
 0x96d   : > { %v11307_v43 = vpop.eup %9682  ;;  %v11324_v57 = vpop.permute.xlu1 %5944 }
 0x96e   : > { %9686 = vpow2.f32 %v5218_v27  ;;  %v5260_v1 = vsel %vm1508_vm4, %v11307_v43, 0.0 }
 0x96f   : > { %5261 = vadd.xlane.f32.xlu1 %v5260_v1  ;;  %9688 = vpow2.f32 %v5220_v55 }
 0x970   : > { %v11311_v5 = vpop.eup %9684 }
 0x971   : > { %v5257_v31 = vsel %vm1508_vm4, %v11311_v5, 0.0 }
 0x972   : > { %5258 = vadd.xlane.f32.xlu0 %v5257_v31 }
 0x978   : > { %v11315_v7 = vpop.eup %9686 }
 0x979   : > { %v5263_v63 = vsel %vm1508_vm4, %v11315_v7, 0.0  ;;  %v11327_v33 = vpop.eup %9688 }
 0x97a   : > { %5264 = vadd.xlane.f32.xlu0 %v5263_v63  ;;  %v5266_v18 = vsel %vm1508_vm4, %v11327_v33, 0.0  ;;  %v5422_v63 = vsel %vm1707_vm3, %v11231_v35, 0 }
 0x980   : > { %6040 = vrot.lane.b32.xlu1 %v10122_v51, %s9814_s28 }
 0x990   : > { %5992 = vrot.lane.b32.xlu0 %v10092_v21, %s9814_s28 }
 0x99e   : > { %v5175_v15 = vpop.xlane.xlu1 %5174 }
 0x99f   : > { %v5191_v20 = vsub.f32 %v11221_v49, %v5175_v15  ;;  %v11347_v49 = vpop.permute.xlu0 %5896 }
 0x9a1   : > { %v5222_v41 = vmul.f32 1.442695, %v5191_v20 }
 0x9a3   : > { %9690 = vpow2.f32 %v5222_v41  ;;  %v5518_v41 = vsel %vm1707_vm3, %v11235_v2, 0 }
 0x9a4   : > { %5267 = vadd.xlane.f32.xlu1 %v5266_v18 }
 0x9ad   : > { %v11331_v4 = vpop.eup %9690 }
 0x9ae   : > { %v5269_v53 = vsel %vm1508_vm4, %v11331_v4, 0.0 }
 0x9af   : > { %5270 = vadd.xlane.f32.xlu0 %v5269_v53 }
 0x9b5   : > { %6197 = vrot.lane.b32.xlu1 %v9991_v14, %s9815_s9 }
 0x9b9   : > { %6195 = vrot.lane.b32.xlu1 %v9991_v14, %s9816_s10 }
 0x9bd   : > { %6297 = vrot.lane.b32.xlu1 %v10029_v30, %s9815_s9 }
 0x9c1   : > { %6295 = vrot.lane.b32.xlu1 %v10029_v30, %s9816_s10 }
 0x9c5   : > { %6147 = vrot.lane.b32.xlu0 %v9984_v10, %s9815_s9  ;;  %6397 = vrot.lane.b32.xlu1 %v10048_v34, %s9815_s9 }
 0x9c9   : > { %6145 = vrot.lane.b32.xlu0 %v9984_v10, %s9816_s10  ;;  %6395 = vrot.lane.b32.xlu1 %v10048_v34, %s9816_s10 }
 0x9cc   : > { %v5226_v38 = vpop.xlane.xlu0 %5225 }
 0x9cd   : > { %9692 = vrcp.f32 %v5226_v38  ;;  %6247 = vrot.lane.b32.xlu0 %v10010_v24, %s9815_s9  ;;  %6497 = vrot.lane.b32.xlu1 %v10063_v40, %s9815_s9 }
 0x9d1   : > { %6245 = vrot.lane.b32.xlu0 %v10010_v24, %s9816_s10  ;;  %6495 = vrot.lane.b32.xlu1 %v10063_v40, %s9816_s10 }
 0x9d4   : > { %v5232_v11 = vpop.xlane.xlu0 %5231 }
 0x9d5   : > { %9694 = vrcp.f32 %v5232_v11  ;;  %6347 = vrot.lane.b32.xlu0 %v10000_v19, %s9815_s9  ;;  %6597 = vrot.lane.b32.xlu1 %v10086_v44, %s9815_s9 }
 0x9d7   : > { %v9693_v47 = vpop.eup %9692  ;;  %v5229_v27 = vpop.xlane.xlu1 %5228 }
 0x9d8   : > { %9696 = vrcp.f32 %v5229_v27  ;;  %v5288_v1 = vmul.f32 %v9693_v47, %v11252_v52  ;;  %v5566_v47 = vsel %vm1707_vm3, %v11233_v12, 0 }
 0x9d9   : > { %6345 = vrot.lane.b32.xlu0 %v10000_v19, %s9816_s10  ;;  %6595 = vrot.lane.b32.xlu1 %v10086_v44, %s9816_s10 }
 0x9da   : > { %v5304_v31 = vpack.c.bf16 %v5288_v1, %v5288_v1 }
 0x9dc   : > { %9176 = vmatmul.mubr.msk.bf16.vlgmr.msra.gmra.mrb[164].mxu0 %vm1703_vm5, %v5304_v31 }
 0x9dd   : > { %9186 = vmatpush3.bf16.msra.mxu0 %v5422_v63  ;;  %6447 = vrot.lane.b32.xlu0 %v10016_v25, %s9815_s9  ;;  %v5614_v63 = vsel %vm1707_vm3, %v11239_v6, 0  ;;  %v5662_v6 = vsel %vm1707_vm3, %v11237_v8, 0  ;;  %v5710_v8 = vsel %vm1707_vm3, %v11243_v23, 0 }
 0x9de   : > { %6697 = vrot.lane.b32.xlu1 %v10102_v46, %s9815_s9  ;;  %9187 = vmatprep.mubr.msk.bf16.mxu0 %vm9806_vm1, %v9805_v60 }
 0x9df   : > { %v9695_v52 = vpop.eup %9694  ;;  %v5235_v54 = vpop.xlane.xlu1 %5234  ;;  %9197 = vmatprep.subr.bf16.mxu0 %v9805_v60 }
 0x9e0   : > { %9698 = vrcp.f32 %v5235_v54  ;;  %v5290_v58 = vmul.f32 %v9695_v52, %v11257_v3 }
 0x9e1   : > { %6445 = vrot.lane.b32.xlu0 %v10016_v25, %s9816_s10 }
 0x9e2   : > { %v9697_v35 = vpop.eup %9696  ;;  %6695 = vrot.lane.b32.xlu1 %v10102_v46, %s9816_s10  ;;  %v5306_v55 = vpack.c.bf16 %v5290_v58, %v5290_v58 }
 0x9e3   : > { %v5238_v15 = vpop.xlane.xlu0 %5237  ;;  %v5289_v20 = vmul.f32 %v9697_v35, %v11262_v0  ;;  %v5470_v0 = vsel %vm1707_vm3, %v11229_v29, 0 }
 0x9e4   : > { %9700 = vrcp.f32 %v5238_v15  ;;  %9188 = vmatmul.mubr.msk.bf16.vlgmr.msra.gmra.mrb[168].mxu0 %vm1703_vm5, %v5306_v55 }
 0x9e5   : > { %9198 = vmatpush3.bf16.msra.mxu0 %v5518_v41  ;;  %6547 = vrot.lane.b32.xlu0 %v10038_v32, %s9815_s9  ;;  %v5305_v3 = vpack.c.bf16 %v5289_v20, %v5289_v20 }
 0x9e6   : > { %6797 = vrot.lane.b32.xlu1 %v10114_v50, %s9815_s9  ;;  %9199 = vmatprep.mubr.msk.bf16.mxu0 %vm9806_vm1, %v9805_v60 }
 0x9e7   : > { %9182 = vmatmul.mubr.msk.bf16.vlgmr.msra.gmra.mrb[164].mxu1 %vm1703_vm5, %v5305_v3  ;;  %v5241_v2 = vpop.xlane.xlu1 %5240  ;;  %9209 = vmatprep.subr.bf16.mxu0 %v9805_v60 }
 0x9e8   : > { %9192 = vmatpush3.bf16.msra.mxu1 %v5470_v0  ;;  %9702 = vrcp.f32 %v5241_v2  ;;  %v5244_v18 = vpop.xlane.xlu0 %5243  ;;  %9193 = vmatprep.mubr.msk.bf16.mxu1 %vm9806_vm1, %v9805_v60  ;;  %v5806_v0 = vsel %vm1707_vm3, %v11245_v22, 0  ;;  %v5854_v22 = vsel %vm1707_vm3, %v11248_v16, 0 }
 0x9e9   : > { %9704 = vrcp.f32 %v5244_v18  ;;  %6545 = vrot.lane.b32.xlu0 %v10038_v32, %s9816_s10  ;;  %9203 = vmatprep.subr.bf16.mxu1 %v9805_v60 }
 0x9ea   : > { %v9699_v53 = vpop.eup %9698  ;;  %6795 = vrot.lane.b32.xlu1 %v10114_v50, %s9816_s10 }
 0x9eb   : > { %v5291_v29 = vmul.f32 %v9699_v53, %v11268_v26 }
 0x9ed   : > { %6647 = vrot.lane.b32.xlu0 %v10057_v37, %s9815_s9  ;;  %v5307_v38 = vpack.c.bf16 %v5291_v29, %v5291_v29 }
 0x9ee   : > { %v9701_v11 = vpop.eup %9700  ;;  %6897 = vrot.lane.b32.xlu1 %v10122_v51, %s9815_s9 }
 0x9ef   : > { %9194 = vmatmul.mubr.msk.bf16.vlgmr.msra.gmra.mrb[168].mxu1 %vm1703_vm5, %v5307_v38  ;;  %v5247_v27 = vpop.xlane.xlu1 %5246  ;;  %v5292_v1 = vmul.f32 %v9701_v11, %v11274_v62  ;;  %v5950_v38 = vsel %vm1707_vm3, %v11324_v57, 0 }
 0x9f0   : > { %9204 = vmatpush3.bf16.msra.mxu1 %v5566_v47  ;;  %9706 = vrcp.f32 %v5247_v27  ;;  %9205 = vmatprep.mubr.msk.bf16.mxu1 %vm9806_vm1, %v9805_v60 }
 0x9f1   : > { %6645 = vrot.lane.b32.xlu0 %v10057_v37, %s9816_s10  ;;  %v5308_v26 = vpack.c.bf16 %v5292_v1, %v5292_v1  ;;  %9215 = vmatprep.subr.bf16.mxu1 %v9805_v60 }
 0x9f2   : > { %v9703_v31 = vpop.eup %9702  ;;  %6895 = vrot.lane.b32.xlu1 %v10122_v51, %s9816_s10 }
 0x9f3   : > { %v9705_v12 = vpop.eup %9704  ;;  %v5250_v62 = vpop.xlane.xlu1 %5249  ;;  %9200 = vmatmul.mubr.msk.bf16.vlgmr.msra.gmra.mrb[172].mxu0 %vm1703_vm5, %v5308_v26  ;;  %v5293_v52 = vmul.f32 %v9703_v31, %v11279_v56 }
 0x9f4   : > { %9708 = vrcp.f32 %v5250_v62  ;;  %9210 = vmatpush3.bf16.msra.mxu0 %v5614_v63  ;;  %9211 = vmatprep.mubr.msk.bf16.mxu0 %vm9806_vm1, %v9805_v60  ;;  %v5294_v58 = vmul.f32 %v9705_v12, %v11281_v48 }
 0x9f5   : > { %6747 = vrot.lane.b32.xlu0 %v10076_v42, %s9815_s9  ;;  %v5309_v54 = vpack.c.bf16 %v5293_v52, %v5293_v52  ;;  %9221 = vmatprep.subr.bf16.mxu0 %v9805_v60 }
 0x9f6   : > { %7185 = vrot.lane.b32.xlu1 %v9991_v14, %s9817_s12  ;;  %v5310_v48 = vpack.c.bf16 %v5294_v58, %v5294_v58 }
 0x9f7   : > { %9206 = vmatmul.mubr.msk.bf16.vlgmr.msra.gmra.mrb[172].mxu1 %vm1703_vm5, %v5309_v54  ;;  %v5256_v56 = vpop.xlane.xlu1 %5255  ;;  %v5253_v35 = vpop.xlane.xlu0 %5252 }
 0x9f8   : > { %9216 = vmatpush3.bf16.msra.mxu1 %v5662_v6  ;;  %9710 = vrcp.f32 %v5256_v56  ;;  %9217 = vmatprep.mubr.msk.bf16.mxu1 %vm9806_vm1, %v9805_v60 }
 0x9f9   : > { %9712 = vrcp.f32 %v5253_v35  ;;  %6745 = vrot.lane.b32.xlu0 %v10076_v42, %s9816_s10  ;;  %9227 = vmatprep.subr.bf16.mxu1 %v9805_v60 }
 0x9fa   : > { %v9707_v14 = vpop.eup %9706  ;;  %7281 = vrot.lane.b32.xlu1 %v10029_v30, %s9817_s12  ;;  %v5758_v30 = vsel %vm1707_vm3, %v11241_v28, 0 }
 0x9fb   : > { %9212 = vmatmul.mubr.msk.bf16.vlgmr.msra.gmra.mrb[176].mxu0 %vm1703_vm5, %v5310_v48  ;;  %v5295_v55 = vmul.f32 %v9707_v14, %v11289_v59 }
 0x9fc   : > { %9222 = vmatpush3.bf16.msra.mxu0 %v5710_v8  ;;  %v5262_v15 = vpop.xlane.xlu1 %5261  ;;  %9223 = vmatprep.mubr.msk.bf16.mxu0 %vm9806_vm1, %v9805_v60 }
 0x9fd   : > { %6847 = vrot.lane.b32.xlu0 %v10092_v21, %s9815_s9  ;;  %v5311_v20 = vpack.c.bf16 %v5295_v55, %v5295_v55  ;;  %9233 = vmatprep.subr.bf16.mxu0 %v9805_v60  ;;  %9714 = vrcp.f32 %v5262_v15 }
 0x9fe   : > { %v9709_v41 = vpop.eup %9708  ;;  %7377 = vrot.lane.b32.xlu1 %v10048_v34, %s9817_s12 }
 0x9ff   : > { %9218 = vmatmul.mubr.msk.bf16.vlgmr.msra.gmra.mrb[176].mxu1 %vm1703_vm5, %v5311_v20  ;;  %v5259_v23 = vpop.xlane.xlu0 %5258  ;;  %v5296_v59 = vmul.f32 %v9709_v41, %v11293_v13 }
 0xa00   : > { %9228 = vmatpush3.bf16.msra.mxu1 %v5758_v30  ;;  %9716 = vrcp.f32 %v5259_v23  ;;  %9229 = vmatprep.mubr.msk.bf16.mxu1 %vm9806_vm1, %v9805_v60  ;;  %v6041_v57 = vpop.permute.xlu1 %6040 }
 0xa01   : > { %6845 = vrot.lane.b32.xlu0 %v10092_v21, %s9816_s10  ;;  %v5312_v3 = vpack.c.bf16 %v5296_v59, %v5296_v59  ;;  %9239 = vmatprep.subr.bf16.mxu1 %v9805_v60 }
 0xa02   : > { %v9711_v34 = vpop.eup %9710  ;;  %7473 = vrot.lane.b32.xlu1 %v10063_v40, %s9817_s12 }
 0xa03   : > { %v9713_v28 = vpop.eup %9712  ;;  %9224 = vmatmul.mubr.msk.bf16.vlgmr.msra.gmra.mrb[180].mxu0 %vm1703_vm5, %v5312_v3  ;;  %v5298_v2 = vmul.f32 %v9711_v34, %v11298_v61 }
 0xa04   : > { %9234 = vmatpush3.bf16.msra.mxu0 %v5806_v0  ;;  %v5297_v13 = vmul.f32 %v9713_v28, %v11300_v45  ;;  %9235 = vmatprep.mubr.msk.bf16.mxu0 %vm9806_vm1, %v9805_v60 }
 0xa05   : > { %7137 = vrot.lane.b32.xlu0 %v9984_v10, %s9817_s12  ;;  %9245 = vmatprep.subr.bf16.mxu0 %v9805_v60  ;;  %v5314_v45 = vpack.c.bf16 %v5298_v2, %v5298_v2  ;;  %v5902_v10 = vsel %vm1707_vm3, %v11347_v49, 0 }
 0xa06   : > { %v5313_v40 = vpack.c.bf16 %v5297_v13, %v5297_v13 }
 0xa07   : > { %v5265_v18 = vpop.xlane.xlu0 %5264  ;;  %v9715_v53 = vpop.eup %9714 }
 0xa08   : > { %9230 = vmatmul.mubr.msk.bf16.vlgmr.msra.gmra.mrb[180].mxu1 %vm1703_vm5, %v5313_v40  ;;  %9718 = vrcp.f32 %v5265_v18 }
 0xa09   : > { %9240 = vmatpush3.bf16.msra.mxu1 %v5854_v22  ;;  %7233 = vrot.lane.b32.xlu0 %v10010_v24, %s9817_s12  ;;  %v5300_v24 = vmul.f32 %v9715_v53, %v11307_v43 }
 0xa0a   : > { %v9717_v29 = vpop.eup %9716  ;;  %9241 = vmatprep.mubr.msk.bf16.mxu1 %vm9806_vm1, %v9805_v60  ;;  %9251 = vmatprep.subr.bf16.mxu1 %v9805_v60 }
 0xa0b   : > { %9236 = vmatmul.mubr.msk.bf16.vlgmr.msra.gmra.mrb[184].mxu0 %vm1703_vm5, %v5314_v45  ;;  %v5299_v16 = vmul.f32 %v9717_v29, %v11311_v5  ;;  %v5993_v49 = vpop.permute.xlu0 %5992  ;;  %v5316_v5 = vpack.c.bf16 %v5300_v24, %v5300_v24 }
 0xa0c   : > { %9246 = vmatpush3.bf16.msra.mxu0 %v5902_v10  ;;  %9247 = vmatprep.mubr.msk.bf16.mxu0 %vm9806_vm1, %v9805_v60  ;;  %v5998_v43 = vsel %vm1707_vm3, %v5993_v49, 0 }
 0xa0d   : > { %7329 = vrot.lane.b32.xlu0 %v10000_v19, %s9817_s12  ;;  %v5315_v61 = vpack.c.bf16 %v5299_v16, %v5299_v16  ;;  %9257 = vmatprep.subr.bf16.mxu0 %v9805_v60 }
 0xa10   : > { %9242 = vmatmul.mubr.msk.bf16.vlgmr.msra.gmra.mrb[184].mxu1 %vm1703_vm5, %v5315_v61 }
 0xa11   : > { %9252 = vmatpush3.bf16.msra.mxu1 %v5950_v38  ;;  %7425 = vrot.lane.b32.xlu0 %v10016_v25, %s9817_s12  ;;  %v6046_v25 = vsel %vm1707_vm3, %v6041_v57, 0 }
 0xa12   : > { %v9719_v11 = vpop.eup %9718  ;;  %9253 = vmatprep.mubr.msk.bf16.mxu1 %vm9806_vm1, %v9805_v60  ;;  %9263 = vmatprep.subr.bf16.mxu1 %v9805_v60 }
 0xa13   : > { %v5301_v19 = vmul.f32 %v9719_v11, %v11315_v7  ;;  %9248 = vmatmul.mubr.msk.bf16.vlgmr.msra.gmra.mrb[188].mxu0 %vm1703_vm5, %v5316_v5 }
 0xa14   : > { %9258 = vmatpush3.bf16.msra.mxu0 %v5998_v43  ;;  %9259 = vmatprep.mubr.msk.bf16.mxu0 %vm9806_vm1, %v9805_v60 }
 0xa15   : > { %v5317_v47 = vpack.c.bf16 %v5301_v19, %v5301_v19  ;;  %9269 = vmatprep.subr.bf16.mxu0 %v9805_v60 }
 0xa18   : > { %9254 = vmatmul.mubr.msk.bf16.vlgmr.msra.gmra.mrb[188].mxu1 %vm1703_vm5, %v5317_v47 }
 0xa19   : > { %9264 = vmatpush3.bf16.msra.mxu1 %v6046_v25  ;;  %9265 = vmatprep.mubr.msk.bf16.mxu1 %vm9806_vm1, %v9805_v60 }
 0xa1a   : > { %9275 = vmatprep.subr.bf16.mxu1 %v9805_v60 }
 0xa31   : > { %v5268_v7 = vpop.xlane.xlu1 %5267 }
 0xa32   : > { %9720 = vrcp.f32 %v5268_v7 }
 0xa35   : > { %v6198_v27 = vpop.permute.xlu1 %6197 }
 0xa36   : > { %v6203_v15 = vsel %vm636_vm2, %v6198_v27, 0 }
 0xa39   : > { %v6196_v1 = vpop.permute.xlu1 %6195 }
 0xa3c   : > { %v9721_v26 = vpop.eup %9720  ;;  %v5271_v31 = vpop.xlane.xlu0 %5270 }
 0xa3d   : > { %v5302_v12 = vmul.f32 %v9721_v26, %v11327_v33  ;;  %9722 = vrcp.f32 %v5271_v31  ;;  %v6298_v63 = vpop.permute.xlu1 %6297 }
 0xa3e   : > { %v6303_v59 = vsel %vm636_vm2, %v6298_v63, 0 }
 0xa3f   : > { %v5318_v62 = vpack.c.bf16 %v5302_v12, %v5302_v12 }
 0xa40   : > { %v6148_v52 = vpop.permute.xlu0 %6147 }
 0xa41   : > { %v6153_v54 = vsel %vm636_vm2, %v6148_v52, 0  ;;  %v6296_v58 = vpop.permute.xlu1 %6295  ;;  %9260 = vmatmul.mubr.msk.bf16.vlgmr.msra.gmra.mrb[192].mxu0 %vm1703_vm5, %v5318_v62 }
 0xa42   : > { %9270 = vmatpush3.bf16.xpose.msra.mxu0 %v6153_v54  ;;  %9271 = vmatprep.mubr.msk.bf16.mxu0 %vm9806_vm1, %v9805_v60 }
 0xa43   : > { %9281 = vmatprep.subr.bf16.mxu0 %v9805_v60 }
 0xa44   : > { %v6146_v6 = vpop.permute.xlu0 %6145 }
 0xa45   : > { %v6398_v56 = vpop.permute.xlu1 %6397 }
 0xa46   : > { %v6403_v13 = vsel %vm636_vm2, %v6398_v56, 0 }
 0xa47   : > { %v9723_v35 = vpop.eup %9722 }
 0xa48   : > { %v5303_v33 = vmul.f32 %v9723_v35, %v11331_v4  ;;  %v6248_v48 = vpop.permute.xlu0 %6247 }
 0xa49   : > { %v6253_v14 = vsel %vm636_vm2, %v6248_v48, 0  ;;  %v6396_v8 = vpop.permute.xlu1 %6395  ;;  %9272 = vmatmul.mubr.msk.bf16.vlgmr.msra.gmra.mrb[196].mxu0 %vm636_vm2, %v6146_v6 }
 0xa4a   : > { %9282 = vmatpush3.bf16.xpose.msra.mxu0 %v6253_v14  ;;  %v5319_v55 = vpack.c.bf16 %v5303_v33, %v5303_v33  ;;  %9283 = vmatprep.mubr.msk.bf16.mxu0 %vm9806_vm1, %v9805_v60 }
 0xa4b   : > { %9293 = vmatprep.subr.bf16.mxu0 %v9805_v60 }
 0xa4c   : > { %9266 = vmatmul.mubr.msk.bf16.vlgmr.msra.gmra.mrb[192].mxu1 %vm1703_vm5, %v5319_v55  ;;  %v6246_v20 = vpop.permute.xlu0 %6245 }
 0xa4d   : > { %9276 = vmatpush3.bf16.xpose.msra.mxu1 %v6203_v15  ;;  %v6498_v4 = vpop.permute.xlu1 %6497  ;;  %9277 = vmatprep.mubr.msk.bf16.mxu1 %vm9806_vm1, %v9805_v60 }
 0xa4e   : > { %9287 = vmatprep.subr.bf16.mxu1 %v9805_v60  ;;  %v6503_v53 = vsel %vm636_vm2, %v6498_v4, 0 }
 0xa50   : > { %v6348_v41 = vpop.permute.xlu0 %6347 }
 0xa51   : > { %v6353_v30 = vsel %vm636_vm2, %v6348_v41, 0  ;;  %9284 = vmatmul.mubr.msk.bf16.vlgmr.msra.gmra.mrb[200].mxu0 %vm636_vm2, %v6246_v20  ;;  %v6496_v23 = vpop.permute.xlu1 %6495 }
 0xa52   : > { %9294 = vmatpush3.bf16.xpose.msra.mxu0 %v6353_v30  ;;  %9295 = vmatprep.mubr.msk.bf16.mxu0 %vm9806_vm1, %v9805_v60 }
 0xa53   : > { %9305 = vmatprep.subr.bf16.mxu0 %v9805_v60 }
 0xa54   : > { %9278 = vmatmul.mubr.msk.bf16.vlgmr.msra.gmra.mrb[196].mxu1 %vm636_vm2, %v6196_v1  ;;  %v6346_v3 = vpop.permute.xlu0 %6345 }
 0xa55   : > { %9288 = vmatpush3.bf16.xpose.msra.mxu1 %v6303_v59  ;;  %9289 = vmatprep.mubr.msk.bf16.mxu1 %vm9806_vm1, %v9805_v60  ;;  %v6598_v28 = vpop.permute.xlu1 %6597 }
 0xa56   : > { %9299 = vmatprep.subr.bf16.mxu1 %v9805_v60  ;;  %v6603_v61 = vsel %vm636_vm2, %v6598_v28, 0 }
 0xa58   : > { %v6448_v34 = vpop.permute.xlu0 %6447 }
 0xa59   : > { %v6453_v0 = vsel %vm636_vm2, %v6448_v34, 0  ;;  %9296 = vmatmul.mubr.msk.bf16.vlgmr.msra.gmra.mrb[204].mxu0 %vm636_vm2, %v6346_v3  ;;  %v6596_v40 = vpop.permute.xlu1 %6595 }
 0xa5a   : > { %9306 = vmatpush3.bf16.xpose.msra.mxu0 %v6453_v0  ;;  %9307 = vmatprep.mubr.msk.bf16.mxu0 %vm9806_vm1, %v9805_v60 }
 0xa5b   : > { %9317 = vmatprep.subr.bf16.mxu0 %v9805_v60 }
 0xa5c   : > { %9290 = vmatmul.mubr.msk.bf16.vlgmr.msra.gmra.mrb[200].mxu1 %vm636_vm2, %v6296_v58  ;;  %v6446_v2 = vpop.permute.xlu0 %6445 }
 0xa5d   : > { %9300 = vmatpush3.bf16.xpose.msra.mxu1 %v6403_v13  ;;  %9301 = vmatprep.mubr.msk.bf16.mxu1 %vm9806_vm1, %v9805_v60  ;;  %v6698_v29 = vpop.permute.xlu1 %6697 }
 0xa5e   : > { %9311 = vmatprep.subr.bf16.mxu1 %v9805_v60  ;;  %v6703_v19 = vsel %vm636_vm2, %v6698_v29, 0 }
 0xa60   : > { %v6548_v18 = vpop.permute.xlu0 %6547 }
 0xa61   : > { %v6553_v22 = vsel %vm636_vm2, %v6548_v18, 0  ;;  %9308 = vmatmul.mubr.msk.bf16.vlgmr.msra.gmra.mrb[208].mxu0 %vm636_vm2, %v6446_v2  ;;  %v6696_v24 = vpop.permute.xlu1 %6695 }
 0xa62   : > { %9318 = vmatpush3.bf16.xpose.msra.mxu0 %v6553_v22  ;;  %9319 = vmatprep.mubr.msk.bf16.mxu0 %vm9806_vm1, %v9805_v60 }
 0xa63   : > { %9329 = vmatprep.subr.bf16.mxu0 %v9805_v60 }
 0xa64   : > { %9302 = vmatmul.mubr.msk.bf16.vlgmr.msra.gmra.mrb[204].mxu1 %vm636_vm2, %v6396_v8  ;;  %v6546_v45 = vpop.permute.xlu0 %6545 }
 0xa65   : > { %9312 = vmatpush3.bf16.xpose.msra.mxu1 %v6503_v53  ;;  %9313 = vmatprep.mubr.msk.bf16.mxu1 %vm9806_vm1, %v9805_v60  ;;  %v6798_v5 = vpop.permute.xlu1 %6797 }
 0xa66   : > { %9323 = vmatprep.subr.bf16.mxu1 %v9805_v60  ;;  %v6803_v7 = vsel %vm636_vm2, %v6798_v5, 0 }
 0xa68   : > { %v6648_v10 = vpop.permute.xlu0 %6647 }
 0xa69   : > { %v6653_v16 = vsel %vm636_vm2, %v6648_v10, 0  ;;  %9320 = vmatmul.mubr.msk.bf16.vlgmr.msra.gmra.mrb[212].mxu0 %vm636_vm2, %v6546_v45  ;;  %v6796_v57 = vpop.permute.xlu1 %6795 }
 0xa6a   : > { %9330 = vmatpush3.bf16.xpose.msra.mxu0 %v6653_v16  ;;  %9331 = vmatprep.mubr.msk.bf16.mxu0 %vm9806_vm1, %v9805_v60 }
 0xa6b   : > { %9341 = vmatprep.subr.bf16.mxu0 %v9805_v60 }
 0xa6c   : > { %9314 = vmatmul.mubr.msk.bf16.vlgmr.msra.gmra.mrb[208].mxu1 %vm636_vm2, %v6496_v23  ;;  %v6646_v38 = vpop.permute.xlu0 %6645 }
 0xa6d   : > { %9324 = vmatpush3.bf16.xpose.msra.mxu1 %v6603_v61  ;;  %9325 = vmatprep.mubr.msk.bf16.mxu1 %vm9806_vm1, %v9805_v60  ;;  %v6898_v1 = vpop.permute.xlu1 %6897 }
 0xa6e   : > { %9335 = vmatprep.subr.bf16.mxu1 %v9805_v60  ;;  %v6903_v63 = vsel %vm636_vm2, %v6898_v1, 0 }
 0xa70   : > { %v6748_v49 = vpop.permute.xlu0 %6747 }
 0xa71   : > { %v6753_v11 = vsel %vm636_vm2, %v6748_v49, 0  ;;  %9332 = vmatmul.mubr.msk.bf16.vlgmr.msra.gmra.mrb[216].mxu0 %vm636_vm2, %v6646_v38  ;;  %v6896_v12 = vpop.permute.xlu1 %6895 }
 0xa72   : > { %9342 = vmatpush3.bf16.xpose.msra.mxu0 %v6753_v11  ;;  %9343 = vmatprep.mubr.msk.bf16.mxu0 %vm9806_vm1, %v9805_v60 }
 0xa73   : > { %9353 = vmatprep.subr.bf16.mxu0 %v9805_v60 }
 0xa74   : > { %9326 = vmatmul.mubr.msk.bf16.vlgmr.msra.gmra.mrb[212].mxu1 %vm636_vm2, %v6596_v40  ;;  %v6746_v43 = vpop.permute.xlu0 %6745 }
 0xa75   : > { %9336 = vmatpush3.bf16.xpose.msra.mxu1 %v6703_v19  ;;  %9337 = vmatprep.mubr.msk.bf16.mxu1 %vm9806_vm1, %v9805_v60  ;;  %v7186_v62 = vpop.permute.xlu1 %7185 }
 0xa76   : > { %9347 = vmatprep.subr.bf16.mxu1 %v9805_v60  ;;  %v7191_v52 = vsel %vm1707_vm3, %v7186_v62, 0 }
 0xa78   : > { %v6848_v47 = vpop.permute.xlu0 %6847 }
 0xa79   : > { %v6853_v25 = vsel %vm636_vm2, %v6848_v47, 0  ;;  %9344 = vmatmul.mubr.msk.bf16.vlgmr.msra.gmra.mrb[220].mxu0 %vm636_vm2, %v6746_v43 }
 0xa7a   : > { %9354 = vmatpush3.bf16.xpose.msra.mxu0 %v6853_v25  ;;  %9355 = vmatprep.mubr.msk.bf16.mxu0 %vm9806_vm1, %v9805_v60 }
 0xa7b   : > { %9365 = vmatprep.subr.bf16.mxu0 %v9805_v60 }
 0xa7c   : > { %9338 = vmatmul.mubr.msk.bf16.vlgmr.msra.gmra.mrb[216].mxu1 %vm636_vm2, %v6696_v24  ;;  %v6846_v27 = vpop.permute.xlu0 %6845 }
 0xa7d   : > { %9348 = vmatpush3.bf16.xpose.msra.mxu1 %v6803_v7  ;;  %9349 = vmatprep.mubr.msk.bf16.mxu1 %vm9806_vm1, %v9805_v60 }
 0xa7e   : > { %9359 = vmatprep.subr.bf16.mxu1 %v9805_v60 }
 0xa80   : > { %v7138_v26 = vpop.permute.xlu0 %7137 }
 0xa81   : > { %v7143_v31 = vsel %vm1707_vm3, %v7138_v26, 0  ;;  %9356 = vmatmul.mubr.msk.bf16.vlgmr.msra.gmra.mrb[224].mxu0 %vm636_vm2, %v6846_v27 }
 0xa82   : > { %9366 = vmatpush3.bf16.msra.mxu0 %v7143_v31  ;;  %9367 = vmatprep.mubr.msk.bf16.mxu0 %vm9806_vm1, %v9805_v60 }
 0xa83   : > { %9377 = vmatprep.subr.bf16.mxu0 %v9805_v60 }
 0xa84   : > { %9350 = vmatmul.mubr.msk.bf16.vlgmr.msra.gmra.mrb[220].mxu1 %vm636_vm2, %v6796_v57 }
 0xa85   : > { %9360 = vmatpush3.bf16.xpose.msra.mxu1 %v6903_v63  ;;  %9361 = vmatprep.mubr.msk.bf16.mxu1 %vm9806_vm1, %v9805_v60 }
 0xa86   : > { %9371 = vmatprep.subr.bf16.mxu1 %v9805_v60 }
 0xa8c   : > { %9362 = vmatmul.mubr.msk.bf16.vlgmr.msra.gmra.mrb[224].mxu1 %vm636_vm2, %v6896_v12 }
 0xa8d   : > { %9372 = vmatpush3.bf16.msra.mxu1 %v7191_v52  ;;  %9373 = vmatprep.mubr.msk.bf16.mxu1 %vm9806_vm1, %v9805_v60 }
 0xa8e   : > { %9383 = vmatprep.subr.bf16.mxu1 %v9805_v60 }
 0xaaf   : > { %v5362_v54 = vpop.f32.mrb[164].mxu0 }
 0xab0   : > { %v9177_v58 = vpop.f32.mrb[165].mxu0 }
 0xab1   : > { %v5365_v6 = vpop.f32.mrb[166].mxu0 }
 0xab2   : > { %v9178_v56 = vpop.f32.mrb[167].mxu0 }
 0xab7   : > { %v5458_v35 = vpop.f32.mrb[168].mxu0 }
 0xab8   : > { %v9189_v33 = vpop.f32.mrb[169].mxu0 }
 0xab9   : > { %v5461_v48 = vpop.f32.mrb[170].mxu0 }
 0xaba   : > { %v5410_v14 = vpop.f32.mrb[164].mxu1  ;;  %v9190_v8 = vpop.f32.mrb[171].mxu0 }
 0xabb   : > { %v6104_v55 = vcombine.low %v5362_v54, %v5410_v14  ;;  %v9183_v15 = vpop.f32.mrb[165].mxu1 }
 0xabc   : > { %v5413_v20 = vpop.f32.mrb[166].mxu1 }
 0xabd   : > { %v9184_v4 = vpop.f32.mrb[167].mxu1 }
 0xac2   : > { %v5506_v41 = vpop.f32.mrb[168].mxu1 }
 0xac3   : > { %v6105_v30 = vcombine.low %v5458_v35, %v5506_v41  ;;  %v9195_v23 = vpop.f32.mrb[169].mxu1 }
 0xac4   : > { %v5509_v59 = vpop.f32.mrb[170].mxu1 }
 0xac5   : > { %v11605_v3 = vpack.c.bf16 %v6105_v30, %v6104_v55  ;;  %v9196_v34 = vpop.f32.mrb[171].mxu1 }
 0xac6   : > { %v5554_v28 = vpop.f32.mrb[172].mxu0 }
 0xac7   : > { %v9201_v0 = vpop.f32.mrb[173].mxu0 }
 0xac8   : > { %v5557_v13 = vpop.f32.mrb[174].mxu0 }
 0xac9   : > { %v9202_v2 = vpop.f32.mrb[175].mxu0 }
 0xaca   : > { %v5602_v40 = vpop.f32.mrb[172].mxu1 }
 0xacb   : > { %v6106_v18 = vcombine.low %v5554_v28, %v5602_v40  ;;  %v9207_v22 = vpop.f32.mrb[173].mxu1 }
 0xacc   : > { %v5605_v53 = vpop.f32.mrb[174].mxu1 }
 0xacd   : > { %v9208_v45 = vpop.f32.mrb[175].mxu1 }
 0xace   : > { %v5650_v29 = vpop.f32.mrb[176].mxu0 }
 0xacf   : > { %v9213_v10 = vpop.f32.mrb[177].mxu0 }
 0xad0   : > { %v5653_v16 = vpop.f32.mrb[178].mxu0 }
 0xad1   : > { %v9214_v24 = vpop.f32.mrb[179].mxu0 }
 0xad2   : > { %v5698_v61 = vpop.f32.mrb[176].mxu1 }
 0xad3   : > { %v6107_v38 = vcombine.low %v5650_v29, %v5698_v61  ;;  %v9219_v49 = vpop.f32.mrb[177].mxu1 }
 0xad4   : > { %v5701_v5 = vpop.f32.mrb[178].mxu1 }
 0xad5   : > { %v11607_v11 = vpack.c.bf16 %v6107_v38, %v6106_v18  ;;  %v9220_v19 = vpop.f32.mrb[179].mxu1 }
 0xad6   : > { %v5746_v43 = vpop.f32.mrb[180].mxu0 }
 0xad7   : > { %v9225_v57 = vpop.f32.mrb[181].mxu0 }
 0xad8   : > { %v5749_v47 = vpop.f32.mrb[182].mxu0 }
 0xad9   : > { %v9226_v25 = vpop.f32.mrb[183].mxu0 }
 0xadb   : > { %v5794_v7 = vpop.f32.mrb[180].mxu1 }
 0xadc   : > { %v6108_v27 = vcombine.low %v5746_v43, %v5794_v7  ;;  %v9231_v1 = vpop.f32.mrb[181].mxu1 }
 0xadd   : > { %v5797_v26 = vpop.f32.mrb[182].mxu1 }
 0xade   : > { %v9232_v31 = vpop.f32.mrb[183].mxu1  ;;  %v5842_v12 = vpop.f32.mrb[184].mxu0 }
 0xadf   : > { %v9237_v63 = vpop.f32.mrb[185].mxu0 }
 0xae0   : > { %v5845_v62 = vpop.f32.mrb[186].mxu0 }
 0xae1   : > { %v9238_v52 = vpop.f32.mrb[187].mxu0 }
 0xae3   : > { %v5890_v54 = vpop.f32.mrb[184].mxu1 }
 0xae4   : > { %v6109_v58 = vcombine.low %v5842_v12, %v5890_v54  ;;  %v9243_v6 = vpop.f32.mrb[185].mxu1 }
 0xae5   : > { %v5893_v56 = vpop.f32.mrb[186].mxu1 }
 0xae6   : > { %v11609_v35 = vpack.c.bf16 %v6109_v58, %v6108_v27  ;;  %v9244_v33 = vpop.f32.mrb[187].mxu1  ;;  %v5938_v48 = vpop.f32.mrb[188].mxu0 }
 0xae7   : > { %v9249_v14 = vpop.f32.mrb[189].mxu0 }
 0xae8   : > { %v5941_v8 = vpop.f32.mrb[190].mxu0 }
 0xae9   : > { %v9250_v55 = vpop.f32.mrb[191].mxu0 }
 0xaeb   : > { %v5986_v15 = vpop.f32.mrb[188].mxu1 }
 0xaec   : > { %v6110_v20 = vcombine.low %v5938_v48, %v5986_v15  ;;  %v9255_v4 = vpop.f32.mrb[189].mxu1 }
 0xaed   : > { %v5989_v41 = vpop.f32.mrb[190].mxu1 }
 0xaee   : > { %v9256_v30 = vpop.f32.mrb[191].mxu1 }
 0xb14   : > { %v6034_v23 = vpop.f32.mrb[192].mxu0 }
 0xb15   : > { %v9261_v59 = vpop.f32.mrb[193].mxu0 }
 0xb16   : > { %v6037_v34 = vpop.f32.mrb[194].mxu0 }
 0xb17   : > { %v9262_v28 = vpop.f32.mrb[195].mxu0 }
 0xb1c   : > { %v11611_v0 = vpop.f32.mrb[196].mxu0 }
 0xb1d   : > { %v9273_v13 = vpop.f32.mrb[197].mxu0  ;;  %v6945_v2 = vsel %vm1508_vm4, %v11611_v0, -inf }
 0xb1e   : > { %6946 = vmax.xlane.f32.xlu0 %v6945_v2  ;;  %v6192_v40 = vpop.f32.mrb[198].mxu0 }
 0xb1f   : > { %v6082_v18 = vpop.f32.mrb[192].mxu1  ;;  %v9274_v22 = vpop.f32.mrb[199].mxu0 }
 0xb20   : > { %v6111_v53 = vcombine.low %v6034_v23, %v6082_v18  ;;  %v9267_v45 = vpop.f32.mrb[193].mxu1 }
 0xb21   : > { %v6085_v29 = vpop.f32.mrb[194].mxu1 }
 0xb22   : > { %v11615_v10 = vpack.c.bf16 %v6111_v53, %v6110_v20  ;;  %v9268_v16 = vpop.f32.mrb[195].mxu1 }
 0xb24   : > { %v11617_v24 = vpop.f32.mrb[200].mxu0 }
 0xb25   : > { %v9285_v61 = vpop.f32.mrb[201].mxu0  ;;  %v6951_v38 = vsel %vm1508_vm4, %v11617_v24, -inf }
 0xb26   : > { %6952 = vmax.xlane.f32.xlu0 %v6951_v38  ;;  %v6292_v49 = vpop.f32.mrb[202].mxu0 }
 0xb27   : > { %v11621_v5 = vpop.f32.mrb[196].mxu1  ;;  %v9286_v19 = vpop.f32.mrb[203].mxu0 }
 0xb28   : > { %v9279_v43 = vpop.f32.mrb[197].mxu1  ;;  %v6948_v57 = vsel %vm1508_vm4, %v11621_v5, -inf }
 0xb29   : > { %6949 = vmax.xlane.f32.xlu1 %v6948_v57  ;;  %v6242_v47 = vpop.f32.mrb[198].mxu1 }
 0xb2a   : > { %v9280_v25 = vpop.f32.mrb[199].mxu1 }
 0xb2c   : > { %v11625_v7 = vpop.f32.mrb[204].mxu0 }
 0xb2d   : > { %v9297_v27 = vpop.f32.mrb[205].mxu0  ;;  %v6957_v58 = vsel %vm1508_vm4, %v11625_v7, -inf }
 0xb2e   : > { %v6392_v1 = vpop.f32.mrb[206].mxu0 }
 0xb2f   : > { %v11627_v26 = vpop.f32.mrb[200].mxu1  ;;  %v9298_v31 = vpop.f32.mrb[207].mxu0 }
 0xb30   : > { %v9291_v12 = vpop.f32.mrb[201].mxu1  ;;  %v6954_v63 = vsel %vm1508_vm4, %v11627_v26, -inf }
 0xb31   : > { %v6342_v62 = vpop.f32.mrb[202].mxu1  ;;  %6955 = vmax.xlane.f32.xlu0 %v6954_v63 }
 0xb32   : > { %v9292_v52 = vpop.f32.mrb[203].mxu1 }
 0xb34   : > { %v11631_v54 = vpop.f32.mrb[208].mxu0 }
 0xb35   : > { %6958 = vmax.xlane.f32.xlu0 %v6957_v58  ;;  %v9309_v6 = vpop.f32.mrb[209].mxu0  ;;  %v6963_v55 = vsel %vm1508_vm4, %v11631_v54, -inf }
 0xb36   : > { %v6492_v56 = vpop.f32.mrb[210].mxu0 }
 0xb37   : > { %v11635_v33 = vpop.f32.mrb[204].mxu1  ;;  %v9310_v48 = vpop.f32.mrb[211].mxu0 }
 0xb38   : > { %v9303_v14 = vpop.f32.mrb[205].mxu1  ;;  %v6960_v8 = vsel %vm1508_vm4, %v11635_v33, -inf }
 0xb39   : > { %6961 = vmax.xlane.f32.xlu1 %v6960_v8  ;;  %v6442_v15 = vpop.f32.mrb[206].mxu1  ;;  %6964 = vmax.xlane.f32.xlu0 %v6963_v55 }
 0xb3a   : > { %v9304_v20 = vpop.f32.mrb[207].mxu1 }
 0xb3c   : > { %v11641_v4 = vpop.f32.mrb[212].mxu0 }
 0xb3d   : > { %v9321_v41 = vpop.f32.mrb[213].mxu0  ;;  %v6969_v30 = vsel %vm1508_vm4, %v11641_v4, -inf }
 0xb3e   : > { %6970 = vmax.xlane.f32.xlu0 %v6969_v30  ;;  %v6592_v23 = vpop.f32.mrb[214].mxu0 }
 0xb3f   : > { %v11645_v59 = vpop.f32.mrb[208].mxu1  ;;  %v9322_v34 = vpop.f32.mrb[215].mxu0 }
 0xb40   : > { %v9315_v28 = vpop.f32.mrb[209].mxu1  ;;  %v6966_v13 = vsel %vm1508_vm4, %v11645_v59, -inf }
 0xb41   : > { %6967 = vmax.xlane.f32.xlu1 %v6966_v13  ;;  %v6542_v2 = vpop.f32.mrb[210].mxu1  ;;  %v11685_v13 = vpop.permute.xlu0 %7233 }
 0xb42   : > { %v9316_v40 = vpop.f32.mrb[211].mxu1 }
 0xb43   : > { %v11689_v40 = vpop.permute.xlu1 %7281 }
 0xb44   : > { %v11649_v18 = vpop.f32.mrb[216].mxu0 }
 0xb45   : > { %v9333_v22 = vpop.f32.mrb[217].mxu0  ;;  %v6975_v53 = vsel %vm1508_vm4, %v11649_v18, -inf  ;;  %v11687_v2 = vpop.permute.xlu0 %7329 }
 0xb46   : > { %6976 = vmax.xlane.f32.xlu0 %v6975_v53  ;;  %v6692_v45 = vpop.f32.mrb[218].mxu0 }
 0xb47   : > { %v11653_v29 = vpop.f32.mrb[212].mxu1  ;;  %v9334_v16 = vpop.f32.mrb[219].mxu0 }
 0xb48   : > { %v9327_v61 = vpop.f32.mrb[213].mxu1  ;;  %v6972_v38 = vsel %vm1508_vm4, %v11653_v29, -inf }
 0xb49   : > { %6973 = vmax.xlane.f32.xlu1 %v6972_v38  ;;  %v6642_v49 = vpop.f32.mrb[214].mxu1 }
 0xb4a   : > { %v9328_v19 = vpop.f32.mrb[215].mxu1 }
 0xb4c   : > { %v11657_v43 = vpop.f32.mrb[220].mxu0 }
 0xb4d   : > { %v9345_v57 = vpop.f32.mrb[221].mxu0  ;;  %v6981_v47 = vsel %vm1508_vm4, %v11657_v43, -inf }
 0xb4e   : > { %6982 = vmax.xlane.f32.xlu0 %v6981_v47  ;;  %v6792_v25 = vpop.f32.mrb[222].mxu0 }
 0xb4f   : > { %v11661_v27 = vpop.f32.mrb[216].mxu1  ;;  %v9346_v1 = vpop.f32.mrb[223].mxu0 }
 0xb50   : > { %v9339_v31 = vpop.f32.mrb[217].mxu1  ;;  %v6978_v12 = vsel %vm1508_vm4, %v11661_v27, -inf }
 0xb51   : > { %6979 = vmax.xlane.f32.xlu1 %v6978_v12  ;;  %v6742_v63 = vpop.f32.mrb[218].mxu1 }
 0xb52   : > { %v9340_v62 = vpop.f32.mrb[219].mxu1 }
 0xb54   : > { %v11665_v52 = vpop.f32.mrb[224].mxu0 }
 0xb55   : > { %v9357_v58 = vpop.f32.mrb[225].mxu0  ;;  %v6987_v6 = vsel %vm1508_vm4, %v11665_v52, -inf }
 0xb56   : > { %6988 = vmax.xlane.f32.xlu0 %v6987_v6  ;;  %v6892_v56 = vpop.f32.mrb[226].mxu0 }
 0xb57   : > { %v11669_v48 = vpop.f32.mrb[220].mxu1  ;;  %v9358_v14 = vpop.f32.mrb[227].mxu0 }
 0xb58   : > { %v9351_v8 = vpop.f32.mrb[221].mxu1  ;;  %v6984_v55 = vsel %vm1508_vm4, %v11669_v48, -inf }
 0xb59   : > { %6985 = vmax.xlane.f32.xlu1 %v6984_v55  ;;  %v6842_v15 = vpop.f32.mrb[222].mxu1 }
 0xb5a   : > { %v9352_v20 = vpop.f32.mrb[223].mxu1 }
 0xb5f   : > { %v11673_v41 = vpop.f32.mrb[224].mxu1 }
 0xb60   : > { %v9363_v30 = vpop.f32.mrb[225].mxu1  ;;  %v6990_v28 = vsel %vm1508_vm4, %v11673_v41, -inf }
 0xb61   : > { %v6942_v23 = vpop.f32.mrb[226].mxu1 }
 0xb62   : > { %v9364_v34 = vpop.f32.mrb[227].mxu1 }
 0xb6a   : > { %7569 = vrot.lane.b32.xlu1 %v10086_v44, %s9817_s12  ;;  %v11691_v44 = vpop.permute.xlu0 %7425 }
 0xb6c   : > { %7521 = vrot.lane.b32.xlu0 %v10038_v32, %s9817_s12  ;;  %v11693_v32 = vpop.permute.xlu1 %7377 }
 0xb6e   : > { %7617 = vrot.lane.b32.xlu1 %v10057_v37, %s9817_s12 }
 0xb72   : > { %7665 = vrot.lane.b32.xlu1 %v10102_v46, %s9817_s12  ;;  %v11696_v46 = vpop.permute.xlu1 %7473 }
 0xb96   : > { %6991 = vmax.xlane.f32.xlu1 %v6990_v28 }
 0xbab   : > { %v6947_v22 = vpop.xlane.xlu0 %6946 }
 0xbac   : > { %v6993_v37 = vsub.f32 %v11611_v0, %v6947_v22 }
 0xbae   : > { %v7009_v53 = vmul.f32 1.442695, %v6993_v37 }
 0xbb0   : > { %9724 = vpow2.f32 %v7009_v53 }
 0xbb3   : > { %v6953_v45 = vpop.xlane.xlu0 %6952 }
 0xbb4   : > { %v6995_v16 = vsub.f32 %v11617_v24, %v6953_v45 }
 0xbb6   : > { %v7013_v61 = vmul.f32 1.442695, %v6995_v16  ;;  %v6950_v38 = vpop.xlane.xlu1 %6949 }
 0xbb7   : > { %v6994_v49 = vsub.f32 %v11621_v5, %v6950_v38 }
 0xbb8   : > { %9726 = vpow2.f32 %v7013_v61 }
 0xbb9   : > { %v7011_v19 = vmul.f32 1.442695, %v6994_v49 }
 0xbba   : > { %v11700_v57 = vpop.eup %9724 }
 0xbbb   : > { %9728 = vpow2.f32 %v7011_v19  ;;  %v7041_v47 = vsel %vm1508_vm4, %v11700_v57, 0.0 }
 0xbbc   : > { %7042 = vadd.xlane.f32.xlu0 %v7041_v47 }
 0xbbe   : > { %v6956_v0 = vpop.xlane.xlu0 %6955 }
 0xbbf   : > { %v6996_v25 = vsub.f32 %v11627_v26, %v6956_v0 }
 0xbc1   : > { %v7015_v1 = vmul.f32 1.442695, %v6996_v25 }
 0xbc2   : > { %v11705_v31 = vpop.eup %9726  ;;  %v6959_v24 = vpop.xlane.xlu0 %6958 }
 0xbc3   : > { %9730 = vpow2.f32 %v7015_v1  ;;  %v6997_v12 = vsub.f32 %v11625_v7, %v6959_v24  ;;  %v7047_v5 = vsel %vm1508_vm4, %v11705_v31, 0.0 }
 0xbc4   : > { %7048 = vadd.xlane.f32.xlu0 %v7047_v5 }
 0xbc5   : > { %v11710_v63 = vpop.eup %9728  ;;  %v7017_v62 = vmul.f32 1.442695, %v6997_v12 }
 0xbc6   : > { %v6962_v58 = vpop.xlane.xlu1 %6961  ;;  %v6965_v6 = vpop.xlane.xlu0 %6964  ;;  %v7044_v56 = vsel %vm1508_vm4, %v11710_v63, 0.0 }
 0xbc7   : > { %9732 = vpow2.f32 %v7017_v62  ;;  %v6998_v26 = vsub.f32 %v11635_v33, %v6962_v58  ;;  %v6999_v14 = vsub.f32 %v11631_v54, %v6965_v6  ;;  %7045 = vadd.xlane.f32.xlu1 %v7044_v56 }
 0xbc9   : > { %v7019_v8 = vmul.f32 1.442695, %v6998_v26  ;;  %v7021_v7 = vmul.f32 1.442695, %v6999_v14 }
 0xbcb   : > { %9734 = vpow2.f32 %v7019_v8  ;;  %v6971_v55 = vpop.xlane.xlu0 %6970 }
 0xbcc   : > { %9736 = vpow2.f32 %v7021_v7  ;;  %v7001_v20 = vsub.f32 %v11641_v4, %v6971_v55 }
 0xbcd   : > { %v11716_v15 = vpop.eup %9730 }
 0xbce   : > { %v6968_v30 = vpop.xlane.xlu1 %6967  ;;  %v7050_v23 = vsel %vm1508_vm4, %v11716_v15, 0.0  ;;  %v7025_v54 = vmul.f32 1.442695, %v7001_v20 }
 0xbcf   : > { %v7000_v34 = vsub.f32 %v11645_v59, %v6968_v30  ;;  %7051 = vadd.xlane.f32.xlu1 %v7050_v23 }
 0xbd1   : > { %v11722_v33 = vpop.eup %9732  ;;  %v7023_v28 = vmul.f32 1.442695, %v7000_v34 }
 0xbd2   : > { %v7053_v22 = vsel %vm1508_vm4, %v11722_v33, 0.0 }
 0xbd3   : > { %9738 = vpow2.f32 %v7023_v28  ;;  %7054 = vadd.xlane.f32.xlu0 %v7053_v22  ;;  %v6977_v37 = vpop.xlane.xlu0 %6976 }
 0xbd4   : > { %v7003_v53 = vsub.f32 %v11649_v18, %v6977_v37  ;;  %9740 = vpow2.f32 %v7025_v54 }
 0xbd5   : > { %v11727_v4 = vpop.eup %9734 }
 0xbd6   : > { %v11729_v45 = vpop.eup %9736  ;;  %v7029_v16 = vmul.f32 1.442695, %v7003_v53  ;;  %v6974_v59 = vpop.xlane.xlu1 %6973  ;;  %v7056_v61 = vsel %vm1508_vm4, %v11727_v4, 0.0 }
 0xbd7   : > { %v7002_v38 = vsub.f32 %v11653_v29, %v6974_v59  ;;  %7057 = vadd.xlane.f32.xlu1 %v7056_v61  ;;  %v7059_v49 = vsel %vm1508_vm4, %v11729_v45, 0.0 }
 0xbd8   : > { %7060 = vadd.xlane.f32.xlu0 %v7059_v49  ;;  %9742 = vpow2.f32 %v7029_v16 }
 0xbd9   : > { %v7027_v19 = vmul.f32 1.442695, %v7002_v38 }
 0xbdb   : > { %9744 = vpow2.f32 %v7027_v19  ;;  %v6983_v56 = vpop.xlane.xlu0 %6982  ;;  %v7239_v19 = vsel %vm1707_vm3, %v11685_v13, 0  ;;  %v7335_v13 = vsel %vm1707_vm3, %v11687_v2, 0 }
 0xbdc   : > { %v7005_v26 = vsub.f32 %v11657_v43, %v6983_v56 }
 0xbdd   : > { %v11736_v18 = vpop.eup %9738 }
 0xbde   : > { %v6980_v47 = vpop.xlane.xlu1 %6979  ;;  %v7062_v0 = vsel %vm1508_vm4, %v11736_v18, 0.0  ;;  %v11740_v25 = vpop.eup %9740  ;;  %v7033_v8 = vmul.f32 1.442695, %v7005_v26 }
 0xbdf   : > { %v7004_v1 = vsub.f32 %v11661_v27, %v6980_v47  ;;  %7063 = vadd.xlane.f32.xlu1 %v7062_v0  ;;  %v7065_v24 = vsel %vm1508_vm4, %v11740_v25, 0.0 }
 0xbe1   : > { %v7031_v29 = vmul.f32 1.442695, %v7004_v1 }
 0xbe2   : > { %v11745_v12 = vpop.eup %9742 }
 0xbe3   : > { %9746 = vpow2.f32 %v7031_v29  ;;  %7066 = vadd.xlane.f32.xlu1 %v7065_v24  ;;  %v7071_v58 = vsel %vm1508_vm4, %v11745_v12, 0.0  ;;  %v6989_v14 = vpop.xlane.xlu0 %6988 }
 0xbe4   : > { %v7007_v7 = vsub.f32 %v11665_v52, %v6989_v14  ;;  %9748 = vpow2.f32 %v7033_v8  ;;  %v7431_v8 = vsel %vm1707_vm3, %v11691_v44, 0 }
 0xbe5   : > { %v11747_v5 = vpop.eup %9744 }
 0xbe6   : > { %v7068_v62 = vsel %vm1508_vm4, %v11747_v5, 0.0  ;;  %v6986_v55 = vpop.xlane.xlu1 %6985  ;;  %v7037_v20 = vmul.f32 1.442695, %v7007_v7 }
 0xbe7   : > { %7069 = vadd.xlane.f32.xlu0 %v7068_v62  ;;  %7072 = vadd.xlane.f32.xlu1 %v7071_v58  ;;  %v7006_v30 = vsub.f32 %v11669_v48, %v6986_v55 }
 0xbe8   : > { %9750 = vpow2.f32 %v7037_v20  ;;  %v7479_v20 = vsel %vm1707_vm3, %v11696_v46, 0 }
 0xbe9   : > { %v7035_v23 = vmul.f32 1.442695, %v7006_v30 }
 0xbea   : > { %v11764_v34 = vpop.permute.xlu1 %7569 }
 0xbeb   : > { %9752 = vpow2.f32 %v7035_v23 }
 0xbed   : > { %v11753_v27 = vpop.eup %9746 }
 0xbee   : > { %v7074_v6 = vsel %vm1508_vm4, %v11753_v27, 0.0  ;;  %v11768_v54 = vpop.permute.xlu1 %7617 }
 0xbef   : > { %7075 = vadd.xlane.f32.xlu0 %v7074_v6 }
 0xbf2   : > { %v11774_v52 = vpop.permute.xlu1 %7665 }
 0xbf8   : > { %7761 = vrot.lane.b32.xlu1 %v10114_v50, %s9817_s12  ;;  %v11766_v50 = vpop.eup %9748 }
 0xbf9   : > { %v11772_v43 = vpop.eup %9750 }
 0xbfa   : > { %v7083_v48 = vsel %vm1508_vm4, %v11772_v43, 0.0  ;;  %v11778_v28 = vpop.eup %9752 }
 0xbfb   : > { %v7080_v37 = vsel %vm1508_vm4, %v11778_v28, 0.0 }
 0xc05   : > { %7713 = vrot.lane.b32.xlu0 %v10076_v42, %s9817_s12  ;;  %v7077_v42 = vsel %vm1508_vm4, %v11766_v50, 0.0 }
 0xc1c   : > { %7078 = vadd.xlane.f32.xlu1 %v7077_v42 }
 0xc20   : > { %7084 = vadd.xlane.f32.xlu1 %v7083_v48 }
 0xc23   : > { %v6992_v22 = vpop.xlane.xlu1 %6991 }
 0xc24   : > { %v7008_v53 = vsub.f32 %v11673_v41, %v6992_v22  ;;  %7081 = vadd.xlane.f32.xlu0 %v7080_v37  ;;  %v11793_v41 = vpop.permute.xlu0 %7521  ;;  %v7575_v22 = vsel %vm1707_vm3, %v11764_v34, 0 }
 0xc25   : > { %v7527_v23 = vsel %vm1707_vm3, %v11793_v41, 0  ;;  %v7623_v41 = vsel %vm1707_vm3, %v11768_v54, 0 }
 0xc26   : > { %v7039_v16 = vmul.f32 1.442695, %v7008_v53 }
 0xc28   : > { %9754 = vpow2.f32 %v7039_v16 }
 0xc31   : > { %7857 = vrot.lane.b32.xlu1 %v10122_v51, %s9817_s12 }
 0xc32   : > { %v11785_v59 = vpop.eup %9754 }
 0xc33   : > { %v7086_v61 = vsel %vm1508_vm4, %v11785_v59, 0.0 }
 0xc34   : > { %7087 = vadd.xlane.f32.xlu0 %v7086_v61 }
 0xc35   : > { %4313 = vrot.lane.b32.xlu1 %v11155_v36, %s9818_s13 }
 0xc39   : > { %6130 = vrot.lane.b32.xlu1 %v11607_v11, %s9819_s14 }
 0xc3d   : > { %4317 = vrot.lane.b32.xlu1 %v11163_v39, %s9818_s13 }
 0xc49   : > { %v7043_v38 = vpop.xlane.xlu0 %7042 }
 0xc4a   : > { %9756 = vrcp.f32 %v7043_v38  ;;  %7809 = vrot.lane.b32.xlu0 %v10092_v21, %s9817_s12  ;;  %s11948_s12 = scalar_lea.vmem %s11985_s8, %s8248_s30 }
 0xc4e   : > { %4311 = vrot.lane.b32.xlu0 %v11153_v17, %s9818_s13 }
 0xc51   : > { %v7049_v51 = vpop.xlane.xlu0 %7048 }
 0xc52   : > { %9758 = vrcp.f32 %v7049_v51  ;;  %6128 = vrot.lane.b32.xlu0 %v11605_v3, %s9819_s14  ;;  %v7671_v51 = vsel %vm1707_vm3, %v11774_v52, 0 }
 0xc54   : > { %v9757_v36 = vpop.eup %9756  ;;  %v7046_v49 = vpop.xlane.xlu1 %7045 }
 0xc55   : > { %v7105_v11 = vmul.f32 %v9757_v36, %v11700_v57  ;;  %9760 = vrcp.f32 %v7046_v49 }
 0xc56   : > { %4315 = vrot.lane.b32.xlu0 %v11157_v9, %s9818_s13 }
 0xc57   : > { %v7121_v39 = vpack.c.bf16 %v7105_v11, %v7105_v11 }
 0xc59   : > { %9368 = vmatmul.mubr.msk.bf16.vlgmr.msra.gmra.mrb[228].mxu0 %vm1703_vm5, %v7121_v39 }
 0xc5a   : > { %9378 = vmatpush3.bf16.msra.mxu0 %v7239_v19  ;;  %9379 = vmatprep.mubr.msk.bf16.mxu0 %vm9806_vm1, %v9805_v60 }
 0xc5b   : > { %9389 = vmatprep.subr.bf16.mxu0 %v9805_v60 }
 0xc5c   : > { %v9759_v21 = vpop.eup %9758  ;;  %v7052_v17 = vpop.xlane.xlu1 %7051 }
 0xc5d   : > { %v7107_v3 = vmul.f32 %v9759_v21, %v11705_v31  ;;  %9762 = vrcp.f32 %v7052_v17  ;;  %v7287_v31 = vsel %vm1707_vm3, %v11689_v40, 0  ;;  %v7383_v40 = vsel %vm1707_vm3, %v11693_v32, 0 }
 0xc5f   : > { %v9761_v57 = vpop.eup %9760  ;;  %v7123_v47 = vpack.c.bf16 %v7107_v3, %v7107_v3 }
 0xc60   : > { %v7106_v9 = vmul.f32 %v9761_v57, %v11710_v63  ;;  %v7055_v0 = vpop.xlane.xlu0 %7054 }
 0xc61   : > { %9764 = vrcp.f32 %v7055_v0  ;;  %9380 = vmatmul.mubr.msk.bf16.vlgmr.msra.gmra.mrb[232].mxu0 %vm1703_vm5, %v7123_v47 }
 0xc62   : > { %9390 = vmatpush3.bf16.msra.mxu0 %v7335_v13  ;;  %v7122_v1 = vpack.c.bf16 %v7106_v9, %v7106_v9  ;;  %9391 = vmatprep.mubr.msk.bf16.mxu0 %vm9806_vm1, %v9805_v60 }
 0xc63   : > { %9401 = vmatprep.subr.bf16.mxu0 %v9805_v60 }
 0xc64   : > { %9374 = vmatmul.mubr.msk.bf16.vlgmr.msra.gmra.mrb[228].mxu1 %vm1703_vm5, %v7122_v1  ;;  %v7058_v63 = vpop.xlane.xlu1 %7057 }
 0xc65   : > { %9384 = vmatpush3.bf16.msra.mxu1 %v7287_v31  ;;  %9766 = vrcp.f32 %v7058_v63  ;;  %v7061_v29 = vpop.xlane.xlu0 %7060  ;;  %9385 = vmatprep.mubr.msk.bf16.mxu1 %vm9806_vm1, %v9805_v60 }
 0xc66   : > { %9768 = vrcp.f32 %v7061_v29  ;;  %9395 = vmatprep.subr.bf16.mxu1 %v9805_v60 }
 0xc67   : > { %v9763_v2 = vpop.eup %9762 }
 0xc68   : > { %v7108_v24 = vmul.f32 %v9763_v2, %v11716_v15 }
 0xc6a   : > { %v7124_v62 = vpack.c.bf16 %v7108_v24, %v7108_v24 }
 0xc6b   : > { %v9765_v58 = vpop.eup %9764 }
 0xc6c   : > { %v7109_v6 = vmul.f32 %v9765_v58, %v11722_v33  ;;  %9386 = vmatmul.mubr.msk.bf16.vlgmr.msra.gmra.mrb[232].mxu1 %vm1703_vm5, %v7124_v62  ;;  %v7064_v56 = vpop.xlane.xlu1 %7063 }
 0xc6d   : > { %9396 = vmatpush3.bf16.msra.mxu1 %v7383_v40  ;;  %9770 = vrcp.f32 %v7064_v56  ;;  %9397 = vmatprep.mubr.msk.bf16.mxu1 %vm9806_vm1, %v9805_v60 }
 0xc6e   : > { %v7125_v26 = vpack.c.bf16 %v7109_v6, %v7109_v6  ;;  %9407 = vmatprep.subr.bf16.mxu1 %v9805_v60 }
 0xc6f   : > { %v9767_v14 = vpop.eup %9766 }
 0xc70   : > { %v9769_v15 = vpop.eup %9768  ;;  %v7110_v32 = vmul.f32 %v9767_v14, %v11727_v4  ;;  %v7067_v7 = vpop.xlane.xlu1 %7066  ;;  %9392 = vmatmul.mubr.msk.bf16.vlgmr.msra.gmra.mrb[236].mxu0 %vm1703_vm5, %v7125_v26 }
 0xc71   : > { %9772 = vrcp.f32 %v7067_v7  ;;  %9402 = vmatpush3.bf16.msra.mxu0 %v7431_v8  ;;  %9403 = vmatprep.mubr.msk.bf16.mxu0 %vm9806_vm1, %v9805_v60  ;;  %v7111_v33 = vmul.f32 %v9769_v15, %v11729_v45 }
 0xc72   : > { %v7126_v55 = vpack.c.bf16 %v7110_v32, %v7110_v32  ;;  %9413 = vmatprep.subr.bf16.mxu0 %v9805_v60 }
 0xc73   : > { %v7127_v30 = vpack.c.bf16 %v7111_v33, %v7111_v33 }
 0xc74   : > { %9398 = vmatmul.mubr.msk.bf16.vlgmr.msra.gmra.mrb[236].mxu1 %vm1703_vm5, %v7126_v55  ;;  %v7073_v44 = vpop.xlane.xlu1 %7072  ;;  %v7070_v4 = vpop.xlane.xlu0 %7069 }
 0xc75   : > { %9408 = vmatpush3.bf16.msra.mxu1 %v7479_v20  ;;  %9774 = vrcp.f32 %v7073_v44  ;;  %9409 = vmatprep.mubr.msk.bf16.mxu1 %vm9806_vm1, %v9805_v60 }
 0xc76   : > { %9776 = vrcp.f32 %v7070_v4  ;;  %9419 = vmatprep.subr.bf16.mxu1 %v9805_v60 }
 0xc77   : > { %v9771_v45 = vpop.eup %9770 }
 0xc78   : > { %v7112_v42 = vmul.f32 %v9771_v45, %v11736_v18  ;;  %9404 = vmatmul.mubr.msk.bf16.vlgmr.msra.gmra.mrb[240].mxu0 %vm1703_vm5, %v7127_v30  ;;  %v7762_v52 = vpop.permute.xlu1 %7761 }
 0xc79   : > { %9414 = vmatpush3.bf16.msra.mxu0 %v7527_v23  ;;  %9415 = vmatprep.mubr.msk.bf16.mxu0 %vm9806_vm1, %v9805_v60  ;;  %v7767_v39 = vsel %vm1707_vm3, %v7762_v52, 0 }
 0xc7a   : > { %v7128_v46 = vpack.c.bf16 %v7112_v42, %v7112_v42  ;;  %9425 = vmatprep.subr.bf16.mxu0 %v9805_v60 }
 0xc7b   : > { %v9773_v48 = vpop.eup %9772 }
 0xc7c   : > { %v7113_v37 = vmul.f32 %v9773_v48, %v11740_v25  ;;  %9410 = vmatmul.mubr.msk.bf16.vlgmr.msra.gmra.mrb[240].mxu1 %vm1703_vm5, %v7128_v46  ;;  %v7076_v53 = vpop.xlane.xlu0 %7075 }
 0xc7d   : > { %9420 = vmatpush3.bf16.msra.mxu1 %v7575_v22  ;;  %9778 = vrcp.f32 %v7076_v53  ;;  %9421 = vmatprep.mubr.msk.bf16.mxu1 %vm9806_vm1, %v9805_v60 }
 0xc7e   : > { %v7129_v18 = vpack.c.bf16 %v7113_v37, %v7113_v37  ;;  %9431 = vmatprep.subr.bf16.mxu1 %v9805_v60 }
 0xc7f   : > { %v9775_v16 = vpop.eup %9774 }
 0xc80   : > { %v9777_v61 = vpop.eup %9776  ;;  %9416 = vmatmul.mubr.msk.bf16.vlgmr.msra.gmra.mrb[244].mxu0 %vm1703_vm5, %v7129_v18  ;;  %v7115_v34 = vmul.f32 %v9775_v16, %v11745_v12  ;;  %v7714_v36 = vpop.permute.xlu0 %7713 }
 0xc81   : > { %v7114_v25 = vmul.f32 %v9777_v61, %v11747_v5  ;;  %9426 = vmatpush3.bf16.msra.mxu0 %v7623_v41  ;;  %9427 = vmatprep.mubr.msk.bf16.mxu0 %vm9806_vm1, %v9805_v60  ;;  %v7719_v12 = vsel %vm1707_vm3, %v7714_v36, 0 }
 0xc82   : > { %9437 = vmatprep.subr.bf16.mxu0 %v9805_v60  ;;  %v7131_v54 = vpack.c.bf16 %v7115_v34, %v7115_v34 }
 0xc83   : > { %v7130_v38 = vpack.c.bf16 %v7114_v25, %v7114_v25  ;;  %v9512_v25 = vld [vmem:[%s11981_s4] sm:$0xff]  }
 0xc85   : > { %9422 = vmatmul.mubr.msk.bf16.vlgmr.msra.gmra.mrb[244].mxu1 %vm1703_vm5, %v7130_v38 }
 0xc86   : > { %9432 = vmatpush3.bf16.msra.mxu1 %v7671_v51  ;;  %9433 = vmatprep.mubr.msk.bf16.mxu1 %vm9806_vm1, %v9805_v60 }
 0xc87   : > { %v9779_v5 = vpop.eup %9778  ;;  %9443 = vmatprep.subr.bf16.mxu1 %v9805_v60 }
 0xc88   : > { %v7116_v49 = vmul.f32 %v9779_v5, %v11753_v27  ;;  %9428 = vmatmul.mubr.msk.bf16.vlgmr.msra.gmra.mrb[248].mxu0 %vm1703_vm5, %v7131_v54  ;;  %v9513_v5 = vld [vmem:[%s11981_s4 + $0x8] sm:$0xff]  }
 0xc89   : > { %9438 = vmatpush3.bf16.msra.mxu0 %v7719_v12  ;;  %9439 = vmatprep.mubr.msk.bf16.mxu0 %vm9806_vm1, %v9805_v60 }
 0xc8a   : > { %v7132_v11 = vpack.c.bf16 %v7116_v49, %v7116_v49  ;;  %9449 = vmatprep.subr.bf16.mxu0 %v9805_v60 }
 0xc8d   : > { %9434 = vmatmul.mubr.msk.bf16.vlgmr.msra.gmra.mrb[248].mxu1 %vm1703_vm5, %v7132_v11 }
 0xc8e   : > { %9444 = vmatpush3.bf16.msra.mxu1 %v7767_v39  ;;  %9445 = vmatprep.mubr.msk.bf16.mxu1 %vm9806_vm1, %v9805_v60 }
 0xc8f   : > { %9455 = vmatprep.subr.bf16.mxu1 %v9805_v60 }
 0xca9   : > { %v7079_v27 = vpop.xlane.xlu1 %7078 }
 0xcaa   : > { %9780 = vrcp.f32 %v7079_v27 }
 0xcad   : > { %v7085_v19 = vpop.xlane.xlu1 %7084 }
 0xcb1   : > { %v7858_v21 = vpop.permute.xlu1 %7857  ;;  %v7082_v17 = vpop.xlane.xlu0 %7081 }
 0xcb2   : > { %9782 = vrcp.f32 %v7082_v17  ;;  %v7863_v29 = vsel %vm1707_vm3, %v7858_v21, 0 }
 0xcb3   : > { %9784 = vrcp.f32 %v7085_v19 }
 0xcb4   : > { %v9781_v3 = vpop.eup %9780 }
 0xcb5   : > { %v7117_v57 = vmul.f32 %v9781_v3, %v11766_v50  ;;  %v4314_v47 = vpop.permute.xlu1 %4313 }
 0xcb6   : > { %4325 = vst.msk [vmem:[#allocation2 + $0x8] sm:$0xff] %vm4323_vm6, %v4314_v47 }
 0xcb7   : > { %v7133_v9 = vpack.c.bf16 %v7117_v57, %v7117_v57 }
 0xcb9   : > { %v6131_v0 = vpop.permute.xlu1 %6130  ;;  %9440 = vmatmul.mubr.msk.bf16.vlgmr.msra.gmra.mrb[252].mxu0 %vm1703_vm5, %v7133_v9 }
 0xcba   : > { %6142 = vst.msk [vmem:[#allocation2 + $0x8] sm:$0xff] %vm6140_vm7, %v6131_v0  ;;  %9451 = vmatprep.mubr.msk.bf16.mxu0 %vm9806_vm1, %v9805_v60 }
 0xcbc   : > { %v9783_v13 = vpop.eup %9782 }
 0xcbd   : > { %v7118_v1 = vmul.f32 %v9783_v13, %v11778_v28  ;;  %v4318_v31 = vpop.permute.xlu1 %4317  ;;  %v9785_v63 = vpop.eup %9784 }
 0xcbe   : > { %4327 = vst.msk [vmem:[#allocation2 + $0x18] sm:$0xff] %vm4323_vm6, %v4318_v31  ;;  %v7119_v24 = vmul.f32 %v9785_v63, %v11772_v43 }
 0xcbf   : > { %v7134_v50 = vpack.c.bf16 %v7118_v1, %v7118_v1 }
 0xcc0   : > { %v7135_v58 = vpack.c.bf16 %v7119_v24, %v7119_v24 }
 0xcc1   : > { %9446 = vmatmul.mubr.msk.bf16.vlgmr.msra.gmra.mrb[252].mxu1 %vm1703_vm5, %v7134_v50  ;;  %v7088_v2 = vpop.xlane.xlu0 %7087 }
 0xcc2   : > { %9456 = vmatpush3.bf16.msra.mxu1 %v7863_v29  ;;  %9786 = vrcp.f32 %v7088_v2  ;;  %9457 = vmatprep.mubr.msk.bf16.mxu1 %vm9806_vm1, %v9805_v60 }
 0xcc5   : > { %v7810_v62 = vpop.permute.xlu0 %7809 }
 0xcc6   : > { %v7815_v28 = vsel %vm1707_vm3, %v7810_v62, 0 }
 0xcc7   : > { %9450 = vmatpush3.bf16.msra.mxu0 %v7815_v28 }
 0xcc8   : > { %9461 = vmatprep.subr.bf16.mxu0 %v9512_v25 }
 0xcc9   : > { %v4312_v40 = vpop.permute.xlu0 %4311 }
 0xcca   : > { %4324 = vst.msk [vmem:[#allocation2] sm:$0xff] %vm4323_vm6, %v4312_v40  ;;  %9452 = vmatmul.mubr.msk.bf16.vlgmr.msra.gmra.mrb[0].mxu0 %vm1703_vm5, %v7135_v58 }
 0xccb   : > { %9462 = vmatpush3.bf16.msra.mxu0 %v9512_v25  ;;  %v9514_v25 = vld [vmem:[%s11983_s6] sm:$0xff]  }
 0xccc   : > { %v9787_v6 = vpop.eup %9786  ;;  %9463 = vmatprep.subr.bf16.mxu0 %v9513_v5  ;;  %9473 = vmatprep.subr.bf16.mxu1 %v9514_v25 }
 0xccd   : > { %v7120_v56 = vmul.f32 %v9787_v6, %v11785_v59  ;;  %v6129_v26 = vpop.permute.xlu0 %6128 }
 0xcce   : > { %6141 = vst.msk [vmem:[#allocation2] sm:$0xff] %vm6140_vm7, %v6129_v26 }
 0xccf   : > { %v7136_v14 = vpack.c.bf16 %v7120_v56, %v7120_v56  ;;  %9464 = vmatpush3.bf16.msra.mxu0 %v9513_v5 }
 0xcd1   : > { %9458 = vmatmul.mubr.msk.bf16.vlgmr.msra.gmra.mrb[0].mxu1 %vm1703_vm5, %v7136_v14  ;;  %v4316_v60 = vpop.permute.xlu0 %4315 }
 0xcd2   : > { %4326 = vst.msk [vmem:[#allocation2 + $0x10] sm:$0xff] %vm4323_vm6, %v4316_v60  ;;  %9474 = vmatpush3.bf16.msra.mxu1 %v9514_v25 }
 0xd2c   : > { %v7179_v43 = vpop.f32.mrb[228].mxu0 }
 0xd2d   : > { %v9369_v15 = vpop.f32.mrb[229].mxu0 }
 0xd2e   : > { %v7182_v8 = vpop.f32.mrb[230].mxu0 }
 0xd2f   : > { %v9370_v32 = vpop.f32.mrb[231].mxu0 }
 0xd34   : > { %v7275_v7 = vpop.f32.mrb[232].mxu0 }
 0xd35   : > { %v9381_v33 = vpop.f32.mrb[233].mxu0 }
 0xd36   : > { %v7278_v55 = vpop.f32.mrb[234].mxu0 }
 0xd37   : > { %v7227_v20 = vpop.f32.mrb[228].mxu1  ;;  %v9382_v44 = vpop.f32.mrb[235].mxu0 }
 0xd38   : > { %v7921_v4 = vcombine.low %v7179_v43, %v7227_v20  ;;  %v9375_v59 = vpop.f32.mrb[229].mxu1 }
 0xd39   : > { %v7230_v30 = vpop.f32.mrb[230].mxu1 }
 0xd3a   : > { %v9376_v45 = vpop.f32.mrb[231].mxu1 }
 0xd3f   : > { %v7323_v23 = vpop.f32.mrb[232].mxu1 }
 0xd40   : > { %v7922_v42 = vcombine.low %v7275_v7, %v7323_v23  ;;  %v9387_v46 = vpop.f32.mrb[233].mxu1 }
 0xd41   : > { %v7326_v48 = vpop.f32.mrb[234].mxu1 }
 0xd42   : > { %v7937_v22 = vpack.c.bf16 %v7922_v42, %v7921_v4  ;;  %v9388_v37 = vpop.f32.mrb[235].mxu1 }
 0xd43   : > { %v7371_v53 = vpop.f32.mrb[236].mxu0 }
 0xd44   : > { %7945 = vrot.lane.b32.xlu0 %v7937_v22, %s9820_s15  ;;  %v9393_v18 = vpop.f32.mrb[237].mxu0 }
 0xd45   : > { %v7374_v16 = vpop.f32.mrb[238].mxu0 }
 0xd46   : > { %v9394_v61 = vpop.f32.mrb[239].mxu0 }
 0xd47   : > { %v7419_v41 = vpop.f32.mrb[236].mxu1 }
 0xd48   : > { %v7923_v34 = vcombine.low %v7371_v53, %v7419_v41  ;;  %v9399_v38 = vpop.f32.mrb[237].mxu1  ;;  %6132 = vrot.lane.b32.xlu0 %v11609_v35, %s9819_s14 }
 0xd49   : > { %v7422_v51 = vpop.f32.mrb[238].mxu1 }
 0xd4a   : > { %v9400_v36 = vpop.f32.mrb[239].mxu1  ;;  %v8391_v51 = vld [vmem:[%s11982_s5] ss:$0 sm:$0xff] }
 0xd4b   : > { %v7467_v54 = vpop.f32.mrb[240].mxu0 }
 0xd4c   : > { %v9405_v49 = vpop.f32.mrb[241].mxu0 }
 0xd4d   : > { %v7470_v12 = vpop.f32.mrb[242].mxu0 }
 0xd4e   : > { %v9406_v52 = vpop.f32.mrb[243].mxu0 }
 0xd4f   : > { %v7515_v11 = vpop.f32.mrb[240].mxu1 }
 0xd50   : > { %v7924_v39 = vcombine.low %v7467_v54, %v7515_v11  ;;  %v9411_v27 = vpop.f32.mrb[241].mxu1 }
 0xd51   : > { %v7518_v19 = vpop.f32.mrb[242].mxu1 }
 0xd52   : > { %v7938_v21 = vpack.c.bf16 %v7924_v39, %v7923_v34  ;;  %v9412_v35 = vpop.f32.mrb[243].mxu1  ;;  %v9515_v34 = vld [vmem:[%s11983_s6 + $0x8] sm:$0xff]  }
 0xd53   : > { %v7563_v17 = vpop.f32.mrb[244].mxu0  ;;  %9475 = vmatprep.subr.bf16.mxu1 %v9515_v34 }
 0xd54   : > { %7947 = vrot.lane.b32.xlu1 %v7938_v21, %s9820_s15  ;;  %v9417_v3 = vpop.f32.mrb[245].mxu0  ;;  %9476 = vmatpush3.bf16.msra.mxu1 %v9515_v34 }
 0xd55   : > { %v7566_v57 = vpop.f32.mrb[246].mxu0 }
 0xd56   : > { %v9418_v47 = vpop.f32.mrb[247].mxu0 }
 0xd58   : > { %v7611_v9 = vpop.f32.mrb[244].mxu1  ;;  %6134 = vrot.lane.b32.xlu1 %v11615_v10, %s9819_s14 }
 0xd59   : > { %v7925_v0 = vcombine.low %v7563_v17, %v7611_v9  ;;  %v9423_v13 = vpop.f32.mrb[245].mxu1 }
 0xd5a   : > { %v7614_v1 = vpop.f32.mrb[246].mxu1 }
 0xd5b   : > { %v9424_v31 = vpop.f32.mrb[247].mxu1  ;;  %v7659_v50 = vpop.f32.mrb[248].mxu0  ;;  %v8398_v1 = vld [vmem:[%s11984_s7] ss:$0 sm:$0xff] }
 0xd5c   : > { %v9429_v63 = vpop.f32.mrb[249].mxu0 }
 0xd5d   : > { %v7662_v29 = vpop.f32.mrb[250].mxu0 }
 0xd5e   : > { %v9430_v2 = vpop.f32.mrb[251].mxu0 }
 0xd60   : > { %v7707_v24 = vpop.f32.mrb[248].mxu1 }
 0xd61   : > { %v7926_v62 = vcombine.low %v7659_v50, %v7707_v24  ;;  %v9435_v28 = vpop.f32.mrb[249].mxu1  ;;  %v9788_v24 = vld [vmem:[%s9882_s11 + $0x10] sm:$0xff] }
 0xd62   : > { %v7710_v58 = vpop.f32.mrb[250].mxu1 }
 0xd63   : > { %v7939_v40 = vpack.c.bf16 %v7926_v62, %v7925_v0  ;;  %v9436_v6 = vpop.f32.mrb[251].mxu1 }
 0xd65   : > { %7949 = vrot.lane.b32.xlu0 %v7939_v40, %s9820_s15  ;;  %v9789_v40 = vld [vmem:[%s9882_s11] sm:$0xff] }
 0xd8c   : > { %v7755_v56 = vpop.f32.mrb[252].mxu0 }
 0xd8d   : > { %v9441_v26 = vpop.f32.mrb[253].mxu0 }
 0xd8e   : > { %v7758_v14 = vpop.f32.mrb[254].mxu0  ;;  %v9790_v26 = vld [vmem:[%s9882_s11 + $0x18] sm:$0xff] }
 0xd8f   : > { %v9442_v10 = vpop.f32.mrb[255].mxu0 }
 0xd90   : > { %v9791_v10 = vld [vmem:[%s9882_s11 + $0x8] sm:$0xff] }
 0xd94   : > { %v7803_v60 = vpop.f32.mrb[252].mxu1 }
 0xd95   : > { %v7927_v43 = vcombine.low %v7755_v56, %v7803_v60  ;;  %v9447_v15 = vpop.f32.mrb[253].mxu1 }
 0xd96   : > { %v7806_v8 = vpop.f32.mrb[254].mxu1 }
 0xd97   : > { %v9448_v32 = vpop.f32.mrb[255].mxu1 }
 0xd9d   : > { %v7851_v7 = vpop.f32.mrb[0].mxu0 }
 0xd9e   : > { %v9453_v33 = vpop.f32.mrb[1].mxu0 }
 0xd9f   : > { %v7854_v55 = vpop.f32.mrb[2].mxu0  ;;  %v9792_v33 = vld [vmem:[%s9882_s11 + $0x30] sm:$0xff] }
 0xda0   : > { %v9454_v20 = vpop.f32.mrb[3].mxu0 }
 0xda4   : > { %v7899_v44 = vpop.f32.mrb[0].mxu1 }
 0xda5   : > { %v7928_v4 = vcombine.low %v7851_v7, %v7899_v44  ;;  %v9459_v59 = vpop.f32.mrb[1].mxu1 }
 0xda6   : > { %v7902_v30 = vpop.f32.mrb[2].mxu1 }
 0xda7   : > { %v7940_v45 = vpack.c.bf16 %v7928_v4, %v7927_v43  ;;  %v9460_v23 = vpop.f32.mrb[3].mxu1  ;;  %v9793_v4 = vld [vmem:[%s9882_s11 + $0x20] sm:$0xff] }
 0xda9   : > { %7951 = vrot.lane.b32.xlu1 %v7940_v45, %s9820_s15  ;;  %v9794_v45 = vld [vmem:[%s9882_s11 + $0x38] sm:$0xff] }
 0xdb6   : > { %v7946_v42 = vpop.permute.xlu0 %7945 }
 0xdb7   : > { %7958 = vst.msk [vmem:[#allocation2] sm:$0xff] %vm7957_vm8, %v7946_v42  ;;  %v9795_v42 = vld [vmem:[%s9882_s11 + $0x28] sm:$0xff] }
 0xdba   : > { %v6133_v46 = vpop.permute.xlu0 %6132 }
 0xdbb   : > { %6143 = vst.msk [vmem:[#allocation2 + $0x10] sm:$0xff] %vm6140_vm7, %v6133_v46 }
 0xdbe   : > { %v7962_v48 = vld [vmem:[#allocation2] sm:$0xff] }
 0xdbf   : > { %9465 = vmatprep.mubr.msk.bf16.mxu0 %vm320_vm0, %v7962_v48 }
 0xdc6   : > { %v7948_v22 = vpop.permute.xlu1 %7947 }
 0xdc7   : > { %7959 = vst.msk [vmem:[#allocation2 + $0x8] sm:$0xff] %vm7957_vm8, %v7948_v22 }
 0xdca   : > { %v6135_v37 = vpop.permute.xlu1 %6134 }
 0xdcb   : > { %6144 = vst.msk [vmem:[#allocation2 + $0x18] sm:$0xff] %vm6140_vm7, %v6135_v37 }
 0xdce   : > { %v7963_v53 = vld [vmem:[#allocation2 + $0x8] sm:$0xff] }
 0xdcf   : > { %9466 = vmatmul.mubr.msk.bf16.vlgmr.msra.gmra.mrb[4].mxu0 %vm320_vm0, %v7963_v53 }
 0xdd7   : > { %v7950_v18 = vpop.permute.xlu0 %7949 }
 0xdd8   : > { %7960 = vst.msk [vmem:[#allocation2 + $0x10] sm:$0xff] %vm7957_vm8, %v7950_v18 }
 0xddf   : > { %v7964_v16 = vld [vmem:[#allocation2 + $0x10] sm:$0xff] }
 0xde0   : > { %9469 = vmatprep.mubr.msk.bf16.mxu0 %vm320_vm0, %v7964_v16 }
 0xe1b   : > { %v7952_v61 = vpop.permute.xlu1 %7951 }
 0xe1c   : > { %7961 = vst.msk [vmem:[#allocation2 + $0x18] sm:$0xff] %vm7957_vm8, %v7952_v61 }
 0xe23   : > { %v7965_v41 = vld [vmem:[#allocation2 + $0x18] sm:$0xff] }
 0xe24   : > { %9470 = vmatmul.mubr.msk.bf16.gmra.mrb[8].mxu0 %vm320_vm0, %v7965_v41 }
 0xea2   : > { %v9467_v38 = vpop.f32.mrb[4].mxu0 }
 0xea3   : > { %v8035_v36 = vpop.f32.mrb[5].mxu0  ;;  %v8044_v5 = vadd.f32 %v9467_v38, %v8391_v51 }
 0xea4   : > { %v9468_v54 = vpop.f32.mrb[6].mxu0  ;;  %v8036_v52 = vadd.f32 %v8391_v51, %v8035_v36 }
 0xea5   : > { %v8047_v49 = vadd.f32 %v9468_v54, %v8391_v51  ;;  %v8038_v12 = vpop.f32.mrb[7].mxu0 }
 0xea6   : > { %v8039_v11 = vadd.f32 %v8391_v51, %v8038_v12 }
 0xea7   : > { %v8067_v39 = vpack.c.bf16 %v8047_v49, %v8044_v5 }
 0xea8   : > { %v8066_v27 = vpack.c.bf16 %v8039_v11, %v8036_v52 }
 0xeaa   : > { %9477 = vmatprep.mubr.msk.bf16.mxu1 %vm320_vm0, %v8066_v27 }
 0xeab   : > { %9478 = vmatmul.mubr.msk.bf16.vlgmr.msra.gmra.mrb[4].mxu1 %vm320_vm0, %v8067_v39 }
 0xef7   : > { %v9471_v19 = vpop.f32.mrb[8].mxu0 }
 0xef8   : > { %v8051_v21 = vpop.f32.mrb[9].mxu0  ;;  %v8060_v17 = vadd.f32 %v9471_v19, %v8391_v51 }
 0xef9   : > { %v9472_v35 = vpop.f32.mrb[10].mxu0  ;;  %v8052_v47 = vadd.f32 %v8391_v51, %v8051_v21 }
 0xefa   : > { %v8063_v3 = vadd.f32 %v9472_v35, %v8391_v51  ;;  %v8054_v57 = vpop.f32.mrb[11].mxu0 }
 0xefb   : > { %v8055_v9 = vadd.f32 %v8391_v51, %v8054_v57 }
 0xefc   : > { %v8069_v0 = vpack.c.bf16 %v8063_v3, %v8060_v17 }
 0xefd   : > { %v8068_v13 = vpack.c.bf16 %v8055_v9, %v8052_v47 }
 0xeff   : > { %9481 = vmatprep.mubr.msk.bf16.mxu1 %vm320_vm0, %v8068_v13 }
 0xf00   : > { %9482 = vmatmul.mubr.msk.bf16.gmra.mrb[8].mxu1 %vm320_vm0, %v8069_v0 }
 0xf7e   : > { %v9479_v31 = vpop.f32.mrb[4].mxu1 }
 0xf7f   : > { %v8148_v50 = vadd.f32 %v9479_v31, %v8398_v1  ;;  %v8139_v63 = vpop.f32.mrb[5].mxu1 }
 0xf80   : > { %v8140_v29 = vadd.f32 %v8398_v1, %v8139_v63  ;;  %v9480_v2 = vpop.f32.mrb[6].mxu1 }
 0xf81   : > { %v8172_v62 = vadd.f32 %v9788_v24, %v8148_v50  ;;  %v8151_v28 = vadd.f32 %v9480_v2, %v8398_v1  ;;  %v8142_v58 = vpop.f32.mrb[7].mxu1 }
 0xf82   : > { %v8170_v6 = vadd.f32 %v9789_v40, %v8140_v29  ;;  %v8143_v56 = vadd.f32 %v8398_v1, %v8142_v58 }
 0xf83   : > { %8180 = vst.msk [vmem:[%s11948_s12 + $0x10] sm:$0xff] %vm320_vm0, %v8172_v62  ;;  %v8173_v14 = vadd.f32 %v9790_v26, %v8151_v28 }
 0xf84   : > { %8178 = vst.msk [vmem:[%s11948_s12] sm:$0xff] %vm320_vm0, %v8170_v6  ;;  %v8171_v60 = vadd.f32 %v9791_v10, %v8143_v56 }
 0xf85   : > { %8181 = vst.msk [vmem:[%s11948_s12 + $0x18] sm:$0xff] %vm320_vm0, %v8173_v14 }
 0xf86   : > { %8179 = vst.msk [vmem:[%s11948_s12 + $0x8] sm:$0xff] %vm320_vm0, %v8171_v60 }
 0xfd3   : > { %v9483_v43 = vpop.f32.mrb[8].mxu1 }
 0xfd4   : > { %v8164_v15 = vadd.f32 %v9483_v43, %v8398_v1  ;;  %v8155_v8 = vpop.f32.mrb[9].mxu1 }
 0xfd5   : > { %v8156_v32 = vadd.f32 %v8398_v1, %v8155_v8  ;;  %v9484_v7 = vpop.f32.mrb[10].mxu1 }
 0xfd6   : > { %v8176_v55 = vadd.f32 %v9792_v33, %v8164_v15  ;;  %v8167_v20 = vadd.f32 %v9484_v7, %v8398_v1  ;;  %v8158_v44 = vpop.f32.mrb[11].mxu1 }
 0xfd7   : > { %v8174_v59 = vadd.f32 %v9793_v4, %v8156_v32  ;;  %v8159_v30 = vadd.f32 %v8398_v1, %v8158_v44 }
 0xfd8   : > { %8184 = vst.msk [vmem:[%s11948_s12 + $0x30] sm:$0xff] %vm320_vm0, %v8176_v55  ;;  %v8177_v23 = vadd.f32 %v9794_v45, %v8167_v20 }
 0xfd9   : > { %8182 = vst.msk [vmem:[%s11948_s12 + $0x20] sm:$0xff] %vm320_vm0, %v8174_v59  ;;  %v8175_v46 = vadd.f32 %v9795_v42, %v8159_v30 }
 0xfda   : > { %8185 = vst.msk [vmem:[%s11948_s12 + $0x38] sm:$0xff] %vm320_vm0, %v8177_v23 }
 0xfdb   : > { %8183 = vst.msk [vmem:[%s11948_s12 + $0x28] sm:$0xff] %vm320_vm0, %v8175_v46 }
 0xfdc PF: > { %s18_s27 = sadd.s32 1, %s9802_s27  }
 0xfdd   : > { %p15_p4 = scmp.ge.s32.totalorder %s18_s27, 4  }
 0xfdf   :  { %17 = sbr.rel (!%p15_p4) target bundleno = 1 (0x1), region = 82 }

</bundles_post_ra>
